<compile_context>
chip_gen: v5e
topology: v5e:2x2
jax: 0.10.0
libtpu: 0.0.40
codegen_flags: <defaults>
</compile_context>

<pallas_src>
import numpy as np
import jax
import jax.numpy as jnp
from jax.experimental import pallas as pl
from jax.experimental.pallas import tpu as pltpu

# ----------------------------- model constants ----------------------------- #
D_IN, H, H2, LATENT = 20, 50, 12, 8
PAD = 128          # lane-padded activation / parameter width
NUM_BN = 9         # number of BatchNorm1d layers
BN_EPS = 1e-5
N_BATCH = 128      # full MXU sublane dimension worth of rows

_VMEM = pl.BlockSpec(memory_space=pltpu.MemorySpace.VMEM)
_SMEM = pl.BlockSpec(memory_space=pltpu.MemorySpace.SMEM)


# ------------------------------ shared VAE body ----------------------------- #
# Weight slab rows : 0 linear1, 1 linear2, 2 linear3, 3 fc1, 4 fc21, 5 fc22,
#                    6 fc3, 7 fc4, 8 linear4, 9 linear5, 10 linear6
# Vector slab rows : 0..8 gammas, 9..17 betas, 18 fc21 bias, 19 fc22 bias
def _vae_body(x, eps, w_ref, vec_ref):
    """Full VAE forward on zero-padded [N, 128] frames.

    x, eps are f32; matmul inputs are bf16 (f32 MXU accumulation); BN math f32.
    Every padded lane of weights/gammas/betas/biases/x/eps is exactly zero, so
    all padded activation lanes stay exactly zero end-to-end.
    """

    def mm(h_bf16, i):
        return jnp.dot(h_bf16, w_ref[i], preferred_element_type=jnp.float32)

    def bn(h, i, relu=True, out_bf16=True):
        # Training-mode BatchNorm1d, single-pass batch stats (biased variance),
        # gamma folded into the [1,128] rsqrt scale.
        gamma = vec_ref[i:i + 1, :]
        beta = vec_ref[NUM_BN + i:NUM_BN + i + 1, :]
        mean = jnp.mean(h, axis=0, keepdims=True)
        var = jnp.mean(h * h, axis=0, keepdims=True) - mean * mean
        scale = gamma * jax.lax.rsqrt(var + BN_EPS)          # [1, PAD]
        y = scale * (h - mean) + beta
        if relu:
            y = jnp.maximum(y, 0.0)
        return y.astype(jnp.bfloat16) if out_bf16 else y

    # -------- encode --------
    h = x.astype(jnp.bfloat16)
    for w_i, bn_i in ((0, 0), (1, 1), (2, 2), (3, 3)):       # linear1..3, fc1
        h = bn(mm(h, w_i), bn_i)

    mu = mm(h, 4) + vec_ref[2 * NUM_BN:2 * NUM_BN + 1, :]            # fc21
    logvar = mm(h, 5) + vec_ref[2 * NUM_BN + 1:2 * NUM_BN + 2, :]    # fc22

    # -------- reparameterize (training mode) --------
    z = (eps * jnp.exp(0.5 * logvar) + mu).astype(jnp.bfloat16)

    # -------- decode --------
    h = z
    for w_i, bn_i in ((6, 4), (7, 5), (8, 6), (9, 7)):       # fc3, fc4, linear4, linear5
        h = bn(mm(h, w_i), bn_i)
    recon = bn(mm(h, 10), 8, relu=False, out_bf16=False)      # linear6 + lin_bn6

    return recon, mu, logvar


def _loss_value(recon, x, mu, logvar):
    """CustomLoss on lane-dense frames: sum((recon-x)^2) - 0.5*sum(1+lv-mu^2-exp(lv)).

    Padded lanes contribute exactly zero (recon/x pads 0; 1 + 0 - 0 - exp(0) = 0),
    so summing the full 128-lane frame equals the unpadded reference.
    """
    diff = recon - x
    kld_terms = 1.0 + logvar - mu * mu - jnp.exp(logvar)
    return jnp.sum(diff * diff - 0.5 * kld_terms)


# --------------------------------- kernels ---------------------------------- #
def vae_loss_kernel(xe_ref, w_ref, vec_ref, loss_ref):
    """Fused VAE forward + CustomLoss; loss only (minimal writeback)."""
    x = xe_ref[0]
    eps = xe_ref[1]
    recon, mu, logvar = _vae_body(x, eps, w_ref, vec_ref)
    loss_ref[0, 0] = _loss_value(recon, x, mu, logvar)


def vae_debug_kernel(xe_ref, w_ref, vec_ref, out_ref, loss_ref):
    """Fused VAE forward + CustomLoss, also emitting the [3,N,128] tensor slab."""
    x = xe_ref[0]
    eps = xe_ref[1]
    recon, mu, logvar = _vae_body(x, eps, w_ref, vec_ref)
    out_ref[0, :, :] = recon
    out_ref[1, :, :] = mu
    out_ref[2, :, :] = logvar
    loss_ref[0, 0] = _loss_value(recon, x, mu, logvar)


def custom_loss_kernel(rx_ref, ml_ref, loss_ref):
    """Standalone CustomLoss (the spec module), lane-dense inputs.

    rx_ref: [2, N, 128] = (x_recon, x) zero-padded; ml_ref: [2, N, 128] = (mu, logvar).
    """
    diff = rx_ref[0] - rx_ref[1]
    mu = ml_ref[0]
    lv = ml_ref[1]
    loss_ref[0, 0] = jnp.sum(diff * diff - 0.5 * (1.0 + lv - mu * mu - jnp.exp(lv)))


# --------------------------------- wrappers --------------------------------- #
def _pack_xe(x, eps):
    n = x.shape[0]
    xe = jnp.zeros((2, n, PAD), jnp.float32)
    xe = xe.at[0, :, :D_IN].set(x)
    xe = xe.at[1, :, :LATENT].set(eps)
    return xe


@jax.jit
def vae_loss(x, eps, w_slab, vec_slab):
    """Production path: one pallas_call, scalar loss only."""
    loss = pl.pallas_call(
        vae_loss_kernel,
        out_shape=jax.ShapeDtypeStruct((1, 1), jnp.float32),
        in_specs=[_VMEM, _VMEM, _VMEM],
        out_specs=_SMEM,
    )(_pack_xe(x, eps), w_slab, vec_slab)
    return loss[0, 0]


@jax.jit
def vae_forward_and_loss(x, eps, w_slab, vec_slab):
    """Verification path: same fused kernel, plus the recon/mu/logvar slab."""
    n = x.shape[0]
    out, loss = pl.pallas_call(
        vae_debug_kernel,
        out_shape=(jax.ShapeDtypeStruct((3, n, PAD), jnp.float32),
                   jax.ShapeDtypeStruct((1, 1), jnp.float32)),
        in_specs=[_VMEM, _VMEM, _VMEM],
        out_specs=(_VMEM, _SMEM),
    )(_pack_xe(x, eps), w_slab, vec_slab)
    return out[0, :, :D_IN], out[1, :, :LATENT], out[2, :, :LATENT], loss[0, 0]


@jax.jit
def custom_loss(x_recon, x, mu, logvar):
    """Standalone spec module: pads inputs to lane-dense [2,N,128] slabs."""
    n = x_recon.shape[0]
    rx = jnp.zeros((2, n, PAD), jnp.float32)
    rx = rx.at[0, :, :x_recon.shape[1]].set(x_recon)
    rx = rx.at[1, :, :x.shape[1]].set(x)
    ml = jnp.zeros((2, n, PAD), jnp.float32)
    ml = ml.at[0, :, :mu.shape[1]].set(mu)
    ml = ml.at[1, :, :logvar.shape[1]].set(logvar)
    loss = pl.pallas_call(
        custom_loss_kernel,
        out_shape=jax.ShapeDtypeStruct((1, 1), jnp.float32),
        in_specs=[_VMEM, _VMEM],
        out_specs=_SMEM,
    )(rx, ml)
    return loss[0, 0]


# ------------------------------ parameter setup ------------------------------ #
def init_params(key):
    """Unpadded synthetic parameters (weights stored (in, out))."""
    wdims = [(D_IN, H), (H, H2), (H2, H2), (H2, LATENT),      # linear1..3, fc1
             (LATENT, LATENT), (LATENT, LATENT),              # fc21, fc22
             (LATENT, LATENT), (LATENT, H2),                  # fc3, fc4
             (H2, H2), (H2, H), (H, D_IN)]                    # linear4..6
    bn_dims = [H, H2, H2, LATENT, LATENT, H2, H2, H, D_IN]
    ws = []
    for fi, fo in wdims:
        key, kw = jax.random.split(key)
        bound = 1.0 / float(np.sqrt(fi))
        ws.append(jax.random.uniform(kw, (fi, fo), jnp.float32, -bound, bound))
    key, k21, k22 = jax.random.split(key, 3)
    bound = 1.0 / float(np.sqrt(LATENT))
    b21 = jax.random.uniform(k21, (1, LATENT), jnp.float32, -bound, bound)
    b22 = jax.random.uniform(k22, (1, LATENT), jnp.float32, -bound, bound)
    gs, bs = [], []
    for d in bn_dims:
        key, kg, kb = jax.random.split(key, 3)
        gs.append(1.0 + 0.1 * jax.random.normal(kg, (1, d), jnp.float32))
        bs.append(0.1 * jax.random.normal(kb, (1, d), jnp.float32))
    return ws, b21, b22, gs, bs


def pack_params(ws, b21, b22, gs, bs):
    """Pack everything into one bf16 weight slab and one f32 vector slab.

    NOTE (correctness invariant): every padded lane/row is zero by construction;
    the kernel's lane-dense design (zero activation pads, zero KLD pad terms)
    relies on this.
    """
    w_slab = jnp.zeros((len(ws), PAD, PAD), jnp.float32)
    for i, w in enumerate(ws):
        w_slab = w_slab.at[i, :w.shape[0], :w.shape[1]].set(w)
    w_slab = w_slab.astype(jnp.bfloat16)

    vec_slab = jnp.zeros((2 * NUM_BN + 2, PAD), jnp.float32)
    for i, g in enumerate(gs):
        vec_slab = vec_slab.at[i, :g.shape[1]].set(g[0])
    for i, b in enumerate(bs):
        vec_slab = vec_slab.at[NUM_BN + i, :b.shape[1]].set(b[0])
    vec_slab = vec_slab.at[2 * NUM_BN, :LATENT].set(b21[0])
    vec_slab = vec_slab.at[2 * NUM_BN + 1, :LATENT].set(b22[0])
    return w_slab, vec_slab


# ----------------------------- pure-JAX references --------------------------- #
def _ref_mm(h, w):
    return jnp.dot(h.astype(jnp.bfloat16), w.astype(jnp.bfloat16),
                   preferred_element_type=jnp.float32)


def _ref_bn(h, g, b, relu=True, out_bf16=True):
    mean = jnp.mean(h, axis=0, keepdims=True)
    var = jnp.mean(h * h, axis=0, keepdims=True) - mean * mean
    y = (g * jax.lax.rsqrt(var + BN_EPS)) * (h - mean) + b
    if relu:
        y = jnp.maximum(y, 0.0)
    return y.astype(jnp.bfloat16) if out_bf16 else y


def vae_reference(x, eps, ws, b21, b22, gs, bs):
    h = x
    h = _ref_bn(_ref_mm(h, ws[0]), gs[0], bs[0])
    h = _ref_bn(_ref_mm(h, ws[1]), gs[1], bs[1])
    h = _ref_bn(_ref_mm(h, ws[2]), gs[2], bs[2])
    h = _ref_bn(_ref_mm(h, ws[3]), gs[3], bs[3])
    mu = _ref_mm(h, ws[4]) + b21
    logvar = _ref_mm(h, ws[5]) + b22
    z = eps * jnp.exp(0.5 * logvar) + mu
    h = _ref_bn(_ref_mm(z, ws[6]), gs[4], bs[4])
    h = _ref_bn(_ref_mm(h, ws[7]), gs[5], bs[5])
    h = _ref_bn(_ref_mm(h, ws[8]), gs[6], bs[6])
    h = _ref_bn(_ref_mm(h, ws[9]), gs[7], bs[7])
    recon = _ref_bn(_ref_mm(h, ws[10]), gs[8], bs[8], relu=False, out_bf16=False)
    return recon, mu, logvar


def custom_loss_reference(x_recon, x, mu, logvar):
    mse = jnp.sum((x_recon - x) ** 2)
    kld = -0.5 * jnp.sum(1.0 + logvar - mu ** 2 - jnp.exp(logvar))
    return mse + kld


# ------------------------------------ main ----------------------------------- #
if __name__ == "__main__":
    key = jax.random.PRNGKey(0)
    kx, keps, kp = jax.random.split(key, 3)
    x = jax.random.normal(kx, (N_BATCH, D_IN), jnp.float32)
    eps = jax.random.normal(keps, (N_BATCH, LATENT), jnp.float32)
    ws, b21, b22, gs, bs = init_params(kp)
    w_slab, vec_slab = pack_params(ws, b21, b22, gs, bs)

    # Fused path with tensor slab (for verification).
    recon, mu, logvar, loss_dbg = jax.block_until_ready(
        vae_forward_and_loss(x, eps, w_slab, vec_slab))
    # Fused production path: loss only, no tensor writeback.
    loss_fused = jax.block_until_ready(vae_loss(x, eps, w_slab, vec_slab))
    # Standalone CustomLoss kernel (the spec module) on the kernel's own tensors.
    loss_standalone = jax.block_until_ready(custom_loss(recon, x, mu, logvar))

    # VAE tensors vs same-recipe pure-JAX reference (covers bf16 re-rounding).
    r_recon, r_mu, r_logvar = vae_reference(x, eps, ws, b21, b22, gs, bs)
    np.testing.assert_allclose(np.asarray(recon), np.asarray(r_recon), rtol=2e-2, atol=2e-2)
    np.testing.assert_allclose(np.asarray(mu), np.asarray(r_mu), rtol=2e-2, atol=2e-2)
    np.testing.assert_allclose(np.asarray(logvar), np.asarray(r_logvar), rtol=2e-2, atol=2e-2)

    # CustomLoss semantics: exact f32 reference formula on the kernel's tensors.
    r_loss = np.asarray(custom_loss_reference(recon, x, mu, logvar))
    np.testing.assert_allclose(np.asarray(loss_standalone), r_loss, rtol=2e-3, atol=1e-1)
    np.testing.assert_allclose(np.asarray(loss_dbg), r_loss, rtol=2e-3, atol=1e-1)
    np.testing.assert_allclose(np.asarray(loss_fused), np.asarray(loss_dbg),
                               rtol=1e-4, atol=1e-2)

    print("KERNEL_OK")
</pallas_src>

<mosaic_0001>
module attributes {stable_mosaic.version = 11 : i64} {
  func.func @vae_debug_kernel(%arg0: memref<2x128x128xf32, #tpu.memory_space<vmem>>, %arg1: memref<11x128x128xbf16, #tpu.memory_space<vmem>>, %arg2: memref<20x128xf32, #tpu.memory_space<vmem>>, %arg3: memref<3x128x128xf32, #tpu.memory_space<vmem>>, %arg4: memref<1x1xf32, #tpu.memory_space<smem>>) attributes {dimension_semantics = [], scalar_prefetch = 0 : i64, scratch_operands = 0 : i64, tpu.core_type = #tpu.core_type<tc>} {
    %c0 = arith.constant 0 : index
    %c0_0 = arith.constant 0 : index
    %c0_1 = arith.constant 0 : index
    %0 = vector.load %arg0[%c0, %c0_0, %c0_1] : memref<2x128x128xf32, #tpu.memory_space<vmem>>, vector<1x128x128xf32>
    %1 = vector.shape_cast %0 : vector<1x128x128xf32> to vector<128x128xf32>
    %c1 = arith.constant 1 : index
    %c0_2 = arith.constant 0 : index
    %c0_3 = arith.constant 0 : index
    %2 = vector.load %arg0[%c1, %c0_2, %c0_3] : memref<2x128x128xf32, #tpu.memory_space<vmem>>, vector<1x128x128xf32>
    %3 = vector.shape_cast %2 : vector<1x128x128xf32> to vector<128x128xf32>
    %4 = arith.truncf %1 : vector<128x128xf32> to vector<128x128xbf16>
    %c0_4 = arith.constant 0 : index
    %c0_5 = arith.constant 0 : index
    %c0_6 = arith.constant 0 : index
    %5 = vector.load %arg1[%c0_4, %c0_5, %c0_6] : memref<11x128x128xbf16, #tpu.memory_space<vmem>>, vector<1x128x128xbf16>
    %6 = vector.shape_cast %5 : vector<1x128x128xbf16> to vector<128x128xbf16>
    %cst = arith.constant dense<0.000000e+00> : vector<128x128xf32>
    %7 = tpu.matmul %4, %6, %cst {dimension_numbers = #tpu.dot_dimension_numbers<[1], [0], [0], [1], [0, 0, 1, 1], [], []>} : vector<128x128xbf16>, vector<128x128xbf16>, vector<128x128xf32> -> vector<128x128xf32>
    %c0_7 = arith.constant 0 : index
    %c0_8 = arith.constant 0 : index
    %8 = vector.load %arg2[%c0_7, %c0_8] : memref<20x128xf32, #tpu.memory_space<vmem>>, vector<1x128xf32>
    %c9 = arith.constant 9 : index
    %c0_9 = arith.constant 0 : index
    %9 = vector.load %arg2[%c9, %c0_9] : memref<20x128xf32, #tpu.memory_space<vmem>>, vector<1x128xf32>
    %cst_10 = arith.constant dense<0.000000e+00> : vector<128xf32>
    %10 = vector.multi_reduction <add>, %7, %cst_10 [0] : vector<128x128xf32> to vector<128xf32>
    %11 = vector.shape_cast %10 : vector<128xf32> to vector<1x128xf32>
    %cst_11 = arith.constant 1.280000e+02 : f32
    %12 = vector.broadcast %cst_11 : f32 to vector<1x128xf32>
    %13 = arith.divf %11, %12 : vector<1x128xf32>
    %14 = arith.mulf %7, %7 : vector<128x128xf32>
    %cst_12 = arith.constant dense<0.000000e+00> : vector<128xf32>
    %15 = vector.multi_reduction <add>, %14, %cst_12 [0] : vector<128x128xf32> to vector<128xf32>
    %16 = vector.shape_cast %15 : vector<128xf32> to vector<1x128xf32>
    %cst_13 = arith.constant 1.280000e+02 : f32
    %17 = vector.broadcast %cst_13 : f32 to vector<1x128xf32>
    %18 = arith.divf %16, %17 : vector<1x128xf32>
    %19 = arith.mulf %13, %13 : vector<1x128xf32>
    %20 = arith.subf %18, %19 : vector<1x128xf32>
    %cst_14 = arith.constant 9.99999974E-6 : f32
    %21 = vector.broadcast %cst_14 : f32 to vector<1x128xf32>
    %22 = arith.addf %20, %21 : vector<1x128xf32>
    %23 = math.rsqrt %22 : vector<1x128xf32>
    %24 = arith.mulf %8, %23 : vector<1x128xf32>
    %25 = vector.broadcast %13 : vector<1x128xf32> to vector<128x128xf32>
    %26 = arith.subf %7, %25 : vector<128x128xf32>
    %27 = vector.broadcast %24 : vector<1x128xf32> to vector<128x128xf32>
    %28 = arith.mulf %27, %26 : vector<128x128xf32>
    %29 = vector.broadcast %9 : vector<1x128xf32> to vector<128x128xf32>
    %30 = arith.addf %28, %29 : vector<128x128xf32>
    %cst_15 = arith.constant 0.000000e+00 : f32
    %31 = vector.broadcast %cst_15 : f32 to vector<128x128xf32>
    %32 = arith.maximumf %30, %31 : vector<128x128xf32>
    %33 = arith.truncf %32 : vector<128x128xf32> to vector<128x128xbf16>
    %c1_16 = arith.constant 1 : index
    %c0_17 = arith.constant 0 : index
    %c0_18 = arith.constant 0 : index
    %34 = vector.load %arg1[%c1_16, %c0_17, %c0_18] : memref<11x128x128xbf16, #tpu.memory_space<vmem>>, vector<1x128x128xbf16>
    %35 = vector.shape_cast %34 : vector<1x128x128xbf16> to vector<128x128xbf16>
    %cst_19 = arith.constant dense<0.000000e+00> : vector<128x128xf32>
    %36 = tpu.matmul %33, %35, %cst_19 {dimension_numbers = #tpu.dot_dimension_numbers<[1], [0], [0], [1], [0, 0, 1, 1], [], []>} : vector<128x128xbf16>, vector<128x128xbf16>, vector<128x128xf32> -> vector<128x128xf32>
    %c1_20 = arith.constant 1 : index
    %c0_21 = arith.constant 0 : index
    %37 = vector.load %arg2[%c1_20, %c0_21] : memref<20x128xf32, #tpu.memory_space<vmem>>, vector<1x128xf32>
    %c10 = arith.constant 10 : index
    %c0_22 = arith.constant 0 : index
    %38 = vector.load %arg2[%c10, %c0_22] : memref<20x128xf32, #tpu.memory_space<vmem>>, vector<1x128xf32>
    %cst_23 = arith.constant dense<0.000000e+00> : vector<128xf32>
    %39 = vector.multi_reduction <add>, %36, %cst_23 [0] : vector<128x128xf32> to vector<128xf32>
    %40 = vector.shape_cast %39 : vector<128xf32> to vector<1x128xf32>
    %cst_24 = arith.constant 1.280000e+02 : f32
    %41 = vector.broadcast %cst_24 : f32 to vector<1x128xf32>
    %42 = arith.divf %40, %41 : vector<1x128xf32>
    %43 = arith.mulf %36, %36 : vector<128x128xf32>
    %cst_25 = arith.constant dense<0.000000e+00> : vector<128xf32>
    %44 = vector.multi_reduction <add>, %43, %cst_25 [0] : vector<128x128xf32> to vector<128xf32>
    %45 = vector.shape_cast %44 : vector<128xf32> to vector<1x128xf32>
    %cst_26 = arith.constant 1.280000e+02 : f32
    %46 = vector.broadcast %cst_26 : f32 to vector<1x128xf32>
    %47 = arith.divf %45, %46 : vector<1x128xf32>
    %48 = arith.mulf %42, %42 : vector<1x128xf32>
    %49 = arith.subf %47, %48 : vector<1x128xf32>
    %cst_27 = arith.constant 9.99999974E-6 : f32
    %50 = vector.broadcast %cst_27 : f32 to vector<1x128xf32>
    %51 = arith.addf %49, %50 : vector<1x128xf32>
    %52 = math.rsqrt %51 : vector<1x128xf32>
    %53 = arith.mulf %37, %52 : vector<1x128xf32>
    %54 = vector.broadcast %42 : vector<1x128xf32> to vector<128x128xf32>
    %55 = arith.subf %36, %54 : vector<128x128xf32>
    %56 = vector.broadcast %53 : vector<1x128xf32> to vector<128x128xf32>
    %57 = arith.mulf %56, %55 : vector<128x128xf32>
    %58 = vector.broadcast %38 : vector<1x128xf32> to vector<128x128xf32>
    %59 = arith.addf %57, %58 : vector<128x128xf32>
    %cst_28 = arith.constant 0.000000e+00 : f32
    %60 = vector.broadcast %cst_28 : f32 to vector<128x128xf32>
    %61 = arith.maximumf %59, %60 : vector<128x128xf32>
    %62 = arith.truncf %61 : vector<128x128xf32> to vector<128x128xbf16>
    %c2 = arith.constant 2 : index
    %c0_29 = arith.constant 0 : index
    %c0_30 = arith.constant 0 : index
    %63 = vector.load %arg1[%c2, %c0_29, %c0_30] : memref<11x128x128xbf16, #tpu.memory_space<vmem>>, vector<1x128x128xbf16>
    %64 = vector.shape_cast %63 : vector<1x128x128xbf16> to vector<128x128xbf16>
    %cst_31 = arith.constant dense<0.000000e+00> : vector<128x128xf32>
    %65 = tpu.matmul %62, %64, %cst_31 {dimension_numbers = #tpu.dot_dimension_numbers<[1], [0], [0], [1], [0, 0, 1, 1], [], []>} : vector<128x128xbf16>, vector<128x128xbf16>, vector<128x128xf32> -> vector<128x128xf32>
    %c2_32 = arith.constant 2 : index
    %c0_33 = arith.constant 0 : index
    %66 = vector.load %arg2[%c2_32, %c0_33] : memref<20x128xf32, #tpu.memory_space<vmem>>, vector<1x128xf32>
    %c11 = arith.constant 11 : index
    %c0_34 = arith.constant 0 : index
    %67 = vector.load %arg2[%c11, %c0_34] : memref<20x128xf32, #tpu.memory_space<vmem>>, vector<1x128xf32>
    %cst_35 = arith.constant dense<0.000000e+00> : vector<128xf32>
    %68 = vector.multi_reduction <add>, %65, %cst_35 [0] : vector<128x128xf32> to vector<128xf32>
    %69 = vector.shape_cast %68 : vector<128xf32> to vector<1x128xf32>
    %cst_36 = arith.constant 1.280000e+02 : f32
    %70 = vector.broadcast %cst_36 : f32 to vector<1x128xf32>
    %71 = arith.divf %69, %70 : vector<1x128xf32>
    %72 = arith.mulf %65, %65 : vector<128x128xf32>
    %cst_37 = arith.constant dense<0.000000e+00> : vector<128xf32>
    %73 = vector.multi_reduction <add>, %72, %cst_37 [0] : vector<128x128xf32> to vector<128xf32>
    %74 = vector.shape_cast %73 : vector<128xf32> to vector<1x128xf32>
    %cst_38 = arith.constant 1.280000e+02 : f32
    %75 = vector.broadcast %cst_38 : f32 to vector<1x128xf32>
    %76 = arith.divf %74, %75 : vector<1x128xf32>
    %77 = arith.mulf %71, %71 : vector<1x128xf32>
    %78 = arith.subf %76, %77 : vector<1x128xf32>
    %cst_39 = arith.constant 9.99999974E-6 : f32
    %79 = vector.broadcast %cst_39 : f32 to vector<1x128xf32>
    %80 = arith.addf %78, %79 : vector<1x128xf32>
    %81 = math.rsqrt %80 : vector<1x128xf32>
    %82 = arith.mulf %66, %81 : vector<1x128xf32>
    %83 = vector.broadcast %71 : vector<1x128xf32> to vector<128x128xf32>
    %84 = arith.subf %65, %83 : vector<128x128xf32>
    %85 = vector.broadcast %82 : vector<1x128xf32> to vector<128x128xf32>
    %86 = arith.mulf %85, %84 : vector<128x128xf32>
    %87 = vector.broadcast %67 : vector<1x128xf32> to vector<128x128xf32>
    %88 = arith.addf %86, %87 : vector<128x128xf32>
    %cst_40 = arith.constant 0.000000e+00 : f32
    %89 = vector.broadcast %cst_40 : f32 to vector<128x128xf32>
    %90 = arith.maximumf %88, %89 : vector<128x128xf32>
    %91 = arith.truncf %90 : vector<128x128xf32> to vector<128x128xbf16>
    %c3 = arith.constant 3 : index
    %c0_41 = arith.constant 0 : index
    %c0_42 = arith.constant 0 : index
    %92 = vector.load %arg1[%c3, %c0_41, %c0_42] : memref<11x128x128xbf16, #tpu.memory_space<vmem>>, vector<1x128x128xbf16>
    %93 = vector.shape_cast %92 : vector<1x128x128xbf16> to vector<128x128xbf16>
    %cst_43 = arith.constant dense<0.000000e+00> : vector<128x128xf32>
    %94 = tpu.matmul %91, %93, %cst_43 {dimension_numbers = #tpu.dot_dimension_numbers<[1], [0], [0], [1], [0, 0, 1, 1], [], []>} : vector<128x128xbf16>, vector<128x128xbf16>, vector<128x128xf32> -> vector<128x128xf32>
    %c3_44 = arith.constant 3 : index
    %c0_45 = arith.constant 0 : index
    %95 = vector.load %arg2[%c3_44, %c0_45] : memref<20x128xf32, #tpu.memory_space<vmem>>, vector<1x128xf32>
    %c12 = arith.constant 12 : index
    %c0_46 = arith.constant 0 : index
    %96 = vector.load %arg2[%c12, %c0_46] : memref<20x128xf32, #tpu.memory_space<vmem>>, vector<1x128xf32>
    %cst_47 = arith.constant dense<0.000000e+00> : vector<128xf32>
    %97 = vector.multi_reduction <add>, %94, %cst_47 [0] : vector<128x128xf32> to vector<128xf32>
    %98 = vector.shape_cast %97 : vector<128xf32> to vector<1x128xf32>
    %cst_48 = arith.constant 1.280000e+02 : f32
    %99 = vector.broadcast %cst_48 : f32 to vector<1x128xf32>
    %100 = arith.divf %98, %99 : vector<1x128xf32>
    %101 = arith.mulf %94, %94 : vector<128x128xf32>
    %cst_49 = arith.constant dense<0.000000e+00> : vector<128xf32>
    %102 = vector.multi_reduction <add>, %101, %cst_49 [0] : vector<128x128xf32> to vector<128xf32>
    %103 = vector.shape_cast %102 : vector<128xf32> to vector<1x128xf32>
    %cst_50 = arith.constant 1.280000e+02 : f32
    %104 = vector.broadcast %cst_50 : f32 to vector<1x128xf32>
    %105 = arith.divf %103, %104 : vector<1x128xf32>
    %106 = arith.mulf %100, %100 : vector<1x128xf32>
    %107 = arith.subf %105, %106 : vector<1x128xf32>
    %cst_51 = arith.constant 9.99999974E-6 : f32
    %108 = vector.broadcast %cst_51 : f32 to vector<1x128xf32>
    %109 = arith.addf %107, %108 : vector<1x128xf32>
    %110 = math.rsqrt %109 : vector<1x128xf32>
    %111 = arith.mulf %95, %110 : vector<1x128xf32>
    %112 = vector.broadcast %100 : vector<1x128xf32> to vector<128x128xf32>
    %113 = arith.subf %94, %112 : vector<128x128xf32>
    %114 = vector.broadcast %111 : vector<1x128xf32> to vector<128x128xf32>
    %115 = arith.mulf %114, %113 : vector<128x128xf32>
    %116 = vector.broadcast %96 : vector<1x128xf32> to vector<128x128xf32>
    %117 = arith.addf %115, %116 : vector<128x128xf32>
    %cst_52 = arith.constant 0.000000e+00 : f32
    %118 = vector.broadcast %cst_52 : f32 to vector<128x128xf32>
    %119 = arith.maximumf %117, %118 : vector<128x128xf32>
    %120 = arith.truncf %119 : vector<128x128xf32> to vector<128x128xbf16>
    %c4 = arith.constant 4 : index
    %c0_53 = arith.constant 0 : index
    %c0_54 = arith.constant 0 : index
    %121 = vector.load %arg1[%c4, %c0_53, %c0_54] : memref<11x128x128xbf16, #tpu.memory_space<vmem>>, vector<1x128x128xbf16>
    %122 = vector.shape_cast %121 : vector<1x128x128xbf16> to vector<128x128xbf16>
    %cst_55 = arith.constant dense<0.000000e+00> : vector<128x128xf32>
    %123 = tpu.matmul %120, %122, %cst_55 {dimension_numbers = #tpu.dot_dimension_numbers<[1], [0], [0], [1], [0, 0, 1, 1], [], []>} : vector<128x128xbf16>, vector<128x128xbf16>, vector<128x128xf32> -> vector<128x128xf32>
    %c18 = arith.constant 18 : index
    %c0_56 = arith.constant 0 : index
    %124 = vector.load %arg2[%c18, %c0_56] : memref<20x128xf32, #tpu.memory_space<vmem>>, vector<1x128xf32>
    %125 = vector.broadcast %124 : vector<1x128xf32> to vector<128x128xf32>
    %126 = arith.addf %123, %125 : vector<128x128xf32>
    %c5 = arith.constant 5 : index
    %c0_57 = arith.constant 0 : index
    %c0_58 = arith.constant 0 : index
    %127 = vector.load %arg1[%c5, %c0_57, %c0_58] : memref<11x128x128xbf16, #tpu.memory_space<vmem>>, vector<1x128x128xbf16>
    %128 = vector.shape_cast %127 : vector<1x128x128xbf16> to vector<128x128xbf16>
    %cst_59 = arith.constant dense<0.000000e+00> : vector<128x128xf32>
    %129 = tpu.matmul %120, %128, %cst_59 {dimension_numbers = #tpu.dot_dimension_numbers<[1], [0], [0], [1], [0, 0, 1, 1], [], []>} : vector<128x128xbf16>, vector<128x128xbf16>, vector<128x128xf32> -> vector<128x128xf32>
    %c19 = arith.constant 19 : index
    %c0_60 = arith.constant 0 : index
    %130 = vector.load %arg2[%c19, %c0_60] : memref<20x128xf32, #tpu.memory_space<vmem>>, vector<1x128xf32>
    %131 = vector.broadcast %130 : vector<1x128xf32> to vector<128x128xf32>
    %132 = arith.addf %129, %131 : vector<128x128xf32>
    %cst_61 = arith.constant 5.000000e-01 : f32
    %133 = vector.broadcast %cst_61 : f32 to vector<128x128xf32>
    %134 = arith.mulf %133, %132 : vector<128x128xf32>
    %135 = math.exp %134 : vector<128x128xf32>
    %136 = arith.mulf %3, %135 : vector<128x128xf32>
    %137 = arith.addf %136, %126 : vector<128x128xf32>
    %138 = arith.truncf %137 : vector<128x128xf32> to vector<128x128xbf16>
    %c6 = arith.constant 6 : index
    %c0_62 = arith.constant 0 : index
    %c0_63 = arith.constant 0 : index
    %139 = vector.load %arg1[%c6, %c0_62, %c0_63] : memref<11x128x128xbf16, #tpu.memory_space<vmem>>, vector<1x128x128xbf16>
    %140 = vector.shape_cast %139 : vector<1x128x128xbf16> to vector<128x128xbf16>
    %cst_64 = arith.constant dense<0.000000e+00> : vector<128x128xf32>
    %141 = tpu.matmul %138, %140, %cst_64 {dimension_numbers = #tpu.dot_dimension_numbers<[1], [0], [0], [1], [0, 0, 1, 1], [], []>} : vector<128x128xbf16>, vector<128x128xbf16>, vector<128x128xf32> -> vector<128x128xf32>
    %c4_65 = arith.constant 4 : index
    %c0_66 = arith.constant 0 : index
    %142 = vector.load %arg2[%c4_65, %c0_66] : memref<20x128xf32, #tpu.memory_space<vmem>>, vector<1x128xf32>
    %c13 = arith.constant 13 : index
    %c0_67 = arith.constant 0 : index
    %143 = vector.load %arg2[%c13, %c0_67] : memref<20x128xf32, #tpu.memory_space<vmem>>, vector<1x128xf32>
    %cst_68 = arith.constant dense<0.000000e+00> : vector<128xf32>
    %144 = vector.multi_reduction <add>, %141, %cst_68 [0] : vector<128x128xf32> to vector<128xf32>
    %145 = vector.shape_cast %144 : vector<128xf32> to vector<1x128xf32>
    %cst_69 = arith.constant 1.280000e+02 : f32
    %146 = vector.broadcast %cst_69 : f32 to vector<1x128xf32>
    %147 = arith.divf %145, %146 : vector<1x128xf32>
    %148 = arith.mulf %141, %141 : vector<128x128xf32>
    %cst_70 = arith.constant dense<0.000000e+00> : vector<128xf32>
    %149 = vector.multi_reduction <add>, %148, %cst_70 [0] : vector<128x128xf32> to vector<128xf32>
    %150 = vector.shape_cast %149 : vector<128xf32> to vector<1x128xf32>
    %cst_71 = arith.constant 1.280000e+02 : f32
    %151 = vector.broadcast %cst_71 : f32 to vector<1x128xf32>
    %152 = arith.divf %150, %151 : vector<1x128xf32>
    %153 = arith.mulf %147, %147 : vector<1x128xf32>
    %154 = arith.subf %152, %153 : vector<1x128xf32>
    %cst_72 = arith.constant 9.99999974E-6 : f32
    %155 = vector.broadcast %cst_72 : f32 to vector<1x128xf32>
    %156 = arith.addf %154, %155 : vector<1x128xf32>
    %157 = math.rsqrt %156 : vector<1x128xf32>
    %158 = arith.mulf %142, %157 : vector<1x128xf32>
    %159 = vector.broadcast %147 : vector<1x128xf32> to vector<128x128xf32>
    %160 = arith.subf %141, %159 : vector<128x128xf32>
    %161 = vector.broadcast %158 : vector<1x128xf32> to vector<128x128xf32>
    %162 = arith.mulf %161, %160 : vector<128x128xf32>
    %163 = vector.broadcast %143 : vector<1x128xf32> to vector<128x128xf32>
    %164 = arith.addf %162, %163 : vector<128x128xf32>
    %cst_73 = arith.constant 0.000000e+00 : f32
    %165 = vector.broadcast %cst_73 : f32 to vector<128x128xf32>
    %166 = arith.maximumf %164, %165 : vector<128x128xf32>
    %167 = arith.truncf %166 : vector<128x128xf32> to vector<128x128xbf16>
    %c7 = arith.constant 7 : index
    %c0_74 = arith.constant 0 : index
    %c0_75 = arith.constant 0 : index
    %168 = vector.load %arg1[%c7, %c0_74, %c0_75] : memref<11x128x128xbf16, #tpu.memory_space<vmem>>, vector<1x128x128xbf16>
    %169 = vector.shape_cast %168 : vector<1x128x128xbf16> to vector<128x128xbf16>
    %cst_76 = arith.constant dense<0.000000e+00> : vector<128x128xf32>
    %170 = tpu.matmul %167, %169, %cst_76 {dimension_numbers = #tpu.dot_dimension_numbers<[1], [0], [0], [1], [0, 0, 1, 1], [], []>} : vector<128x128xbf16>, vector<128x128xbf16>, vector<128x128xf32> -> vector<128x128xf32>
    %c5_77 = arith.constant 5 : index
    %c0_78 = arith.constant 0 : index
    %171 = vector.load %arg2[%c5_77, %c0_78] : memref<20x128xf32, #tpu.memory_space<vmem>>, vector<1x128xf32>
    %c14 = arith.constant 14 : index
    %c0_79 = arith.constant 0 : index
    %172 = vector.load %arg2[%c14, %c0_79] : memref<20x128xf32, #tpu.memory_space<vmem>>, vector<1x128xf32>
    %cst_80 = arith.constant dense<0.000000e+00> : vector<128xf32>
    %173 = vector.multi_reduction <add>, %170, %cst_80 [0] : vector<128x128xf32> to vector<128xf32>
    %174 = vector.shape_cast %173 : vector<128xf32> to vector<1x128xf32>
    %cst_81 = arith.constant 1.280000e+02 : f32
    %175 = vector.broadcast %cst_81 : f32 to vector<1x128xf32>
    %176 = arith.divf %174, %175 : vector<1x128xf32>
    %177 = arith.mulf %170, %170 : vector<128x128xf32>
    %cst_82 = arith.constant dense<0.000000e+00> : vector<128xf32>
    %178 = vector.multi_reduction <add>, %177, %cst_82 [0] : vector<128x128xf32> to vector<128xf32>
    %179 = vector.shape_cast %178 : vector<128xf32> to vector<1x128xf32>
    %cst_83 = arith.constant 1.280000e+02 : f32
    %180 = vector.broadcast %cst_83 : f32 to vector<1x128xf32>
    %181 = arith.divf %179, %180 : vector<1x128xf32>
    %182 = arith.mulf %176, %176 : vector<1x128xf32>
    %183 = arith.subf %181, %182 : vector<1x128xf32>
    %cst_84 = arith.constant 9.99999974E-6 : f32
    %184 = vector.broadcast %cst_84 : f32 to vector<1x128xf32>
    %185 = arith.addf %183, %184 : vector<1x128xf32>
    %186 = math.rsqrt %185 : vector<1x128xf32>
    %187 = arith.mulf %171, %186 : vector<1x128xf32>
    %188 = vector.broadcast %176 : vector<1x128xf32> to vector<128x128xf32>
    %189 = arith.subf %170, %188 : vector<128x128xf32>
    %190 = vector.broadcast %187 : vector<1x128xf32> to vector<128x128xf32>
    %191 = arith.mulf %190, %189 : vector<128x128xf32>
    %192 = vector.broadcast %172 : vector<1x128xf32> to vector<128x128xf32>
    %193 = arith.addf %191, %192 : vector<128x128xf32>
    %cst_85 = arith.constant 0.000000e+00 : f32
    %194 = vector.broadcast %cst_85 : f32 to vector<128x128xf32>
    %195 = arith.maximumf %193, %194 : vector<128x128xf32>
    %196 = arith.truncf %195 : vector<128x128xf32> to vector<128x128xbf16>
    %c8 = arith.constant 8 : index
    %c0_86 = arith.constant 0 : index
    %c0_87 = arith.constant 0 : index
    %197 = vector.load %arg1[%c8, %c0_86, %c0_87] : memref<11x128x128xbf16, #tpu.memory_space<vmem>>, vector<1x128x128xbf16>
    %198 = vector.shape_cast %197 : vector<1x128x128xbf16> to vector<128x128xbf16>
    %cst_88 = arith.constant dense<0.000000e+00> : vector<128x128xf32>
    %199 = tpu.matmul %196, %198, %cst_88 {dimension_numbers = #tpu.dot_dimension_numbers<[1], [0], [0], [1], [0, 0, 1, 1], [], []>} : vector<128x128xbf16>, vector<128x128xbf16>, vector<128x128xf32> -> vector<128x128xf32>
    %c6_89 = arith.constant 6 : index
    %c0_90 = arith.constant 0 : index
    %200 = vector.load %arg2[%c6_89, %c0_90] : memref<20x128xf32, #tpu.memory_space<vmem>>, vector<1x128xf32>
    %c15 = arith.constant 15 : index
    %c0_91 = arith.constant 0 : index
    %201 = vector.load %arg2[%c15, %c0_91] : memref<20x128xf32, #tpu.memory_space<vmem>>, vector<1x128xf32>
    %cst_92 = arith.constant dense<0.000000e+00> : vector<128xf32>
    %202 = vector.multi_reduction <add>, %199, %cst_92 [0] : vector<128x128xf32> to vector<128xf32>
    %203 = vector.shape_cast %202 : vector<128xf32> to vector<1x128xf32>
    %cst_93 = arith.constant 1.280000e+02 : f32
    %204 = vector.broadcast %cst_93 : f32 to vector<1x128xf32>
    %205 = arith.divf %203, %204 : vector<1x128xf32>
    %206 = arith.mulf %199, %199 : vector<128x128xf32>
    %cst_94 = arith.constant dense<0.000000e+00> : vector<128xf32>
    %207 = vector.multi_reduction <add>, %206, %cst_94 [0] : vector<128x128xf32> to vector<128xf32>
    %208 = vector.shape_cast %207 : vector<128xf32> to vector<1x128xf32>
    %cst_95 = arith.constant 1.280000e+02 : f32
    %209 = vector.broadcast %cst_95 : f32 to vector<1x128xf32>
    %210 = arith.divf %208, %209 : vector<1x128xf32>
    %211 = arith.mulf %205, %205 : vector<1x128xf32>
    %212 = arith.subf %210, %211 : vector<1x128xf32>
    %cst_96 = arith.constant 9.99999974E-6 : f32
    %213 = vector.broadcast %cst_96 : f32 to vector<1x128xf32>
    %214 = arith.addf %212, %213 : vector<1x128xf32>
    %215 = math.rsqrt %214 : vector<1x128xf32>
    %216 = arith.mulf %200, %215 : vector<1x128xf32>
    %217 = vector.broadcast %205 : vector<1x128xf32> to vector<128x128xf32>
    %218 = arith.subf %199, %217 : vector<128x128xf32>
    %219 = vector.broadcast %216 : vector<1x128xf32> to vector<128x128xf32>
    %220 = arith.mulf %219, %218 : vector<128x128xf32>
    %221 = vector.broadcast %201 : vector<1x128xf32> to vector<128x128xf32>
    %222 = arith.addf %220, %221 : vector<128x128xf32>
    %cst_97 = arith.constant 0.000000e+00 : f32
    %223 = vector.broadcast %cst_97 : f32 to vector<128x128xf32>
    %224 = arith.maximumf %222, %223 : vector<128x128xf32>
    %225 = arith.truncf %224 : vector<128x128xf32> to vector<128x128xbf16>
    %c9_98 = arith.constant 9 : index
    %c0_99 = arith.constant 0 : index
    %c0_100 = arith.constant 0 : index
    %226 = vector.load %arg1[%c9_98, %c0_99, %c0_100] : memref<11x128x128xbf16, #tpu.memory_space<vmem>>, vector<1x128x128xbf16>
    %227 = vector.shape_cast %226 : vector<1x128x128xbf16> to vector<128x128xbf16>
    %cst_101 = arith.constant dense<0.000000e+00> : vector<128x128xf32>
    %228 = tpu.matmul %225, %227, %cst_101 {dimension_numbers = #tpu.dot_dimension_numbers<[1], [0], [0], [1], [0, 0, 1, 1], [], []>} : vector<128x128xbf16>, vector<128x128xbf16>, vector<128x128xf32> -> vector<128x128xf32>
    %c7_102 = arith.constant 7 : index
    %c0_103 = arith.constant 0 : index
    %229 = vector.load %arg2[%c7_102, %c0_103] : memref<20x128xf32, #tpu.memory_space<vmem>>, vector<1x128xf32>
    %c16 = arith.constant 16 : index
    %c0_104 = arith.constant 0 : index
    %230 = vector.load %arg2[%c16, %c0_104] : memref<20x128xf32, #tpu.memory_space<vmem>>, vector<1x128xf32>
    %cst_105 = arith.constant dense<0.000000e+00> : vector<128xf32>
    %231 = vector.multi_reduction <add>, %228, %cst_105 [0] : vector<128x128xf32> to vector<128xf32>
    %232 = vector.shape_cast %231 : vector<128xf32> to vector<1x128xf32>
    %cst_106 = arith.constant 1.280000e+02 : f32
    %233 = vector.broadcast %cst_106 : f32 to vector<1x128xf32>
    %234 = arith.divf %232, %233 : vector<1x128xf32>
    %235 = arith.mulf %228, %228 : vector<128x128xf32>
    %cst_107 = arith.constant dense<0.000000e+00> : vector<128xf32>
    %236 = vector.multi_reduction <add>, %235, %cst_107 [0] : vector<128x128xf32> to vector<128xf32>
    %237 = vector.shape_cast %236 : vector<128xf32> to vector<1x128xf32>
    %cst_108 = arith.constant 1.280000e+02 : f32
    %238 = vector.broadcast %cst_108 : f32 to vector<1x128xf32>
    %239 = arith.divf %237, %238 : vector<1x128xf32>
    %240 = arith.mulf %234, %234 : vector<1x128xf32>
    %241 = arith.subf %239, %240 : vector<1x128xf32>
    %cst_109 = arith.constant 9.99999974E-6 : f32
    %242 = vector.broadcast %cst_109 : f32 to vector<1x128xf32>
    %243 = arith.addf %241, %242 : vector<1x128xf32>
    %244 = math.rsqrt %243 : vector<1x128xf32>
    %245 = arith.mulf %229, %244 : vector<1x128xf32>
    %246 = vector.broadcast %234 : vector<1x128xf32> to vector<128x128xf32>
    %247 = arith.subf %228, %246 : vector<128x128xf32>
    %248 = vector.broadcast %245 : vector<1x128xf32> to vector<128x128xf32>
    %249 = arith.mulf %248, %247 : vector<128x128xf32>
    %250 = vector.broadcast %230 : vector<1x128xf32> to vector<128x128xf32>
    %251 = arith.addf %249, %250 : vector<128x128xf32>
    %cst_110 = arith.constant 0.000000e+00 : f32
    %252 = vector.broadcast %cst_110 : f32 to vector<128x128xf32>
    %253 = arith.maximumf %251, %252 : vector<128x128xf32>
    %254 = arith.truncf %253 : vector<128x128xf32> to vector<128x128xbf16>
    %c10_111 = arith.constant 10 : index
    %c0_112 = arith.constant 0 : index
    %c0_113 = arith.constant 0 : index
    %255 = vector.load %arg1[%c10_111, %c0_112, %c0_113] : memref<11x128x128xbf16, #tpu.memory_space<vmem>>, vector<1x128x128xbf16>
    %256 = vector.shape_cast %255 : vector<1x128x128xbf16> to vector<128x128xbf16>
    %cst_114 = arith.constant dense<0.000000e+00> : vector<128x128xf32>
    %257 = tpu.matmul %254, %256, %cst_114 {dimension_numbers = #tpu.dot_dimension_numbers<[1], [0], [0], [1], [0, 0, 1, 1], [], []>} : vector<128x128xbf16>, vector<128x128xbf16>, vector<128x128xf32> -> vector<128x128xf32>
    %c8_115 = arith.constant 8 : index
    %c0_116 = arith.constant 0 : index
    %258 = vector.load %arg2[%c8_115, %c0_116] : memref<20x128xf32, #tpu.memory_space<vmem>>, vector<1x128xf32>
    %c17 = arith.constant 17 : index
    %c0_117 = arith.constant 0 : index
    %259 = vector.load %arg2[%c17, %c0_117] : memref<20x128xf32, #tpu.memory_space<vmem>>, vector<1x128xf32>
    %cst_118 = arith.constant dense<0.000000e+00> : vector<128xf32>
    %260 = vector.multi_reduction <add>, %257, %cst_118 [0] : vector<128x128xf32> to vector<128xf32>
    %261 = vector.shape_cast %260 : vector<128xf32> to vector<1x128xf32>
    %cst_119 = arith.constant 1.280000e+02 : f32
    %262 = vector.broadcast %cst_119 : f32 to vector<1x128xf32>
    %263 = arith.divf %261, %262 : vector<1x128xf32>
    %264 = arith.mulf %257, %257 : vector<128x128xf32>
    %cst_120 = arith.constant dense<0.000000e+00> : vector<128xf32>
    %265 = vector.multi_reduction <add>, %264, %cst_120 [0] : vector<128x128xf32> to vector<128xf32>
    %266 = vector.shape_cast %265 : vector<128xf32> to vector<1x128xf32>
    %cst_121 = arith.constant 1.280000e+02 : f32
    %267 = vector.broadcast %cst_121 : f32 to vector<1x128xf32>
    %268 = arith.divf %266, %267 : vector<1x128xf32>
    %269 = arith.mulf %263, %263 : vector<1x128xf32>
    %270 = arith.subf %268, %269 : vector<1x128xf32>
    %cst_122 = arith.constant 9.99999974E-6 : f32
    %271 = vector.broadcast %cst_122 : f32 to vector<1x128xf32>
    %272 = arith.addf %270, %271 : vector<1x128xf32>
    %273 = math.rsqrt %272 : vector<1x128xf32>
    %274 = arith.mulf %258, %273 : vector<1x128xf32>
    %275 = vector.broadcast %263 : vector<1x128xf32> to vector<128x128xf32>
    %276 = arith.subf %257, %275 : vector<128x128xf32>
    %277 = vector.broadcast %274 : vector<1x128xf32> to vector<128x128xf32>
    %278 = arith.mulf %277, %276 : vector<128x128xf32>
    %279 = vector.broadcast %259 : vector<1x128xf32> to vector<128x128xf32>
    %280 = arith.addf %278, %279 : vector<128x128xf32>
    %c0_123 = arith.constant 0 : index
    %c0_124 = arith.constant 0 : index
    %c0_125 = arith.constant 0 : index
    %281 = vector.load %arg3[%c0_123, %c0_124, %c0_125] : memref<3x128x128xf32, #tpu.memory_space<vmem>>, vector<1x128x128xf32>
    %282 = vector.shape_cast %281 : vector<1x128x128xf32> to vector<128x128xf32>
    %283 = vector.shape_cast %280 : vector<128x128xf32> to vector<1x128x128xf32>
    tpu.vector_store %arg3[%c0_123, %c0_124, %c0_125], %283 {strides = array<i32>} : memref<3x128x128xf32, #tpu.memory_space<vmem>>, vector<1x128x128xf32>,
    %c1_126 = arith.constant 1 : index
    %c0_127 = arith.constant 0 : index
    %c0_128 = arith.constant 0 : index
    %284 = vector.load %arg3[%c1_126, %c0_127, %c0_128] : memref<3x128x128xf32, #tpu.memory_space<vmem>>, vector<1x128x128xf32>
    %285 = vector.shape_cast %284 : vector<1x128x128xf32> to vector<128x128xf32>
    %286 = vector.shape_cast %126 : vector<128x128xf32> to vector<1x128x128xf32>
    tpu.vector_store %arg3[%c1_126, %c0_127, %c0_128], %286 {strides = array<i32>} : memref<3x128x128xf32, #tpu.memory_space<vmem>>, vector<1x128x128xf32>,
    %c2_129 = arith.constant 2 : index
    %c0_130 = arith.constant 0 : index
    %c0_131 = arith.constant 0 : index
    %287 = vector.load %arg3[%c2_129, %c0_130, %c0_131] : memref<3x128x128xf32, #tpu.memory_space<vmem>>, vector<1x128x128xf32>
    %288 = vector.shape_cast %287 : vector<1x128x128xf32> to vector<128x128xf32>
    %289 = vector.shape_cast %132 : vector<128x128xf32> to vector<1x128x128xf32>
    tpu.vector_store %arg3[%c2_129, %c0_130, %c0_131], %289 {strides = array<i32>} : memref<3x128x128xf32, #tpu.memory_space<vmem>>, vector<1x128x128xf32>,
    %290 = arith.subf %280, %1 : vector<128x128xf32>
    %cst_132 = arith.constant 1.000000e+00 : f32
    %291 = vector.broadcast %cst_132 : f32 to vector<128x128xf32>
    %292 = arith.addf %291, %132 : vector<128x128xf32>
    %293 = arith.mulf %126, %126 : vector<128x128xf32>
    %294 = arith.subf %292, %293 : vector<128x128xf32>
    %295 = math.exp %132 : vector<128x128xf32>
    %296 = arith.subf %294, %295 : vector<128x128xf32>
    %297 = arith.mulf %290, %290 : vector<128x128xf32>
    %cst_133 = arith.constant 5.000000e-01 : f32
    %298 = vector.broadcast %cst_133 : f32 to vector<128x128xf32>
    %299 = arith.mulf %298, %296 : vector<128x128xf32>
    %300 = arith.subf %297, %299 : vector<128x128xf32>
    %301 = vector.shape_cast %300 : vector<128x128xf32> to vector<1x128x128xf32>
    %cst_134 = arith.constant dense<0.000000e+00> : vector<1xf32>
    %302 = vector.multi_reduction <add>, %301, %cst_134 [1, 2] : vector<1x128x128xf32> to vector<1xf32>
    %303 = vector.shape_cast %302 : vector<1xf32> to vector<1x1x1xf32>
    %304 = vector.extract %303[0, 0, 0] : f32 from vector<1x1x1xf32>
    %c0_135 = arith.constant 0 : index
    %c0_136 = arith.constant 0 : index
    %305 = memref.load %arg4[%c0_135, %c0_136] : memref<1x1xf32, #tpu.memory_space<smem>>
    memref.store %304, %arg4[%c0_135, %c0_136] : memref<1x1xf32, #tpu.memory_space<smem>>
    return
  }
}

</mosaic_0001>

<bundles_post_ra>
// kernel: vae_forward_and_loss.1
= control target key start
LH: loop header
LB: loop body
LE: loop exit
PB: predicated region body
PF: predicated region fallthrough
CT: control target
= control target key end

     0   :  { %s5859_s0 = inlined_call_operand.vmem [shape: f32[2,128,128], index: 0, kind: input, shape index: {}]   ;;  %s5860_s1 = inlined_call_operand.vmem [shape: bf16[11,128,128], index: 1, kind: input, shape index: {}]   ;;  %s5861_s2 = inlined_call_operand.vmem [shape: f32[20,128], index: 2, kind: input, shape index: {}]   ;;  %s5862_s3 = inlined_call_operand.vmem [shape: f32[3,128,128], index: 3, kind: output, shape index: {0}]   ;;  %s5863_s4 = inlined_call_operand.hbm [shape: f32[1,1], index: 4, kind: output, shape index: {1}]  }
   0x1   :  { %v3558_v0 = vld [vmem:[%s5860_s1 + $0x38] sm:$0xff]  ;;  %v3557_v1 = vld [vmem:[%s5860_s1 + $0x30] sm:$0xff]  ;;  %v3556_v2 = vld [vmem:[%s5860_s1 + $0x28] sm:$0xff] }
   0x2   :  { %122 = vmatpush.bf16.msra.mxu0 %v3558_v0  ;;  %3639 = vmatpush.bf16.msra.mxu3 %v3558_v0 }
   0x6   :  { %123 = vmatpush.bf16.msra.mxu0 %v3557_v1  ;;  %3640 = vmatpush.bf16.msra.mxu3 %v3557_v1 }
   0x7   :  { %10 = vsyncpa [#allocation3], 0  ;;  %v3555_v3 = vld [vmem:[%s5860_s1 + $0x20] sm:$0xff]  ;;  %v3554_v4 = vld [vmem:[%s5860_s1 + $0x18] sm:$0xff]  ;;  %s2979_s27 = sshll.u32 %s5863_s4, 4  ;;  %s3793_s29 = smov [#allocation2]   ;;  %s2980_s27 = int_to_ptr.hbm [resolvable:$true] %s2979_s27 }
   0x8   :  { %v3553_v5 = vld [vmem:[%s5860_s1 + $0x10] sm:$0xff]  ;;  %v3552_v6 = vld [vmem:[%s5860_s1 + $0x8] sm:$0xff]  ;;  %v3551_v7 = vld [vmem:[%s5860_s1] sm:$0xff] }
   0x9   :  { %v17_v8 = vld [vmem:[%s5859_s0] sm:$0xff]  ;;  %v18_v9 = vld [vmem:[%s5859_s0 + $0x8] sm:$0xff]  ;;  %v19_v14 = vld [vmem:[%s5859_s0 + $0x10] sm:$0xff] }
   0xa   :  { %124 = vmatpush.bf16.msra.mxu0 %v3556_v2  ;;  %3641 = vmatpush.bf16.msra.mxu3 %v3556_v2  ;;  %v21_v10 = vld [vmem:[%s5859_s0 + $0x20] sm:$0xff]  ;;  %v22_v11 = vld [vmem:[%s5859_s0 + $0x28] sm:$0xff]  ;;  %v50_v12 = vpack.c.bf16 %v18_v9, %v17_v8  ;;  %v20_v15 = vld [vmem:[%s5859_s0 + $0x18] sm:$0xff] }
   0xb   :  { %v52_v13 = vpack.c.bf16 %v22_v11, %v21_v10  ;;  %v23_v16 = vld [vmem:[%s5859_s0 + $0x30] sm:$0xff]  ;;  %v24_v17 = vld [vmem:[%s5859_s0 + $0x38] sm:$0xff]  ;;  %v51_v18 = vpack.c.bf16 %v20_v15, %v19_v14  ;;  %v25_v20 = vld [vmem:[%s5859_s0 + $0x40] sm:$0xff] }
   0xc   :  { %v53_v19 = vpack.c.bf16 %v24_v17, %v23_v16  ;;  %v26_v21 = vld [vmem:[%s5859_s0 + $0x48] sm:$0xff]  ;;  %v27_v23 = vld [vmem:[%s5859_s0 + $0x50] sm:$0xff]  ;;  %v28_v24 = vld [vmem:[%s5859_s0 + $0x58] sm:$0xff] }
   0xd   :  { %v54_v22 = vpack.c.bf16 %v26_v21, %v25_v20  ;;  %v55_v25 = vpack.c.bf16 %v28_v24, %v27_v23  ;;  %v29_v26 = vld [vmem:[%s5859_s0 + $0x60] sm:$0xff]  ;;  %v30_v27 = vld [vmem:[%s5859_s0 + $0x68] sm:$0xff]  ;;  %v31_v29 = vld [vmem:[%s5859_s0 + $0x70] sm:$0xff] }
   0xe   :  { %125 = vmatpush.bf16.msra.mxu0 %v3555_v3  ;;  %3642 = vmatpush.bf16.msra.mxu3 %v3555_v3  ;;  %v56_v28 = vpack.c.bf16 %v30_v27, %v29_v26  ;;  %v32_v30 = vld [vmem:[%s5859_s0 + $0x78] sm:$0xff]  ;;  %v3565_v16 = vld [vmem:[%s5860_s1 + $0x70] sm:$0xff] }
   0xf   :  { %v57_v31 = vpack.c.bf16 %v32_v30, %v31_v29  ;;  %v3566_v8 = vld [vmem:[%s5860_s1 + $0x78] sm:$0xff] }
  0x10   :  { %3647 = vmatpush.bf16.msra.mxu1 %v3566_v8 }
  0x12   :  { %126 = vmatpush.bf16.msra.mxu0 %v3554_v4  ;;  %3643 = vmatpush.bf16.msra.mxu3 %v3554_v4 }
  0x14   :  { %3648 = vmatpush.bf16.msra.mxu1 %v3565_v16 }
  0x16   :  { %127 = vmatpush.bf16.msra.mxu0 %v3553_v5  ;;  %3644 = vmatpush.bf16.msra.mxu3 %v3553_v5 }
  0x1a   :  { %128 = vmatpush.bf16.msra.mxu0 %v3552_v6  ;;  %3645 = vmatpush.bf16.msra.mxu3 %v3552_v6 }
  0x1e   :  { %129 = vmatpush.bf16.msra.mxu0 %v3551_v7  ;;  %3646 = vmatpush.bf16.msra.mxu3 %v3551_v7  ;;  %v3792_v7 = vmov 128.0  }
  0x1f   :  { %3678 = vrcp.f32 %v3792_v7 }
  0x21   :  { %130 = vmatmul.bf16.vlgmr.msra.gmra.mxu0 %v50_v12  ;;  %140 = vmatmul.bf16.vlgmr.msra.gmra.mxu3 %v52_v13 }
  0x22   :  { %393 = vmatpush.bf16.msrb.mxu0 %v3566_v8 }
  0x25   :  { %v3679_v17 = vpop.eup %3678 }
  0x26   :  { %394 = vmatpush.bf16.msrb.mxu0 %v3565_v16  ;;  %v195_v24 = vmul.f32 128.0, %v3679_v17  ;;  %vm199_vm0 = vweird.f32 %v3679_v17 }
  0x31   :  { %135 = vmatmul.bf16.gmra.mxu0 %v51_v18  ;;  %145 = vmatmul.bf16.gmra.mxu3 %v53_v19 }
  0x41   :  { %150 = vmatmul.bf16.gmra.mxu3 %v54_v22 }
  0x51   :  { %155 = vmatmul.bf16.gmra.mxu3 %v55_v25  ;;  %v3564_v25 = vld [vmem:[%s5860_s1 + $0x68] sm:$0xff] }
  0x52   :  { %395 = vmatpush.bf16.msrb.mxu0 %v3564_v25  ;;  %3649 = vmatpush.bf16.msra.mxu1 %v3564_v25  ;;  %v4021_v25 = vld [vmem:[%s5861_s2 + $0x9] ss:$0 sm:$0xff] }
  0x61   :  { %160 = vmatmul.bf16.gmra.mxu3 %v56_v28 }
  0x71   :  { %165 = vmatmul.bf16.gmra.mxu3 %v57_v31 }
  0x9e   :  { %v3897_v35 = vpop.f32.mrf.mxu0 }
  0x9f   :  { %v202_v41 = vmul.f32 %v3897_v35, %v3897_v35 }
  0xa4   :  { %v3891_v32 = vpop.f32.mrf.mxu3 }
  0xa5   :  { %v206_v54 = vmul.f32 %v3891_v32, %v3891_v32 }
  0xa6   :  { %v3901_v37 = vpop.f32.mrf.mxu0 }
  0xa7   :  { %v203_v42 = vmul.f32 %v3901_v37, %v3901_v37  ;;  %v173_v44 = vadd.f32 %v3901_v37, %v3897_v35 }
  0xa9   :  { %v218_v46 = vadd.f32 %v203_v42, %v202_v41  ;;  %v196_v41 = vsub.f32 1.0, %v195_v24  ;;  %v3563_v42 = vld [vmem:[%s5860_s1 + $0x60] sm:$0xff] }
  0xaa   :  { %396 = vmatpush.bf16.msrb.mxu0 %v3563_v42  ;;  %3650 = vmatpush.bf16.msra.mxu1 %v3563_v42 }
  0xac   :  { %v3893_v33 = vpop.f32.mrf.mxu3 }
  0xad   :  { %v207_v58 = vmul.f32 %v3893_v33, %v3893_v33 }
  0xae   :  { %v3907_v40 = vpop.f32.mrf.mxu0 }
  0xaf   :  { %v204_v45 = vmul.f32 %v3907_v40, %v3907_v40  ;;  %v174_v48 = vadd.f32 %v173_v44, %v3907_v40 }
  0xb1   :  { %v219_v49 = vadd.f32 %v218_v46, %v204_v45 }
  0xb4   :  { %v3895_v34 = vpop.f32.mrf.mxu3 }
  0xb5   :  { %v208_v61 = vmul.f32 %v3895_v34, %v3895_v34 }
  0xb6   :  { %v3919_v47 = vpop.f32.mrf.mxu0 }
  0xb7   :  { %v205_v50 = vmul.f32 %v3919_v47, %v3919_v47  ;;  %v175_v52 = vadd.f32 %v174_v48, %v3919_v47 }
  0xb9   :  { %v220_v53 = vadd.f32 %v219_v49, %v205_v50  ;;  %v176_v55 = vadd.f32 %v175_v52, %v3891_v32  ;;  %v197_v50 = vmul.f32 %v3679_v17, %v196_v41  ;;  %v3562_v52 = vld [vmem:[%s5860_s1 + $0x58] sm:$0xff] }
  0xba   :  { %397 = vmatpush.bf16.msrb.mxu0 %v3562_v52  ;;  %3651 = vmatpush.bf16.msra.mxu1 %v3562_v52 }
  0xbb   :  { %v221_v56 = vadd.f32 %v220_v53, %v206_v54  ;;  %v177_v59 = vadd.f32 %v176_v55, %v3893_v33 }
  0xbc   :  { %v3899_v36 = vpop.f32.mrf.mxu3 }
  0xbd   :  { %v222_v60 = vadd.f32 %v221_v56, %v207_v58  ;;  %v178_v62 = vadd.f32 %v177_v59, %v3895_v34  ;;  %v209_v1 = vmul.f32 %v3899_v36, %v3899_v36  ;;  %v198_v58 = vadd.f32 %v3679_v17, %v197_v50  ;;  %v3561_v59 = vld [vmem:[%s5860_s1 + $0x50] sm:$0xff] }
  0xbe   :  { %398 = vmatpush.bf16.msrb.mxu0 %v3561_v59  ;;  %3652 = vmatpush.bf16.msra.mxu1 %v3561_v59 }
  0xbf   :  { %v223_v63 = vadd.f32 %v222_v60, %v208_v61  ;;  %v179_v2 = vadd.f32 %v178_v62, %v3899_v36 }
  0xc1   :  { %v224_v5 = vadd.f32 %v223_v63, %v209_v1  ;;  %v3560_v1 = vld [vmem:[%s5860_s1 + $0x48] sm:$0xff] }
  0xc2   :  { %399 = vmatpush.bf16.msrb.mxu0 %v3560_v1  ;;  %3653 = vmatpush.bf16.msra.mxu1 %v3560_v1 }
  0xc4   :  { %v3903_v38 = vpop.f32.mrf.mxu3 }
  0xc5   :  { %v210_v3 = vmul.f32 %v3903_v38, %v3903_v38  ;;  %v180_v4 = vadd.f32 %v179_v2, %v3903_v38  ;;  %v3992_v2 = vsel %vm199_vm0, %v3679_v17, %v198_v58 }
  0xc7   :  { %v225_v9 = vadd.f32 %v224_v5, %v210_v3  ;;  %v3559_v5 = vld [vmem:[%s5860_s1 + $0x40] sm:$0xff] }
  0xc8   :  { %400 = vmatpush.bf16.msrb.mxu0 %v3559_v5  ;;  %3654 = vmatpush.bf16.msra.mxu1 %v3559_v5 }
  0xcc   :  { %v3905_v39 = vpop.f32.mrf.mxu3 }
  0xcd   :  { %v211_v6 = vmul.f32 %v3905_v39, %v3905_v39  ;;  %v181_v10 = vadd.f32 %v180_v4, %v3905_v39 }
  0xcf   :  { %v226_v13 = vadd.f32 %v225_v9, %v211_v6 }
  0xd4   :  { %v3913_v43 = vpop.f32.mrf.mxu3 }
  0xd5   :  { %v212_v11 = vmul.f32 %v3913_v43, %v3913_v43  ;;  %v182_v12 = vadd.f32 %v181_v10, %v3913_v43 }
  0xd7   :  { %v227_v18 = vadd.f32 %v226_v13, %v212_v11 }
  0xdc   :  { %v3924_v51 = vpop.f32.mrf.mxu3 }
  0xdd   :  { %v213_v14 = vmul.f32 %v3924_v51, %v3924_v51  ;;  %v183_v19 = vadd.f32 %v182_v12, %v3924_v51 }
  0xdf   :  { %v228_v22 = vadd.f32 %v227_v18, %v213_v14 }
  0xe4   :  { %v3930_v57 = vpop.f32.mrf.mxu3 }
  0xe5   :  { %v214_v20 = vmul.f32 %v3930_v57, %v3930_v57  ;;  %v184_v21 = vadd.f32 %v183_v19, %v3930_v57 }
  0xe7   :  { %v229_v26 = vadd.f32 %v228_v22, %v214_v20 }
  0xec   :  { %v3938_v0 = vpop.f32.mrf.mxu3 }
  0xed   :  { %v215_v23 = vmul.f32 %v3938_v0, %v3938_v0  ;;  %v185_v27 = vadd.f32 %v184_v21, %v3938_v0  ;;  %v171_v21 = vld [vmem:[%s5861_s2] sm:$0x1] }
  0xef   :  { %v230_v30 = vadd.f32 %v229_v26, %v215_v23 }
  0xf4   :  { %v3957_v15 = vpop.f32.mrf.mxu3 }
  0xf5   :  { %v216_v28 = vmul.f32 %v3957_v15, %v3957_v15  ;;  %v186_v29 = vadd.f32 %v185_v27, %v3957_v15 }
  0xf7   :  { %v231_v44 = vadd.f32 %v230_v30, %v216_v28 }
  0xfc   :  { %v3975_v31 = vpop.f32.mrf.mxu3 }
  0xfd   :  { %v187_v45 = vadd.f32 %v186_v29, %v3975_v31  ;;  %v217_v46 = vmul.f32 %v3975_v31, %v3975_v31 }
  0xff   :  { %v188_v48 = vrot.slane %v187_v45, 4  ;;  %v232_v49 = vadd.f32 %v231_v44, %v217_v46 }
 0x101   :  { %v189_v53 = vadd.f32 %v188_v48, %v187_v45  ;;  %v233_v54 = vrot.slane %v232_v49, 4 }
 0x103   :  { %v190_v55 = vrot.slane %v189_v53, 2  ;;  %v234_v56 = vadd.f32 %v233_v54, %v232_v49 }
 0x105   :  { %v191_v60 = vadd.f32 %v190_v55, %v189_v53  ;;  %v235_v61 = vrot.slane %v234_v56, 2 }
 0x107   :  { %v192_v62 = vrot.slane %v191_v60, 1  ;;  %v236_v63 = vadd.f32 %v235_v61, %v234_v56 }
 0x109   :  { %v193_v3 = vadd.f32 %v192_v62, %v191_v60  ;;  %v237_v4 = vrot.slane %v236_v63, 1 }
 0x10b   :  { %v3998_v6 = vmul.f32 %v3992_v2, %v193_v3  ;;  %v238_v7 = vadd.f32 %v237_v4, %v236_v63 }
 0x10d   :  { %v239_v8 = vmul.f32 %v238_v7, %v3992_v2  ;;  %v240_v9 = vmul.f32 %v3998_v6, %v3998_v6  ;;  %v264_v11 = vsub.f32 %v3913_v43, %v3998_v6  ;;  %v266_v13 = vsub.f32 %v3930_v57, %v3998_v6 }
 0x10e   :  { %v268_v14 = vsub.f32 %v3957_v15, %v3998_v6  ;;  %v254_v57 = vsub.f32 %v3897_v35, %v3998_v6  ;;  %v255_v24 = vsub.f32 %v3901_v37, %v3998_v6  ;;  %v258_v26 = vsub.f32 %v3891_v32, %v3998_v6 }
 0x10f   :  { %v241_v10 = vsub.f32 %v239_v8, %v240_v9  ;;  %v259_v27 = vsub.f32 %v3893_v33, %v3998_v6  ;;  %v269_v48 = vsub.f32 %v3975_v31, %v3998_v6  ;;  %v256_v49 = vsub.f32 %v3907_v40, %v3998_v6 }
 0x110   :  { %v265_v50 = vsub.f32 %v3924_v51, %v3998_v6  ;;  %v257_v54 = vsub.f32 %v3919_v47, %v3998_v6  ;;  %v260_v55 = vsub.f32 %v3895_v34, %v3998_v6  ;;  %v261_v56 = vsub.f32 %v3899_v36, %v3998_v6 }
 0x111   :  { %v242_v12 = vadd.f32 1e-05, %v241_v10  ;;  %v267_v40 = vsub.f32 %v3938_v0, %v3998_v6 }
 0x113   :  { %3680 = vrsqrt.f32 %v242_v12  ;;  %vm249_vm2 = vweird.f32 %v242_v12 }
 0x119   :  { %v3681_v16 = vpop.eup %3680 }
 0x11a   :  { %v244_v17 = vmul.f32 %v3681_v16, %v242_v12  ;;  %vm250_vm1 = vweird.f32 %v3681_v16 }
 0x11b   :  { %vm251_vm3 = vmor %vm249_vm2, %vm250_vm1 }
 0x11c   :  { %v245_v18 = vmul.f32 %v3681_v16, %v244_v17 }
 0x11e   :  { %v246_v19 = vmul.f32 0.5, %v245_v18 }
 0x120   :  { %v247_v20 = vsub.f32 1.5, %v246_v19 }
 0x122   :  { %v248_v22 = vmul.f32 %v3681_v16, %v247_v20 }
 0x124   :  { %v252_v43 = vsel %vm251_vm3, %v3681_v16, %v248_v22 }
 0x125   :  { %v253_v23 = vmul.f32 %v252_v43, %v171_v21 }
 0x127   :  { %v4014_v15 = vperm.slane %v253_v23, 0 }
 0x129   :  { %v271_v28 = vmul.f32 %v4014_v15, %v254_v57  ;;  %v272_v35 = vmul.f32 %v4014_v15, %v255_v24  ;;  %v275_v29 = vmul.f32 %v4014_v15, %v258_v26  ;;  %v276_v30 = vmul.f32 %v4014_v15, %v259_v27 }
 0x12a   :  { %v281_v58 = vmul.f32 %v4014_v15, %v264_v11  ;;  %v282_v31 = vmul.f32 %v4014_v15, %v265_v50  ;;  %v273_v51 = vmul.f32 %v4014_v15, %v256_v49  ;;  %v274_v59 = vmul.f32 %v4014_v15, %v257_v54 }
 0x12b   :  { %v288_v37 = vadd.f32 %v4021_v25, %v271_v28  ;;  %v289_v41 = vadd.f32 %v4021_v25, %v272_v35  ;;  %v292_v42 = vadd.f32 %v4021_v25, %v275_v29  ;;  %v293_v44 = vadd.f32 %v4021_v25, %v276_v30 }
 0x12c   :  { %v283_v47 = vmul.f32 %v4014_v15, %v266_v13  ;;  %v298_v34 = vadd.f32 %v4021_v25, %v281_v58  ;;  %v299_v60 = vadd.f32 %v4021_v25, %v282_v31  ;;  %v284_v36 = vmul.f32 %v4014_v15, %v267_v40 }
 0x12d   :  { %v304_v32 = vmax.f32 %v288_v37, 0.0  ;;  %v305_v45 = vmax.f32 %v289_v41, 0.0  ;;  %v308_v46 = vmax.f32 %v292_v42, 0.0  ;;  %v309_v33 = vmax.f32 %v293_v44, 0.0 }
 0x12e   :  { %v285_v61 = vmul.f32 %v4014_v15, %v268_v14  ;;  %v277_v62 = vmul.f32 %v4014_v15, %v260_v55  ;;  %v278_v0 = vmul.f32 %v4014_v15, %v261_v56  ;;  %v300_v63 = vadd.f32 %v4021_v25, %v283_v47 }
 0x12f   :  { %v320_v52 = vpack.c.bf16 %v305_v45, %v304_v32  ;;  %v322_v53 = vpack.c.bf16 %v309_v33, %v308_v46  ;;  %v286_v1 = vmul.f32 %v4014_v15, %v269_v48  ;;  %v314_v3 = vmax.f32 %v298_v34, 0.0 }
 0x130   :  { %v315_v4 = vmax.f32 %v299_v60, 0.0  ;;  %v301_v5 = vadd.f32 %v4021_v25, %v284_v36  ;;  %v302_v7 = vadd.f32 %v4021_v25, %v285_v61  ;;  %v316_v8 = vmax.f32 %v300_v63, 0.0 }
 0x131   :  { %401 = vmatmul.bf16.vlgmr.msrb.gmra.mxu0 %v320_v52  ;;  %411 = vmatmul.bf16.vlgmr.msra.gmra.mxu1 %v322_v53  ;;  %v303_v9 = vadd.f32 %v4021_v25, %v286_v1  ;;  %v290_v10 = vadd.f32 %v4021_v25, %v273_v51  ;;  %v291_v14 = vadd.f32 %v4021_v25, %v274_v59 }
 0x132   :  { %v325_v11 = vpack.c.bf16 %v315_v4, %v314_v3  ;;  %v317_v12 = vmax.f32 %v301_v5, 0.0  ;;  %v318_v13 = vmax.f32 %v302_v7, 0.0  ;;  %v294_v16 = vadd.f32 %v4021_v25, %v277_v62 }
 0x133   :  { %v295_v17 = vadd.f32 %v4021_v25, %v278_v0  ;;  %v319_v18 = vmax.f32 %v303_v9, 0.0  ;;  %v306_v21 = vmax.f32 %v290_v10, 0.0  ;;  %v307_v22 = vmax.f32 %v291_v14, 0.0 }
 0x134   :  { %v326_v19 = vpack.c.bf16 %v317_v12, %v316_v8  ;;  %v310_v43 = vmax.f32 %v294_v16, 0.0  ;;  %v262_v26 = vsub.f32 %v3903_v38, %v3998_v6  ;;  %v263_v27 = vsub.f32 %v3905_v39, %v3998_v6 }
 0x135   :  { %v327_v20 = vpack.c.bf16 %v319_v18, %v318_v13  ;;  %v311_v23 = vmax.f32 %v295_v17, 0.0  ;;  %v321_v57 = vpack.c.bf16 %v307_v22, %v306_v21 }
 0x136   :  { %v279_v28 = vmul.f32 %v4014_v15, %v262_v26  ;;  %v280_v35 = vmul.f32 %v4014_v15, %v263_v27  ;;  %v3574_v27 = vld [vmem:[%s5860_s1 + $0xb8] sm:$0xff] }
 0x137   :  { %v323_v24 = vpack.c.bf16 %v311_v23, %v310_v43  ;;  %657 = vmatpush.bf16.msra.mxu0 %v3574_v27  ;;  %3655 = vmatpush.bf16.msra.mxu2 %v3574_v27 }
 0x138   :  { %v296_v29 = vadd.f32 %v4021_v25, %v279_v28  ;;  %v297_v30 = vadd.f32 %v4021_v25, %v280_v35 }
 0x13a   :  { %v312_v37 = vmax.f32 %v296_v29, 0.0  ;;  %v313_v41 = vmax.f32 %v297_v30, 0.0 }
 0x13c   :  { %v324_v42 = vpack.c.bf16 %v313_v41, %v312_v37 }
 0x141   :  { %406 = vmatmul.bf16.gmra.mxu0 %v321_v57  ;;  %416 = vmatmul.bf16.gmra.mxu1 %v323_v24 }
 0x151   :  { %421 = vmatmul.bf16.gmra.mxu1 %v324_v42  ;;  %v3573_v42 = vld [vmem:[%s5860_s1 + $0xb0] sm:$0xff] }
 0x152   :  { %658 = vmatpush.bf16.msra.mxu0 %v3573_v42  ;;  %3656 = vmatpush.bf16.msra.mxu2 %v3573_v42 }
 0x161   :  { %426 = vmatmul.bf16.gmra.mxu1 %v325_v11 }
 0x171   :  { %431 = vmatmul.bf16.gmra.mxu1 %v326_v19 }
 0x181   :  { %436 = vmatmul.bf16.gmra.mxu1 %v327_v20 }
 0x1ae   :  { %v4077_v44 = vpop.f32.mrf.mxu1  ;;  %v4083_v6 = vpop.f32.mrf.mxu0 }
 0x1af   :  { %v466_v50 = vmul.f32 %v4083_v6, %v4083_v6  ;;  %v470_v59 = vmul.f32 %v4077_v44, %v4077_v44 }
 0x1b6   :  { %v4079_v38 = vpop.f32.mrf.mxu1  ;;  %v4087_v32 = vpop.f32.mrf.mxu0 }
 0x1b7   :  { %v467_v48 = vmul.f32 %v4087_v32, %v4087_v32  ;;  %v444_v52 = vadd.f32 %v4087_v32, %v4083_v6  ;;  %v471_v60 = vmul.f32 %v4079_v38, %v4079_v38 }
 0x1b9   :  { %v482_v55 = vadd.f32 %v467_v48, %v466_v50 }
 0x1be   :  { %v4081_v39 = vpop.f32.mrf.mxu1  ;;  %v4091_v45 = vpop.f32.mrf.mxu0 }
 0x1bf   :  { %v468_v53 = vmul.f32 %v4091_v45, %v4091_v45  ;;  %v445_v54 = vadd.f32 %v444_v52, %v4091_v45  ;;  %v472_v0 = vmul.f32 %v4081_v39, %v4081_v39 }
 0x1c1   :  { %v483_v58 = vadd.f32 %v482_v55, %v468_v53 }
 0x1c6   :  { %v4085_v15 = vpop.f32.mrf.mxu1  ;;  %v4099_v49 = vpop.f32.mrf.mxu0 }
 0x1c7   :  { %v469_v56 = vmul.f32 %v4099_v49, %v4099_v49  ;;  %v446_v31 = vadd.f32 %v445_v54, %v4099_v49  ;;  %v473_v3 = vmul.f32 %v4085_v15, %v4085_v15  ;;  %v3572_v54 = vld [vmem:[%s5860_s1 + $0xa8] sm:$0xff] }
 0x1c8   :  { %659 = vmatpush.bf16.msra.mxu0 %v3572_v54  ;;  %3657 = vmatpush.bf16.msra.mxu2 %v3572_v54 }
 0x1c9   :  { %v484_v51 = vadd.f32 %v483_v58, %v469_v56  ;;  %v447_v47 = vadd.f32 %v446_v31, %v4077_v44 }
 0x1cb   :  { %v485_v34 = vadd.f32 %v484_v51, %v470_v59  ;;  %v448_v36 = vadd.f32 %v447_v47, %v4079_v38  ;;  %v3571_v51 = vld [vmem:[%s5860_s1 + $0xa0] sm:$0xff] }
 0x1cc   :  { %660 = vmatpush.bf16.msra.mxu0 %v3571_v51  ;;  %3658 = vmatpush.bf16.msra.mxu2 %v3571_v51 }
 0x1cd   :  { %v486_v62 = vadd.f32 %v485_v34, %v471_v60  ;;  %v449_v63 = vadd.f32 %v448_v36, %v4081_v39  ;;  %v3570_v34 = vld [vmem:[%s5860_s1 + $0x98] sm:$0xff] }
 0x1ce   :  { %v4089_v25 = vpop.f32.mrf.mxu1 }
 0x1cf   :  { %v487_v1 = vadd.f32 %v486_v62, %v472_v0  ;;  %v450_v4 = vadd.f32 %v449_v63, %v4085_v15  ;;  %v474_v9 = vmul.f32 %v4089_v25, %v4089_v25  ;;  %v3569_v63 = vld [vmem:[%s5860_s1 + $0x90] sm:$0xff] }
 0x1d0   :  { %661 = vmatpush.bf16.msra.mxu0 %v3570_v34  ;;  %3659 = vmatpush.bf16.msra.mxu2 %v3570_v34 }
 0x1d1   :  { %v488_v7 = vadd.f32 %v487_v1, %v473_v3  ;;  %v451_v8 = vadd.f32 %v450_v4, %v4089_v25 }
 0x1d3   :  { %v489_v11 = vadd.f32 %v488_v7, %v474_v9  ;;  %v3568_v7 = vld [vmem:[%s5860_s1 + $0x88] sm:$0xff] }
 0x1d4   :  { %662 = vmatpush.bf16.msra.mxu0 %v3569_v63  ;;  %3660 = vmatpush.bf16.msra.mxu2 %v3569_v63 }
 0x1d6   :  { %v4093_v46 = vpop.f32.mrf.mxu1 }
 0x1d7   :  { %v475_v10 = vmul.f32 %v4093_v46, %v4093_v46  ;;  %v452_v12 = vadd.f32 %v451_v8, %v4093_v46 }
 0x1d8   :  { %663 = vmatpush.bf16.msra.mxu0 %v3568_v7  ;;  %3661 = vmatpush.bf16.msra.mxu2 %v3568_v7 }
 0x1d9   :  { %v490_v16 = vadd.f32 %v489_v11, %v475_v10 }
 0x1de   :  { %v4095_v33 = vpop.f32.mrf.mxu1 }
 0x1df   :  { %v476_v13 = vmul.f32 %v4095_v33, %v4095_v33  ;;  %v453_v14 = vadd.f32 %v452_v12, %v4095_v33  ;;  %v3567_v12 = vld [vmem:[%s5860_s1 + $0x80] sm:$0xff] }
 0x1e0   :  { %664 = vmatpush.bf16.msra.mxu0 %v3567_v12  ;;  %3662 = vmatpush.bf16.msra.mxu2 %v3567_v12 }
 0x1e1   :  { %v491_v19 = vadd.f32 %v490_v16, %v476_v13 }
 0x1e6   :  { %v4111_v40 = vpop.f32.mrf.mxu1 }
 0x1e7   :  { %v477_v17 = vmul.f32 %v4111_v40, %v4111_v40  ;;  %v454_v20 = vadd.f32 %v453_v14, %v4111_v40 }
 0x1e9   :  { %v492_v43 = vadd.f32 %v491_v19, %v477_v17 }
 0x1ee   :  { %v4119_v61 = vpop.f32.mrf.mxu1 }
 0x1ef   :  { %v478_v21 = vmul.f32 %v4119_v61, %v4119_v61  ;;  %v455_v22 = vadd.f32 %v454_v20, %v4119_v61 }
 0x1f1   :  { %v493_v57 = vadd.f32 %v492_v43, %v478_v21 }
 0x1f6   :  { %v4127_v5 = vpop.f32.mrf.mxu1 }
 0x1f7   :  { %v479_v23 = vmul.f32 %v4127_v5, %v4127_v5  ;;  %v456_v24 = vadd.f32 %v455_v22, %v4127_v5 }
 0x1f9   :  { %v494_v35 = vadd.f32 %v493_v57, %v479_v23  ;;  %v4205_v23 = vld [vmem:[%s5861_s2 + $0xa] ss:$0 sm:$0xff] }
 0x1fe   :  { %v4140_v18 = vpop.f32.mrf.mxu1 }
 0x1ff   :  { %v480_v26 = vmul.f32 %v4140_v18, %v4140_v18  ;;  %v457_v28 = vadd.f32 %v456_v24, %v4140_v18 }
 0x201   :  { %v495_v30 = vadd.f32 %v494_v35, %v480_v26 }
 0x206   :  { %v4155_v29 = vpop.f32.mrf.mxu1 }
 0x207   :  { %v458_v37 = vadd.f32 %v457_v28, %v4155_v29  ;;  %v481_v41 = vmul.f32 %v4155_v29, %v4155_v29 }
 0x209   :  { %v459_v48 = vrot.slane %v458_v37, 4  ;;  %v496_v50 = vadd.f32 %v495_v30, %v481_v41 }
 0x20b   :  { %v460_v52 = vadd.f32 %v459_v48, %v458_v37  ;;  %v497_v53 = vrot.slane %v496_v50, 4 }
 0x20d   :  { %v461_v55 = vrot.slane %v460_v52, 2  ;;  %v498_v56 = vadd.f32 %v497_v53, %v496_v50 }
 0x20f   :  { %v462_v58 = vadd.f32 %v461_v55, %v460_v52  ;;  %v499_v31 = vrot.slane %v498_v56, 2 }
 0x211   :  { %v463_v59 = vrot.slane %v462_v58, 1  ;;  %v500_v47 = vadd.f32 %v499_v31, %v498_v56 }
 0x213   :  { %v464_v60 = vadd.f32 %v463_v59, %v462_v58  ;;  %v501_v36 = vrot.slane %v500_v47, 1 }
 0x215   :  { %v4173_v62 = vmul.f32 %v464_v60, %v3992_v2  ;;  %v502_v0 = vadd.f32 %v501_v36, %v500_v47 }
 0x217   :  { %v503_v1 = vmul.f32 %v502_v0, %v3992_v2  ;;  %v504_v3 = vmul.f32 %v4173_v62, %v4173_v62  ;;  %v528_v8 = vsub.f32 %v4095_v33, %v4173_v62  ;;  %v530_v10 = vsub.f32 %v4119_v61, %v4173_v62  ;;  %v442_v61 = vld [vmem:[%s5861_s2 + $0x1] sm:$0x1] }
 0x218   :  { %v532_v11 = vsub.f32 %v4140_v18, %v4173_v62  ;;  %v518_v21 = vsub.f32 %v4083_v6, %v4173_v62  ;;  %v519_v43 = vsub.f32 %v4087_v32, %v4173_v62  ;;  %v522_v57 = vsub.f32 %v4077_v44, %v4173_v62 }
 0x219   :  { %v505_v4 = vsub.f32 %v503_v1, %v504_v3  ;;  %v523_v24 = vsub.f32 %v4079_v38, %v4173_v62  ;;  %v533_v48 = vsub.f32 %v4155_v29, %v4173_v62  ;;  %v520_v50 = vsub.f32 %v4091_v45, %v4173_v62 }
 0x21a   :  { %v529_v52 = vsub.f32 %v4111_v40, %v4173_v62  ;;  %v521_v55 = vsub.f32 %v4099_v49, %v4173_v62  ;;  %v524_v56 = vsub.f32 %v4081_v39, %v4173_v62  ;;  %v525_v58 = vsub.f32 %v4085_v15, %v4173_v62 }
 0x21b   :  { %v506_v9 = vadd.f32 1e-05, %v505_v4  ;;  %v531_v45 = vsub.f32 %v4127_v5, %v4173_v62 }
 0x21d   :  { %3682 = vrsqrt.f32 %v506_v9  ;;  %vm513_vm5 = vweird.f32 %v506_v9 }
 0x223   :  { %v3683_v13 = vpop.eup %3682 }
 0x224   :  { %v508_v14 = vmul.f32 %v3683_v13, %v506_v9  ;;  %vm514_vm4 = vweird.f32 %v3683_v13 }
 0x225   :  { %vm515_vm6 = vmor %vm513_vm5, %vm514_vm4 }
 0x226   :  { %v509_v16 = vmul.f32 %v3683_v13, %v508_v14 }
 0x228   :  { %v510_v33 = vmul.f32 0.5, %v509_v16 }
 0x22a   :  { %v511_v17 = vsub.f32 1.5, %v510_v33 }
 0x22c   :  { %v512_v18 = vmul.f32 %v3683_v13, %v511_v17 }
 0x22e   :  { %v516_v19 = vsel %vm515_vm6, %v3683_v13, %v512_v18 }
 0x22f   :  { %v517_v20 = vmul.f32 %v516_v19, %v442_v61 }
 0x231   :  { %v4198_v22 = vperm.slane %v517_v20, 0 }
 0x233   :  { %v535_v26 = vmul.f32 %v4198_v22, %v518_v21  ;;  %v536_v6 = vmul.f32 %v4198_v22, %v519_v43  ;;  %v539_v27 = vmul.f32 %v4198_v22, %v522_v57  ;;  %v540_v28 = vmul.f32 %v4198_v22, %v523_v24 }
 0x234   :  { %v545_v31 = vmul.f32 %v4198_v22, %v528_v8  ;;  %v546_v29 = vmul.f32 %v4198_v22, %v529_v52  ;;  %v537_v40 = vmul.f32 %v4198_v22, %v520_v50  ;;  %v538_v51 = vmul.f32 %v4198_v22, %v521_v55 }
 0x235   :  { %v552_v32 = vadd.f32 %v4205_v23, %v535_v26  ;;  %v553_v35 = vadd.f32 %v4205_v23, %v536_v6  ;;  %v556_v30 = vadd.f32 %v4205_v23, %v539_v27  ;;  %v557_v37 = vadd.f32 %v4205_v23, %v540_v28 }
 0x236   :  { %v547_v49 = vmul.f32 %v4198_v22, %v530_v10  ;;  %v562_v39 = vadd.f32 %v4205_v23, %v545_v31  ;;  %v563_v59 = vadd.f32 %v4205_v23, %v546_v29  ;;  %v548_v15 = vmul.f32 %v4198_v22, %v531_v45 }
 0x237   :  { %v568_v44 = vmax.f32 %v552_v32, 0.0  ;;  %v569_v41 = vmax.f32 %v553_v35, 0.0  ;;  %v572_v42 = vmax.f32 %v556_v30, 0.0  ;;  %v573_v38 = vmax.f32 %v557_v37, 0.0 }
 0x238   :  { %v549_v47 = vmul.f32 %v4198_v22, %v532_v11  ;;  %v541_v34 = vmul.f32 %v4198_v22, %v524_v56  ;;  %v542_v5 = vmul.f32 %v4198_v22, %v525_v58  ;;  %v564_v60 = vadd.f32 %v4205_v23, %v547_v49 }
 0x239   :  { %v584_v53 = vpack.c.bf16 %v569_v41, %v568_v44  ;;  %v586_v54 = vpack.c.bf16 %v573_v38, %v572_v42  ;;  %v550_v36 = vmul.f32 %v4198_v22, %v533_v48  ;;  %v578_v0 = vmax.f32 %v562_v39, 0.0  ;;  %v3581_v44 = vld [vmem:[%s5860_s1 + $0xf0] sm:$0xff]  ;;  %v3580_v38 = vld [vmem:[%s5860_s1 + $0xe8] sm:$0xff] }
 0x23a   :  { %v579_v63 = vmax.f32 %v563_v59, 0.0  ;;  %v565_v1 = vadd.f32 %v4205_v23, %v548_v15  ;;  %v566_v3 = vadd.f32 %v4205_v23, %v549_v47  ;;  %v580_v4 = vmax.f32 %v564_v60, 0.0 }
 0x23b   :  { %665 = vmatmul.bf16.vlgmr.msra.gmra.mxu0 %v584_v53  ;;  %675 = vmatmul.bf16.vlgmr.msra.gmra.mxu2 %v586_v54  ;;  %v567_v7 = vadd.f32 %v4205_v23, %v550_v36  ;;  %v554_v8 = vadd.f32 %v4205_v23, %v537_v40  ;;  %v555_v12 = vadd.f32 %v4205_v23, %v538_v51  ;;  %v3579_v54 = vld [vmem:[%s5860_s1 + $0xe0] sm:$0xff] }
 0x23c   :  { %v589_v9 = vpack.c.bf16 %v579_v63, %v578_v0  ;;  %v581_v10 = vmax.f32 %v565_v1, 0.0  ;;  %v582_v11 = vmax.f32 %v566_v3, 0.0  ;;  %v558_v13 = vadd.f32 %v4205_v23, %v541_v34 }
 0x23d   :  { %v559_v14 = vadd.f32 %v4205_v23, %v542_v5  ;;  %v583_v16 = vmax.f32 %v567_v7, 0.0  ;;  %v570_v61 = vmax.f32 %v554_v8, 0.0  ;;  %v571_v18 = vmax.f32 %v555_v12, 0.0 }
 0x23e   :  { %v590_v33 = vpack.c.bf16 %v581_v10, %v580_v4  ;;  %v574_v19 = vmax.f32 %v558_v13, 0.0  ;;  %v526_v57 = vsub.f32 %v4089_v25, %v4173_v62  ;;  %v527_v24 = vsub.f32 %v4093_v46, %v4173_v62  ;;  %v3582_v46 = vld [vmem:[%s5860_s1 + $0xf8] sm:$0xff] }
 0x23f   :  { %v591_v17 = vpack.c.bf16 %v583_v16, %v582_v11  ;;  %v575_v20 = vmax.f32 %v559_v14, 0.0  ;;  %v585_v21 = vpack.c.bf16 %v571_v18, %v570_v61  ;;  %921 = vmatpush.bf16.msrb.mxu3 %v3582_v46 }
 0x240   :  { %v543_v26 = vmul.f32 %v4198_v22, %v526_v57  ;;  %v544_v6 = vmul.f32 %v4198_v22, %v527_v24 }
 0x241   :  { %v587_v43 = vpack.c.bf16 %v575_v20, %v574_v19 }
 0x242   :  { %v560_v27 = vadd.f32 %v4205_v23, %v543_v26  ;;  %v561_v28 = vadd.f32 %v4205_v23, %v544_v6 }
 0x243   :  { %922 = vmatpush.bf16.msrb.mxu3 %v3581_v44 }
 0x244   :  { %v576_v32 = vmax.f32 %v560_v27, 0.0  ;;  %v577_v35 = vmax.f32 %v561_v28, 0.0 }
 0x246   :  { %v588_v30 = vpack.c.bf16 %v577_v35, %v576_v32 }
 0x247   :  { %923 = vmatpush.bf16.msrb.mxu3 %v3580_v38 }
 0x24b   :  { %670 = vmatmul.bf16.gmra.mxu0 %v585_v21  ;;  %680 = vmatmul.bf16.gmra.mxu2 %v587_v43 }
 0x24c   :  { %924 = vmatpush.bf16.msrb.mxu3 %v3579_v54 }
 0x25b   :  { %685 = vmatmul.bf16.gmra.mxu2 %v588_v30 }
 0x26b   :  { %690 = vmatmul.bf16.gmra.mxu2 %v589_v9 }
 0x27b   :  { %695 = vmatmul.bf16.gmra.mxu2 %v590_v33 }
 0x28b   :  { %700 = vmatmul.bf16.gmra.mxu2 %v591_v17 }
 0x2b8   :  { %v4270_v22 = vpop.f32.mrf.mxu0 }
 0x2b9   :  { %v730_v56 = vmul.f32 %v4270_v22, %v4270_v22 }
 0x2be   :  { %v4261_v37 = vpop.f32.mrf.mxu2 }
 0x2bf   :  { %v734_v15 = vmul.f32 %v4261_v37, %v4261_v37 }
 0x2c0   :  { %v4277_v41 = vpop.f32.mrf.mxu0 }
 0x2c1   :  { %v731_v53 = vmul.f32 %v4277_v41, %v4277_v41  ;;  %v708_v58 = vadd.f32 %v4277_v41, %v4270_v22 }
 0x2c3   :  { %v746_v45 = vadd.f32 %v731_v53, %v730_v56 }
 0x2c6   :  { %v4263_v25 = vpop.f32.mrf.mxu2 }
 0x2c7   :  { %v735_v60 = vmul.f32 %v4263_v25, %v4263_v25 }
 0x2c8   :  { %v4286_v50 = vpop.f32.mrf.mxu0 }
 0x2c9   :  { %v732_v31 = vmul.f32 %v4286_v50, %v4286_v50  ;;  %v709_v29 = vadd.f32 %v708_v58, %v4286_v50 }
 0x2cb   :  { %v747_v49 = vadd.f32 %v746_v45, %v732_v31 }
 0x2ce   :  { %v4268_v62 = vpop.f32.mrf.mxu2 }
 0x2cf   :  { %v736_v63 = vmul.f32 %v4268_v62, %v4268_v62 }
 0x2d0   :  { %v4295_v55 = vpop.f32.mrf.mxu0 }
 0x2d1   :  { %v733_v40 = vmul.f32 %v4295_v55, %v4295_v55  ;;  %v710_v39 = vadd.f32 %v709_v29, %v4295_v55 }
 0x2d3   :  { %v748_v59 = vadd.f32 %v747_v49, %v733_v40  ;;  %v711_v47 = vadd.f32 %v710_v39, %v4261_v37 }
 0x2d5   :  { %v749_v34 = vadd.f32 %v748_v59, %v734_v15  ;;  %v712_v36 = vadd.f32 %v711_v47, %v4263_v25  ;;  %v3578_v15 = vld [vmem:[%s5860_s1 + $0xd8] sm:$0xff] }
 0x2d6   :  { %v4272_v23 = vpop.f32.mrf.mxu2  ;;  %925 = vmatpush.bf16.msrb.mxu3 %v3578_v15 }
 0x2d7   :  { %v750_v0 = vadd.f32 %v749_v34, %v735_v60  ;;  %v713_v1 = vadd.f32 %v712_v36, %v4268_v62  ;;  %v737_v7 = vmul.f32 %v4272_v23, %v4272_v23  ;;  %v3577_v60 = vld [vmem:[%s5860_s1 + $0xd0] sm:$0xff] }
 0x2d9   :  { %v751_v3 = vadd.f32 %v750_v0, %v736_v63  ;;  %v714_v8 = vadd.f32 %v713_v1, %v4272_v23  ;;  %v3576_v1 = vld [vmem:[%s5860_s1 + $0xc8] sm:$0xff] }
 0x2da   :  { %926 = vmatpush.bf16.msrb.mxu3 %v3577_v60 }
 0x2db   :  { %v752_v11 = vadd.f32 %v751_v3, %v737_v7 }
 0x2de   :  { %v4279_v42 = vpop.f32.mrf.mxu2  ;;  %927 = vmatpush.bf16.msrb.mxu3 %v3576_v1 }
 0x2df   :  { %v738_v9 = vmul.f32 %v4279_v42, %v4279_v42  ;;  %v715_v10 = vadd.f32 %v714_v8, %v4279_v42 }
 0x2e1   :  { %v753_v13 = vadd.f32 %v752_v11, %v738_v9 }
 0x2e6   :  { %v4284_v48 = vpop.f32.mrf.mxu2 }
 0x2e7   :  { %v739_v12 = vmul.f32 %v4284_v48, %v4284_v48  ;;  %v716_v14 = vadd.f32 %v715_v10, %v4284_v48  ;;  %v3575_v10 = vld [vmem:[%s5860_s1 + $0xc0] sm:$0xff] }
 0x2e8   :  { %928 = vmatpush.bf16.msrb.mxu3 %v3575_v10 }
 0x2e9   :  { %v754_v17 = vadd.f32 %v753_v13, %v739_v12 }
 0x2ee   :  { %v4288_v52 = vpop.f32.mrf.mxu2 }
 0x2ef   :  { %v740_v16 = vmul.f32 %v4288_v52, %v4288_v52  ;;  %v717_v33 = vadd.f32 %v716_v14, %v4288_v52 }
 0x2f1   :  { %v755_v19 = vadd.f32 %v754_v17, %v740_v16 }
 0x2f6   :  { %v4306_v51 = vpop.f32.mrf.mxu2 }
 0x2f7   :  { %v741_v61 = vmul.f32 %v4306_v51, %v4306_v51  ;;  %v718_v20 = vadd.f32 %v717_v33, %v4306_v51 }
 0x2f9   :  { %v756_v57 = vadd.f32 %v755_v19, %v741_v61 }
 0x2fe   :  { %v4312_v5 = vpop.f32.mrf.mxu2 }
 0x2ff   :  { %v742_v21 = vmul.f32 %v4312_v5, %v4312_v5  ;;  %v719_v43 = vadd.f32 %v718_v20, %v4312_v5 }
 0x301   :  { %v757_v26 = vadd.f32 %v756_v57, %v742_v21  ;;  %v4385_v21 = vld [vmem:[%s5861_s2 + $0xb] ss:$0 sm:$0xff] }
 0x306   :  { %v4320_v4 = vpop.f32.mrf.mxu2 }
 0x307   :  { %v743_v24 = vmul.f32 %v4320_v4, %v4320_v4  ;;  %v720_v6 = vadd.f32 %v719_v43, %v4320_v4 }
 0x309   :  { %v758_v32 = vadd.f32 %v757_v26, %v743_v24 }
 0x30e   :  { %v4336_v18 = vpop.f32.mrf.mxu2 }
 0x30f   :  { %v744_v27 = vmul.f32 %v4336_v18, %v4336_v18  ;;  %v721_v28 = vadd.f32 %v720_v6, %v4336_v18 }
 0x311   :  { %v759_v30 = vadd.f32 %v758_v32, %v744_v27 }
 0x316   :  { %v703_v35 = vpop.f32.mrf.mxu2 }
 0x317   :  { %v722_v46 = vadd.f32 %v721_v28, %v703_v35  ;;  %v745_v44 = vmul.f32 %v703_v35, %v703_v35 }
 0x319   :  { %v723_v38 = vrot.slane %v722_v46, 4  ;;  %v760_v53 = vadd.f32 %v759_v30, %v745_v44 }
 0x31b   :  { %v724_v54 = vadd.f32 %v723_v38, %v722_v46  ;;  %v761_v56 = vrot.slane %v760_v53, 4 }
 0x31d   :  { %v725_v58 = vrot.slane %v724_v54, 2  ;;  %v762_v31 = vadd.f32 %v761_v56, %v760_v53 }
 0x31f   :  { %v726_v29 = vadd.f32 %v725_v58, %v724_v54  ;;  %v763_v45 = vrot.slane %v762_v31, 2 }
 0x321   :  { %v727_v40 = vrot.slane %v726_v29, 1  ;;  %v764_v49 = vadd.f32 %v763_v45, %v762_v31 }
 0x323   :  { %v728_v39 = vadd.f32 %v727_v40, %v726_v29  ;;  %v765_v59 = vrot.slane %v764_v49, 1 }
 0x325   :  { %v4352_v47 = vmul.f32 %v728_v39, %v3992_v2  ;;  %v766_v34 = vadd.f32 %v765_v59, %v764_v49 }
 0x327   :  { %v767_v36 = vmul.f32 %v766_v34, %v3992_v2  ;;  %v768_v0 = vmul.f32 %v4352_v47, %v4352_v47  ;;  %v792_v3 = vsub.f32 %v4288_v52, %v4352_v47  ;;  %v794_v8 = vsub.f32 %v4312_v5, %v4352_v47  ;;  %v706_v52 = vld [vmem:[%s5861_s2 + $0x2] sm:$0x1] }
 0x328   :  { %v796_v9 = vsub.f32 %v4336_v18, %v4352_v47  ;;  %v797_v61 = vsub.f32 %v703_v35, %v4352_v47  ;;  %v782_v19 = vsub.f32 %v4270_v22, %v4352_v47  ;;  %v783_v20 = vsub.f32 %v4277_v41, %v4352_v47 }
 0x329   :  { %v769_v63 = vsub.f32 %v767_v36, %v768_v0  ;;  %v790_v41 = vsub.f32 %v4279_v42, %v4352_v47  ;;  %v791_v28 = vsub.f32 %v4284_v48, %v4352_v47  ;;  %v784_v32 = vsub.f32 %v4286_v50, %v4352_v47 }
 0x32a   :  { %v793_v35 = vsub.f32 %v4306_v51, %v4352_v47  ;;  %v785_v46 = vsub.f32 %v4295_v55, %v4352_v47  ;;  %v795_v50 = vsub.f32 %v4320_v4, %v4352_v47 }
 0x32b   :  { %v770_v7 = vadd.f32 1e-05, %v769_v63 }
 0x32d   :  { %3684 = vrsqrt.f32 %v770_v7  ;;  %vm777_vm8 = vweird.f32 %v770_v7 }
 0x333   :  { %v3685_v11 = vpop.eup %3684 }
 0x334   :  { %v772_v12 = vmul.f32 %v3685_v11, %v770_v7  ;;  %vm778_vm7 = vweird.f32 %v3685_v11 }
 0x335   :  { %vm779_vm9 = vmor %vm777_vm8, %vm778_vm7 }
 0x336   :  { %v773_v13 = vmul.f32 %v3685_v11, %v772_v12 }
 0x338   :  { %v774_v14 = vmul.f32 0.5, %v773_v13 }
 0x33a   :  { %v775_v16 = vsub.f32 1.5, %v774_v14 }
 0x33c   :  { %v776_v5 = vmul.f32 %v3685_v11, %v775_v16  ;;  %v786_v16 = vsub.f32 %v4261_v37, %v4352_v47  ;;  %v789_v37 = vsub.f32 %v4272_v23, %v4352_v47 }
 0x33e   :  { %v780_v33 = vsel %vm779_vm9, %v3685_v11, %v776_v5 }
 0x33f   :  { %v781_v17 = vmul.f32 %v780_v33, %v706_v52  ;;  %v787_v52 = vsub.f32 %v4263_v25, %v4352_v47 }
 0x341   :  { %v4376_v18 = vperm.slane %v781_v17, 0 }
 0x343   :  { %v814_v43 = vmul.f32 %v4376_v18, %v797_v61  ;;  %v799_v57 = vmul.f32 %v4376_v18, %v782_v19  ;;  %v800_v24 = vmul.f32 %v4376_v18, %v783_v20  ;;  %v807_v44 = vmul.f32 %v4376_v18, %v790_v41 }
 0x344   :  { %v808_v38 = vmul.f32 %v4376_v18, %v791_v28  ;;  %v801_v53 = vmul.f32 %v4376_v18, %v784_v32  ;;  %v809_v42 = vmul.f32 %v4376_v18, %v792_v3  ;;  %v810_v48 = vmul.f32 %v4376_v18, %v793_v35 }
 0x345   :  { %v816_v26 = vadd.f32 %v4385_v21, %v799_v57  ;;  %v817_v6 = vadd.f32 %v4385_v21, %v800_v24  ;;  %v802_v51 = vmul.f32 %v4376_v18, %v785_v46  ;;  %v824_v54 = vadd.f32 %v4385_v21, %v807_v44  ;;  %v3597_v46 = vld [vmem:[%s5860_s1 + $0x170] sm:$0xff] }
 0x346   :  { %v825_v55 = vadd.f32 %v4385_v21, %v808_v38  ;;  %v811_v56 = vmul.f32 %v4376_v18, %v794_v8  ;;  %v826_v58 = vadd.f32 %v4385_v21, %v809_v42  ;;  %v827_v31 = vadd.f32 %v4385_v21, %v810_v48  ;;  %v3596_v38 = vld [vmem:[%s5860_s1 + $0x168] sm:$0xff]  ;;  %v3595_v48 = vld [vmem:[%s5860_s1 + $0x160] sm:$0xff] }
 0x347   :  { %v832_v27 = vmax.f32 %v816_v26, 0.0  ;;  %v833_v22 = vmax.f32 %v817_v6, 0.0  ;;  %v812_v29 = vmul.f32 %v4376_v18, %v795_v50  ;;  %v813_v45 = vmul.f32 %v4376_v18, %v796_v9 }
 0x348   :  { %v840_v40 = vmax.f32 %v824_v54, 0.0  ;;  %v841_v49 = vmax.f32 %v825_v55, 0.0  ;;  %v828_v4 = vadd.f32 %v4385_v21, %v811_v56  ;;  %v831_v39 = vadd.f32 %v4385_v21, %v814_v43 }
 0x349   :  { %v848_v30 = vpack.c.bf16 %v833_v22, %v832_v27  ;;  %v842_v59 = vmax.f32 %v826_v58, 0.0  ;;  %v843_v15 = vmax.f32 %v827_v31, 0.0  ;;  %v829_v34 = vadd.f32 %v4385_v21, %v812_v29 }
 0x34a   :  { %v830_v60 = vadd.f32 %v4385_v21, %v813_v45  ;;  %v852_v36 = vpack.c.bf16 %v841_v49, %v840_v40  ;;  %v844_v0 = vmax.f32 %v828_v4, 0.0  ;;  %v847_v63 = vmax.f32 %v831_v39, 0.0 }
 0x34b   :  { %929 = vmatmul.bf16.vlgmr.msrb.gmra.mxu3 %v848_v30  ;;  %v853_v1 = vpack.c.bf16 %v843_v15, %v842_v59  ;;  %v845_v3 = vmax.f32 %v829_v34, 0.0  ;;  %v818_v8 = vadd.f32 %v4385_v21, %v801_v53  ;;  %v819_v9 = vadd.f32 %v4385_v21, %v802_v51 }
 0x34c   :  { %v846_v7 = vmax.f32 %v830_v60, 0.0  ;;  %v803_v5 = vmul.f32 %v4376_v18, %v786_v16  ;;  %v804_v33 = vmul.f32 %v4376_v18, %v787_v52  ;;  %v788_v57 = vsub.f32 %v4268_v62, %v4352_v47 }
 0x34d   :  { %v854_v10 = vpack.c.bf16 %v845_v3, %v844_v0  ;;  %v834_v12 = vmax.f32 %v818_v8, 0.0  ;;  %v835_v13 = vmax.f32 %v819_v9, 0.0  ;;  %v806_v24 = vmul.f32 %v4376_v18, %v789_v37 }
 0x34e   :  { %v855_v11 = vpack.c.bf16 %v847_v63, %v846_v7  ;;  %v820_v17 = vadd.f32 %v4385_v21, %v803_v5  ;;  %v821_v61 = vadd.f32 %v4385_v21, %v804_v33  ;;  %v805_v25 = vmul.f32 %v4376_v18, %v788_v57 }
 0x34f   :  { %v849_v14 = vpack.c.bf16 %v835_v13, %v834_v12  ;;  %v823_v6 = vadd.f32 %v4385_v21, %v806_v24 }
 0x350   :  { %v836_v19 = vmax.f32 %v820_v17, 0.0  ;;  %v837_v20 = vmax.f32 %v821_v61, 0.0  ;;  %v822_v26 = vadd.f32 %v4385_v21, %v805_v25  ;;  %v3598_v21 = vld [vmem:[%s5860_s1 + $0x178] sm:$0xff] }
 0x351   :  { %v839_v22 = vmax.f32 %v823_v6, 0.0  ;;  %1303 = vmatpush.bf16.msrb.mxu1 %v3598_v21  ;;  %v3590_v6 = vld [vmem:[%s5860_s1 + $0x138] sm:$0xff] }
 0x352   :  { %v850_v43 = vpack.c.bf16 %v837_v20, %v836_v19  ;;  %v838_v27 = vmax.f32 %v822_v26, 0.0  ;;  %1187 = vmatpush.bf16.msrb.mxu0 %v3590_v6 }
 0x354   :  { %v851_v41 = vpack.c.bf16 %v839_v22, %v838_v27 }
 0x355   :  { %1304 = vmatpush.bf16.msrb.mxu1 %v3597_v46 }
 0x359   :  { %1305 = vmatpush.bf16.msrb.mxu1 %v3596_v38 }
 0x35b   :  { %934 = vmatmul.bf16.gmra.mxu3 %v849_v14 }
 0x35d   :  { %1306 = vmatpush.bf16.msrb.mxu1 %v3595_v48  ;;  %v3589_v48 = vld [vmem:[%s5860_s1 + $0x130] sm:$0xff] }
 0x35e   :  { %1188 = vmatpush.bf16.msrb.mxu0 %v3589_v48 }
 0x36b   :  { %939 = vmatmul.bf16.gmra.mxu3 %v850_v43 }
 0x37b   :  { %944 = vmatmul.bf16.gmra.mxu3 %v851_v41 }
 0x38b   :  { %949 = vmatmul.bf16.gmra.mxu3 %v852_v36 }
 0x39b   :  { %954 = vmatmul.bf16.gmra.mxu3 %v853_v1 }
 0x3ab   :  { %959 = vmatmul.bf16.gmra.mxu3 %v854_v10 }
 0x3bb   :  { %964 = vmatmul.bf16.gmra.mxu3 %v855_v11 }
 0x3ce   :  { %v4439_v62 = vpop.f32.mrf.mxu3 }
 0x3cf   :  { %v994_v54 = vmul.f32 %v4439_v62, %v4439_v62 }
 0x3d6   :  { %v4441_v28 = vpop.f32.mrf.mxu3 }
 0x3d7   :  { %v995_v51 = vmul.f32 %v4441_v28, %v4441_v28  ;;  %v972_v55 = vadd.f32 %v4441_v28, %v4439_v62 }
 0x3d9   :  { %v1010_v31 = vadd.f32 %v995_v51, %v994_v54 }
 0x3de   :  { %v4443_v23 = vpop.f32.mrf.mxu3 }
 0x3df   :  { %v996_v56 = vmul.f32 %v4443_v23, %v4443_v23  ;;  %v973_v58 = vadd.f32 %v972_v55, %v4443_v23 }
 0x3e1   :  { %v1011_v40 = vadd.f32 %v1010_v31, %v996_v56 }
 0x3e6   :  { %v4445_v47 = vpop.f32.mrf.mxu3 }
 0x3e7   :  { %v997_v29 = vmul.f32 %v4445_v47, %v4445_v47  ;;  %v974_v49 = vadd.f32 %v973_v58, %v4445_v47  ;;  %v3588_v58 = vld [vmem:[%s5860_s1 + $0x128] sm:$0xff] }
 0x3e8   :  { %1189 = vmatpush.bf16.msrb.mxu0 %v3588_v58 }
 0x3e9   :  { %v1012_v59 = vadd.f32 %v1011_v40, %v997_v29 }
 0x3ee   :  { %v4447_v18 = vpop.f32.mrf.mxu3 }
 0x3ef   :  { %v998_v4 = vmul.f32 %v4447_v18, %v4447_v18  ;;  %v975_v39 = vadd.f32 %v974_v49, %v4447_v18 }
 0x3f1   :  { %v1013_v34 = vadd.f32 %v1012_v59, %v998_v4  ;;  %v3587_v4 = vld [vmem:[%s5860_s1 + $0x120] sm:$0xff] }
 0x3f2   :  { %1190 = vmatpush.bf16.msrb.mxu0 %v3587_v4 }
 0x3f6   :  { %v4449_v32 = vpop.f32.mrf.mxu3 }
 0x3f7   :  { %v999_v15 = vmul.f32 %v4449_v32, %v4449_v32  ;;  %v976_v60 = vadd.f32 %v975_v39, %v4449_v32 }
 0x3f9   :  { %v1014_v63 = vadd.f32 %v1013_v34, %v999_v15 }
 0x3fe   :  { %v4454_v35 = vpop.f32.mrf.mxu3 }
 0x3ff   :  { %v1000_v36 = vmul.f32 %v4454_v35, %v4454_v35  ;;  %v977_v0 = vadd.f32 %v976_v60, %v4454_v35  ;;  %v3594_v60 = vld [vmem:[%s5860_s1 + $0x158] sm:$0xff] }
 0x400   :  { %1307 = vmatpush.bf16.msrb.mxu1 %v3594_v60 }
 0x401   :  { %v1015_v7 = vadd.f32 %v1014_v63, %v1000_v36  ;;  %v3586_v36 = vld [vmem:[%s5860_s1 + $0x118] sm:$0xff] }
 0x402   :  { %1191 = vmatpush.bf16.msrb.mxu0 %v3586_v36 }
 0x406   :  { %v4456_v30 = vpop.f32.mrf.mxu3 }
 0x407   :  { %v1001_v1 = vmul.f32 %v4456_v30, %v4456_v30  ;;  %v978_v8 = vadd.f32 %v977_v0, %v4456_v30 }
 0x409   :  { %v1016_v11 = vadd.f32 %v1015_v7, %v1001_v1  ;;  %v3593_v1 = vld [vmem:[%s5860_s1 + $0x150] sm:$0xff] }
 0x40a   :  { %v3585_v7 = vld [vmem:[%s5860_s1 + $0x110] sm:$0xff]  ;;  %1308 = vmatpush.bf16.msrb.mxu1 %v3593_v1 }
 0x40b   :  { %1192 = vmatpush.bf16.msrb.mxu0 %v3585_v7 }
 0x40e   :  { %v4461_v44 = vpop.f32.mrf.mxu3 }
 0x40f   :  { %v1002_v9 = vmul.f32 %v4461_v44, %v4461_v44  ;;  %v979_v10 = vadd.f32 %v978_v8, %v4461_v44 }
 0x411   :  { %v1017_v13 = vadd.f32 %v1016_v11, %v1002_v9  ;;  %v3592_v11 = vld [vmem:[%s5860_s1 + $0x148] sm:$0xff] }
 0x412   :  { %1309 = vmatpush.bf16.msrb.mxu1 %v3592_v11 }
 0x416   :  { %v4466_v53 = vpop.f32.mrf.mxu3 }
 0x417   :  { %v1003_v12 = vmul.f32 %v4466_v53, %v4466_v53  ;;  %v980_v14 = vadd.f32 %v979_v10, %v4466_v53 }
 0x419   :  { %v1018_v52 = vadd.f32 %v1017_v13, %v1003_v12  ;;  %v3584_v12 = vld [vmem:[%s5860_s1 + $0x108] sm:$0xff] }
 0x41a   :  { %1193 = vmatpush.bf16.msrb.mxu0 %v3584_v12 }
 0x41e   :  { %v4468_v42 = vpop.f32.mrf.mxu3 }
 0x41f   :  { %v1004_v16 = vmul.f32 %v4468_v42, %v4468_v42  ;;  %v981_v5 = vadd.f32 %v980_v14, %v4468_v42 }
 0x421   :  { %v1019_v61 = vadd.f32 %v1018_v52, %v1004_v16 }
 0x426   :  { %v4473_v50 = vpop.f32.mrf.mxu3 }
 0x427   :  { %v1005_v33 = vmul.f32 %v4473_v50, %v4473_v50  ;;  %v982_v19 = vadd.f32 %v981_v5, %v4473_v50 }
 0x429   :  { %v1020_v43 = vadd.f32 %v1019_v61, %v1005_v33  ;;  %v3591_v61 = vld [vmem:[%s5860_s1 + $0x140] sm:$0xff] }
 0x42a   :  { %1310 = vmatpush.bf16.msrb.mxu1 %v3591_v61 }
 0x42e   :  { %v4486_v45 = vpop.f32.mrf.mxu3 }
 0x42f   :  { %v1006_v20 = vmul.f32 %v4486_v45, %v4486_v45  ;;  %v983_v57 = vadd.f32 %v982_v19, %v4486_v45 }
 0x431   :  { %v1021_v25 = vadd.f32 %v1020_v43, %v1006_v20 }
 0x436   :  { %v4500_v3 = vpop.f32.mrf.mxu3 }
 0x437   :  { %v1007_v37 = vmul.f32 %v4500_v3, %v4500_v3  ;;  %v984_v24 = vadd.f32 %v983_v57, %v4500_v3 }
 0x439   :  { %v1022_v27 = vadd.f32 %v1021_v25, %v1007_v37 }
 0x43e   :  { %v4514_v17 = vpop.f32.mrf.mxu3 }
 0x43f   :  { %v1008_v26 = vmul.f32 %v4514_v17, %v4514_v17  ;;  %v985_v22 = vadd.f32 %v984_v24, %v4514_v17 }
 0x441   :  { %v1023_v21 = vadd.f32 %v1022_v27, %v1008_v26  ;;  %v4597_v27 = vld [vmem:[%s5861_s2 + $0xc] ss:$0 sm:$0xff] }
 0x446   :  { %v4529_v41 = vpop.f32.mrf.mxu3 }
 0x447   :  { %v986_v46 = vadd.f32 %v985_v22, %v4529_v41  ;;  %v1009_v38 = vmul.f32 %v4529_v41, %v4529_v41 }
 0x449   :  { %v987_v51 = vrot.slane %v986_v46, 4  ;;  %v1024_v54 = vadd.f32 %v1023_v21, %v1009_v38 }
 0x44b   :  { %v988_v55 = vadd.f32 %v987_v51, %v986_v46  ;;  %v1025_v56 = vrot.slane %v1024_v54, 4 }
 0x44d   :  { %v989_v31 = vrot.slane %v988_v55, 2  ;;  %v1026_v29 = vadd.f32 %v1025_v56, %v1024_v54 }
 0x44f   :  { %v990_v40 = vadd.f32 %v989_v31, %v988_v55  ;;  %v1027_v49 = vrot.slane %v1026_v29, 2 }
 0x451   :  { %v991_v39 = vrot.slane %v990_v40, 1  ;;  %v1028_v59 = vadd.f32 %v1027_v49, %v1026_v29 }
 0x453   :  { %v992_v15 = vadd.f32 %v991_v39, %v990_v40  ;;  %v1029_v34 = vrot.slane %v1028_v59, 1 }
 0x455   :  { %v4550_v0 = vmul.f32 %v992_v15, %v3992_v2  ;;  %v1030_v63 = vadd.f32 %v1029_v34, %v1028_v59 }
 0x457   :  { %v1031_v8 = vmul.f32 %v1030_v63, %v3992_v2  ;;  %v1032_v9 = vmul.f32 %v4550_v0, %v4550_v0  ;;  %v1056_v13 = vsub.f32 %v4468_v42, %v4550_v0  ;;  %v1057_v14 = vsub.f32 %v4473_v50, %v4550_v0  ;;  %v3583_v42 = vld [vmem:[%s5860_s1 + $0x100] sm:$0xff] }
 0x458   :  { %v1058_v52 = vsub.f32 %v4486_v45, %v4550_v0  ;;  %v1059_v5 = vsub.f32 %v4500_v3, %v4550_v0  ;;  %v1060_v33 = vsub.f32 %v4514_v17, %v4550_v0  ;;  %1194 = vmatpush.bf16.msrb.mxu0 %v3583_v42  ;;  %v970_v17 = vld [vmem:[%s5861_s2 + $0x3] sm:$0x1]  ;;  %v1061_v25 = vsub.f32 %v4529_v41, %v4550_v0 }
 0x459   :  { %v1033_v10 = vsub.f32 %v1031_v8, %v1032_v9  ;;  %v1046_v26 = vsub.f32 %v4439_v62, %v4550_v0  ;;  %v1047_v6 = vsub.f32 %v4441_v28, %v4550_v0  ;;  %v1054_v28 = vsub.f32 %v4461_v44, %v4550_v0 }
 0x45a   :  { %v1055_v51 = vsub.f32 %v4466_v53, %v4550_v0  ;;  %v1048_v54 = vsub.f32 %v4443_v23, %v4550_v0  ;;  %v1049_v56 = vsub.f32 %v4445_v47, %v4550_v0 }
 0x45b   :  { %v1034_v16 = vadd.f32 1e-05, %v1033_v10 }
 0x45d   :  { %3686 = vrsqrt.f32 %v1034_v16  ;;  %vm1041_vm11 = vweird.f32 %v1034_v16 }
 0x463   :  { %v3687_v50 = vpop.eup %3686 }
 0x464   :  { %v1036_v45 = vmul.f32 %v3687_v50, %v1034_v16  ;;  %vm1042_vm10 = vweird.f32 %v3687_v50 }
 0x465   :  { %vm1043_vm12 = vmor %vm1041_vm11, %vm1042_vm10 }
 0x466   :  { %v1037_v19 = vmul.f32 %v3687_v50, %v1036_v45 }
 0x468   :  { %v1038_v3 = vmul.f32 0.5, %v1037_v19  ;;  %v1050_v19 = vsub.f32 %v4447_v18, %v4550_v0  ;;  %v1052_v18 = vsub.f32 %v4454_v35, %v4550_v0  ;;  %v3604_v35 = vld [vmem:[%s5860_s1 + $0x1a8] sm:$0xff] }
 0x46a   :  { %v1039_v20 = vsub.f32 1.5, %v1038_v3  ;;  %v1051_v3 = vsub.f32 %v4449_v32, %v4550_v0  ;;  %v1053_v32 = vsub.f32 %v4456_v30, %v4550_v0  ;;  %v3603_v30 = vld [vmem:[%s5860_s1 + $0x1a0] sm:$0xff]  ;;  %v3602_v0 = vld [vmem:[%s5860_s1 + $0x198] sm:$0xff] }
 0x46c   :  { %v1040_v43 = vmul.f32 %v3687_v50, %v1039_v20  ;;  %v3606_v20 = vld [vmem:[%s5860_s1 + $0x1b8] sm:$0xff] }
 0x46d   :  { %1505 = vmatpush.bf16.msrb.mxu2 %v3606_v20 }
 0x46e   :  { %v1044_v57 = vsel %vm1043_vm12, %v3687_v50, %v1040_v43 }
 0x46f   :  { %v1045_v37 = vmul.f32 %v1044_v57, %v970_v17 }
 0x471   :  { %v4588_v24 = vperm.slane %v1045_v37, 0 }
 0x473   :  { %v1078_v22 = vmul.f32 %v4588_v24, %v1061_v25  ;;  %v1063_v21 = vmul.f32 %v4588_v24, %v1046_v26  ;;  %v1064_v46 = vmul.f32 %v4588_v24, %v1047_v6  ;;  %v1071_v58 = vmul.f32 %v4588_v24, %v1054_v28 }
 0x474   :  { %v1072_v31 = vmul.f32 %v4588_v24, %v1055_v51  ;;  %v1065_v29 = vmul.f32 %v4588_v24, %v1048_v54  ;;  %v1073_v40 = vmul.f32 %v4588_v24, %v1056_v13  ;;  %v1074_v44 = vmul.f32 %v4588_v24, %v1057_v14  ;;  %v4671_v51 = vld [vmem:[%s5861_s2 + $0x12] ss:$0 sm:$0xff]  ;;  %v4676_v54 = vld [vmem:[%s5861_s2 + $0x13] ss:$0 sm:$0xff] }
 0x475   :  { %v1080_v41 = vadd.f32 %v4597_v27, %v1063_v21  ;;  %v1081_v38 = vadd.f32 %v4597_v27, %v1064_v46  ;;  %v1066_v53 = vmul.f32 %v4588_v24, %v1049_v56  ;;  %v1088_v23 = vadd.f32 %v4597_v27, %v1071_v58 }
 0x476   :  { %v1089_v49 = vadd.f32 %v4597_v27, %v1072_v31  ;;  %v1090_v47 = vadd.f32 %v4597_v27, %v1073_v40  ;;  %v1091_v4 = vadd.f32 %v4597_v27, %v1074_v44  ;;  %v1075_v39 = vmul.f32 %v4588_v24, %v1058_v52 }
 0x477   :  { %v1096_v48 = vmax.f32 %v1080_v41, 0.0  ;;  %v1097_v62 = vmax.f32 %v1081_v38, 0.0  ;;  %v1076_v59 = vmul.f32 %v4588_v24, %v1059_v5  ;;  %v1104_v15 = vmax.f32 %v1088_v23, 0.0 }
 0x478   :  { %v1105_v34 = vmax.f32 %v1089_v49, 0.0  ;;  %v1077_v60 = vmul.f32 %v4588_v24, %v1060_v33  ;;  %v1095_v36 = vadd.f32 %v4597_v27, %v1078_v22  ;;  %v1106_v63 = vmax.f32 %v1090_v47, 0.0  ;;  %v3605_v22 = vld [vmem:[%s5860_s1 + $0x1b0] sm:$0xff] }
 0x479   :  { %v1112_v55 = vpack.c.bf16 %v1097_v62, %v1096_v48  ;;  %v1107_v1 = vmax.f32 %v1091_v4, 0.0  ;;  %v1092_v7 = vadd.f32 %v4597_v27, %v1075_v39  ;;  %v1093_v8 = vadd.f32 %v4597_v27, %v1076_v59  ;;  %1506 = vmatpush.bf16.msrb.mxu2 %v3605_v22 }
 0x47a   :  { %v1116_v9 = vpack.c.bf16 %v1105_v34, %v1104_v15  ;;  %v1094_v10 = vadd.f32 %v4597_v27, %v1077_v60  ;;  %v1111_v11 = vmax.f32 %v1095_v36, 0.0  ;;  %v1082_v16 = vadd.f32 %v4597_v27, %v1065_v29 }
 0x47b   :  { %1195 = vmatmul.bf16.vlgmr.msrb.gmra.mxu0 %v1112_v55  ;;  %1311 = vmatmul.bf16.vlgmr.msrb.gmra.mxu1 %v1112_v55  ;;  %v1117_v12 = vpack.c.bf16 %v1107_v1, %v1106_v63  ;;  %v1108_v13 = vmax.f32 %v1092_v7, 0.0  ;;  %v1109_v14 = vmax.f32 %v1093_v8, 0.0  ;;  %v1083_v52 = vadd.f32 %v4597_v27, %v1066_v53  ;;  %v3599_v55 = vld [vmem:[%s5860_s1 + $0x180] sm:$0xff] }
 0x47c   :  { %v1110_v5 = vmax.f32 %v1094_v10, 0.0  ;;  %v1098_v42 = vmax.f32 %v1082_v16, 0.0  ;;  %v1067_v17 = vmul.f32 %v4588_v24, %v1050_v19  ;;  %v1068_v43 = vmul.f32 %v4588_v24, %v1051_v3  ;;  %v2991_v16 = vld [vmem:[%s5859_s0 + $0x80] sm:$0xff] }
 0x47d   :  { %v1118_v33 = vpack.c.bf16 %v1109_v14, %v1108_v13  ;;  %v1099_v50 = vmax.f32 %v1083_v52, 0.0  ;;  %v1069_v21 = vmul.f32 %v4588_v24, %v1052_v18  ;;  %v1070_v46 = vmul.f32 %v4588_v24, %v1053_v32  ;;  %1507 = vmatpush.bf16.msrb.mxu2 %v3604_v35  ;;  %v3601_v24 = vld [vmem:[%s5860_s1 + $0x190] sm:$0xff] }
 0x47e   :  { %v1119_v61 = vpack.c.bf16 %v1111_v11, %v1110_v5  ;;  %v1084_v57 = vadd.f32 %v4597_v27, %v1067_v17  ;;  %v1085_v37 = vadd.f32 %v4597_v27, %v1068_v43 }
 0x47f   :  { %v1113_v45 = vpack.c.bf16 %v1099_v50, %v1098_v42  ;;  %v1086_v41 = vadd.f32 %v4597_v27, %v1069_v21  ;;  %v1087_v38 = vadd.f32 %v4597_v27, %v1070_v46  ;;  %v3600_v27 = vld [vmem:[%s5860_s1 + $0x188] sm:$0xff] }
 0x480   :  { %v1100_v25 = vmax.f32 %v1084_v57, 0.0  ;;  %v1101_v26 = vmax.f32 %v1085_v37, 0.0  ;;  %v2992_v50 = vld [vmem:[%s5859_s0 + $0x88] sm:$0xff] }
 0x481   :  { %v1102_v48 = vmax.f32 %v1086_v41, 0.0  ;;  %v1103_v62 = vmax.f32 %v1087_v38, 0.0  ;;  %1508 = vmatpush.bf16.msrb.mxu2 %v3603_v30 }
 0x482   :  { %v1114_v6 = vpack.c.bf16 %v1101_v26, %v1100_v25 }
 0x483   :  { %v1115_v28 = vpack.c.bf16 %v1103_v62, %v1102_v48 }
 0x485   :  { %1509 = vmatpush.bf16.msrb.mxu2 %v3602_v0 }
 0x489   :  { %1510 = vmatpush.bf16.msrb.mxu2 %v3601_v24 }
 0x48b   :  { %1200 = vmatmul.bf16.gmra.mxu0 %v1113_v45  ;;  %1316 = vmatmul.bf16.gmra.mxu1 %v1113_v45 }
 0x48d   :  { %1511 = vmatpush.bf16.msrb.mxu2 %v3600_v27 }
 0x491   :  { %1512 = vmatpush.bf16.msrb.mxu2 %v3599_v55  ;;  %v2993_v55 = vld [vmem:[%s5859_s0 + $0x90] sm:$0xff] }
 0x49b   :  { %1205 = vmatmul.bf16.gmra.mxu0 %v1114_v6  ;;  %1321 = vmatmul.bf16.gmra.mxu1 %v1114_v6 }
 0x4ab   :  { %1210 = vmatmul.bf16.gmra.mxu0 %v1115_v28  ;;  %1326 = vmatmul.bf16.gmra.mxu1 %v1115_v28 }
 0x4bb   :  { %1215 = vmatmul.bf16.gmra.mxu0 %v1116_v9  ;;  %1331 = vmatmul.bf16.gmra.mxu1 %v1116_v9 }
 0x4cb   :  { %1220 = vmatmul.bf16.gmra.mxu0 %v1117_v12  ;;  %1336 = vmatmul.bf16.gmra.mxu1 %v1117_v12 }
 0x4db   :  { %1225 = vmatmul.bf16.gmra.mxu0 %v1118_v33  ;;  %1341 = vmatmul.bf16.gmra.mxu1 %v1118_v33 }
 0x4eb   :  { %1230 = vmatmul.bf16.gmra.mxu0 %v1119_v61  ;;  %1346 = vmatmul.bf16.gmra.mxu1 %v1119_v61 }
 0x4f8   :  { %v1196_v56 = vpop.f32.mrf.mxu0  ;;  %v1312_v58 = vpop.f32.mrf.mxu1 }
 0x4f9   :  { %v1197_v31 = vadd.f32 %v4671_v51, %v1196_v56  ;;  %v1313_v29 = vadd.f32 %v4676_v54, %v1312_v58 }
 0x4fb   :  { %3519 = vst [vmem:[%s5862_s3 + $0x80] sm:$0xff] %v1197_v31  ;;  %v2818_v40 = vmul.f32 %v1197_v31, %v1197_v31  ;;  %v1352_v44 = vmul.f32 0.5, %v1313_v29  ;;  %v2802_v53 = vadd.f32 1.0, %v1313_v29  ;;  %v2850_v23 = vmul.f32 1.442695, %v1313_v29 }
 0x4fc   :  { %3535 = vst [vmem:[%s5862_s3 + $0x100] sm:$0xff] %v1313_v29 }
 0x4fd   :  { %v2834_v49 = vsub.f32 %v2802_v53, %v2818_v40  ;;  %3688 = vpow2.f32 %v2850_v23  ;;  %v1368_v47 = vmul.f32 1.442695, %v1352_v44  ;;  %v2994_v44 = vld [vmem:[%s5859_s0 + $0x98] sm:$0xff] }
 0x4ff   :  { %3690 = vpow2.f32 %v1368_v47 }
 0x500   :  { %v1198_v4 = vpop.f32.mrf.mxu0  ;;  %v1314_v39 = vpop.f32.mrf.mxu1 }
 0x501   :  { %v1199_v59 = vadd.f32 %v4671_v51, %v1198_v4  ;;  %v1315_v15 = vadd.f32 %v4676_v54, %v1314_v39 }
 0x503   :  { %v3689_v34 = vpop.eup %3688  ;;  %3520 = vst [vmem:[%s5862_s3 + $0x88] sm:$0xff] %v1199_v59  ;;  %v2819_v60 = vmul.f32 %v1199_v59, %v1199_v59  ;;  %v1353_v36 = vmul.f32 0.5, %v1315_v15  ;;  %v2803_v63 = vadd.f32 1.0, %v1315_v15  ;;  %v2852_v1 = vmul.f32 1.442695, %v1315_v15 }
 0x504   :  { %v4694_v7 = vsub.f32 %v2834_v49, %v3689_v34  ;;  %3536 = vst [vmem:[%s5862_s3 + $0x108] sm:$0xff] %v1315_v15 }
 0x505   :  { %v1370_v8 = vmul.f32 1.442695, %v1353_v36  ;;  %v2835_v9 = vsub.f32 %v2803_v63, %v2819_v60  ;;  %3692 = vpow2.f32 %v2852_v1  ;;  %v3691_v10 = vpop.eup %3690 }
 0x506   :  { %v1400_v19 = vmul.f32 %v3691_v10, %v2991_v16 }
 0x507   :  { %3694 = vpow2.f32 %v1370_v8 }
 0x508   :  { %v1201_v11 = vpop.f32.mrf.mxu0  ;;  %v1317_v12 = vpop.f32.mrf.mxu1  ;;  %v1416_v25 = vadd.f32 %v1400_v19, %v1197_v31 }
 0x509   :  { %v1202_v13 = vadd.f32 %v4671_v51, %v1201_v11  ;;  %v1318_v14 = vadd.f32 %v4676_v54, %v1317_v12 }
 0x50b   :  { %v3693_v52 = vpop.eup %3692  ;;  %3521 = vst [vmem:[%s5862_s3 + $0x90] sm:$0xff] %v1202_v13  ;;  %v2820_v5 = vmul.f32 %v1202_v13, %v1202_v13  ;;  %v1354_v33 = vmul.f32 0.5, %v1318_v14  ;;  %v2804_v61 = vadd.f32 1.0, %v1318_v14  ;;  %v2854_v42 = vmul.f32 1.442695, %v1318_v14 }
 0x50c   :  { %v4710_v45 = vsub.f32 %v2835_v9, %v3693_v52  ;;  %3537 = vst [vmem:[%s5862_s3 + $0x110] sm:$0xff] %v1318_v14 }
 0x50d   :  { %v3695_v3 = vpop.eup %3694  ;;  %v2836_v20 = vsub.f32 %v2804_v61, %v2820_v5  ;;  %3696 = vpow2.f32 %v2854_v42  ;;  %v1372_v17 = vmul.f32 1.442695, %v1354_v33 }
 0x50e   :  { %v1401_v43 = vmul.f32 %v3695_v3, %v2992_v50  ;;  %v2995_v50 = vld [vmem:[%s5859_s0 + $0xa0] sm:$0xff] }
 0x50f   :  { %3698 = vpow2.f32 %v1372_v17 }
 0x510   :  { %v1203_v57 = vpop.f32.mrf.mxu0  ;;  %v1319_v37 = vpop.f32.mrf.mxu1  ;;  %v1417_v26 = vadd.f32 %v1401_v43, %v1199_v59 }
 0x511   :  { %v1204_v6 = vadd.f32 %v4671_v51, %v1203_v57  ;;  %v1320_v18 = vadd.f32 %v4676_v54, %v1319_v37  ;;  %v2996_v57 = vld [vmem:[%s5859_s0 + $0xa8] sm:$0xff] }
 0x512   :  { %v1432_v32 = vpack.c.bf16 %v1417_v26, %v1416_v25 }
 0x513   :  { %v3697_v22 = vpop.eup %3696  ;;  %3522 = vst [vmem:[%s5862_s3 + $0x98] sm:$0xff] %v1204_v6  ;;  %v2821_v21 = vmul.f32 %v1204_v6, %v1204_v6  ;;  %v1355_v46 = vmul.f32 0.5, %v1320_v18  ;;  %v2805_v41 = vadd.f32 1.0, %v1320_v18  ;;  %v2856_v38 = vmul.f32 1.442695, %v1320_v18 }
 0x514   :  { %v4720_v48 = vsub.f32 %v2836_v20, %v3697_v22  ;;  %3538 = vst [vmem:[%s5862_s3 + $0x118] sm:$0xff] %v1320_v18  ;;  %1513 = vmatmul.bf16.vlgmr.msrb.gmra.mxu2 %v1432_v32 }
 0x515   :  { %v1374_v62 = vmul.f32 1.442695, %v1355_v46  ;;  %v2837_v28 = vsub.f32 %v2805_v41, %v2821_v21  ;;  %3700 = vpow2.f32 %v2856_v38  ;;  %v3699_v35 = vpop.eup %3698 }
 0x516   :  { %v1402_v23 = vmul.f32 %v3699_v35, %v2993_v55 }
 0x517   :  { %3702 = vpow2.f32 %v1374_v62 }
 0x518   :  { %v1206_v30 = vpop.f32.mrf.mxu0  ;;  %v1322_v0 = vpop.f32.mrf.mxu1  ;;  %v1418_v34 = vadd.f32 %v1402_v23, %v1202_v13 }
 0x519   :  { %v1207_v24 = vadd.f32 %v4671_v51, %v1206_v30  ;;  %v1323_v27 = vadd.f32 %v4676_v54, %v1322_v0 }
 0x51b   :  { %v3701_v56 = vpop.eup %3700  ;;  %3523 = vst [vmem:[%s5862_s3 + $0xa0] sm:$0xff] %v1207_v24  ;;  %v2822_v58 = vmul.f32 %v1207_v24, %v1207_v24  ;;  %v1356_v31 = vmul.f32 0.5, %v1323_v27  ;;  %v2806_v29 = vadd.f32 1.0, %v1323_v27  ;;  %v2858_v40 = vmul.f32 1.442695, %v1323_v27 }
 0x51c   :  { %v4736_v53 = vsub.f32 %v2837_v28, %v3701_v56  ;;  %3539 = vst [vmem:[%s5862_s3 + $0x120] sm:$0xff] %v1323_v27 }
 0x51d   :  { %v3703_v49 = vpop.eup %3702  ;;  %v2838_v47 = vsub.f32 %v2806_v29, %v2822_v58  ;;  %3704 = vpow2.f32 %v2858_v40  ;;  %v1376_v4 = vmul.f32 1.442695, %v1356_v31 }
 0x51e   :  { %v1403_v39 = vmul.f32 %v3703_v49, %v2994_v44  ;;  %v2997_v49 = vld [vmem:[%s5859_s0 + $0xb0] sm:$0xff] }
 0x51f   :  { %3706 = vpow2.f32 %v1376_v4 }
 0x520   :  { %v1208_v59 = vpop.f32.mrf.mxu0  ;;  %v1324_v15 = vpop.f32.mrf.mxu1  ;;  %v1419_v60 = vadd.f32 %v1403_v39, %v1204_v6 }
 0x521   :  { %v1209_v36 = vadd.f32 %v4671_v51, %v1208_v59  ;;  %v1325_v63 = vadd.f32 %v4676_v54, %v1324_v15 }
 0x522   :  { %v1433_v1 = vpack.c.bf16 %v1419_v60, %v1418_v34  ;;  %v2998_v34 = vld [vmem:[%s5859_s0 + $0xb8] sm:$0xff] }
 0x523   :  { %v3705_v8 = vpop.eup %3704  ;;  %3524 = vst [vmem:[%s5862_s3 + $0xa8] sm:$0xff] %v1209_v36  ;;  %v2823_v9 = vmul.f32 %v1209_v36, %v1209_v36  ;;  %v1357_v10 = vmul.f32 0.5, %v1325_v63  ;;  %v2807_v11 = vadd.f32 1.0, %v1325_v63  ;;  %v2860_v12 = vmul.f32 1.442695, %v1325_v63 }
 0x524   :  { %v4746_v14 = vsub.f32 %v2838_v47, %v3705_v8  ;;  %3540 = vst [vmem:[%s5862_s3 + $0x128] sm:$0xff] %v1325_v63  ;;  %1518 = vmatmul.bf16.gmra.mxu2 %v1433_v1 }
 0x525   :  { %v1378_v13 = vmul.f32 1.442695, %v1357_v10  ;;  %v2839_v16 = vsub.f32 %v2807_v11, %v2823_v9  ;;  %3708 = vpow2.f32 %v2860_v12  ;;  %v3707_v52 = vpop.eup %3706 }
 0x526   :  { %v1404_v25 = vmul.f32 %v3707_v52, %v2995_v50 }
 0x527   :  { %3710 = vpow2.f32 %v1378_v13 }
 0x528   :  { %v1211_v5 = vpop.f32.mrf.mxu0  ;;  %v1327_v33 = vpop.f32.mrf.mxu1  ;;  %v1420_v46 = vadd.f32 %v1404_v25, %v1207_v24 }
 0x529   :  { %v1212_v61 = vadd.f32 %v4671_v51, %v1211_v5  ;;  %v1328_v42 = vadd.f32 %v4676_v54, %v1327_v33 }
 0x52b   :  { %v3709_v19 = vpop.eup %3708  ;;  %3525 = vst [vmem:[%s5862_s3 + $0xb0] sm:$0xff] %v1212_v61  ;;  %v2824_v3 = vmul.f32 %v1212_v61, %v1212_v61  ;;  %v1358_v20 = vmul.f32 0.5, %v1328_v42  ;;  %v2808_v17 = vadd.f32 1.0, %v1328_v42  ;;  %v2862_v43 = vmul.f32 1.442695, %v1328_v42 }
 0x52c   :  { %v4762_v37 = vsub.f32 %v2839_v16, %v3709_v19  ;;  %3541 = vst [vmem:[%s5862_s3 + $0x130] sm:$0xff] %v1328_v42 }
 0x52d   :  { %v3711_v26 = vpop.eup %3710  ;;  %v2840_v6 = vsub.f32 %v2808_v17, %v2824_v3  ;;  %3712 = vpow2.f32 %v2862_v43  ;;  %v1380_v18 = vmul.f32 1.442695, %v1358_v20 }
 0x52e   :  { %v1405_v32 = vmul.f32 %v3711_v26, %v2996_v57 }
 0x52f   :  { %3714 = vpow2.f32 %v1380_v18  ;;  %v2999_v18 = vld [vmem:[%s5859_s0 + $0xc0] sm:$0xff] }
 0x530   :  { %v1213_v22 = vpop.f32.mrf.mxu0  ;;  %v1329_v21 = vpop.f32.mrf.mxu1  ;;  %v1421_v41 = vadd.f32 %v1405_v32, %v1209_v36 }
 0x531   :  { %v1214_v38 = vadd.f32 %v4671_v51, %v1213_v22  ;;  %v1330_v62 = vadd.f32 %v4676_v54, %v1329_v21 }
 0x532   :  { %v1434_v28 = vpack.c.bf16 %v1421_v41, %v1420_v46 }
 0x533   :  { %v3713_v35 = vpop.eup %3712  ;;  %3526 = vst [vmem:[%s5862_s3 + $0xb8] sm:$0xff] %v1214_v38  ;;  %v2825_v30 = vmul.f32 %v1214_v38, %v1214_v38  ;;  %v1359_v0 = vmul.f32 0.5, %v1330_v62  ;;  %v2809_v27 = vadd.f32 1.0, %v1330_v62  ;;  %v2864_v55 = vmul.f32 1.442695, %v1330_v62 }
 0x534   :  { %v4772_v56 = vsub.f32 %v2840_v6, %v3713_v35  ;;  %3542 = vst [vmem:[%s5862_s3 + $0x138] sm:$0xff] %v1330_v62  ;;  %1523 = vmatmul.bf16.gmra.mxu2 %v1434_v28 }
 0x535   :  { %v1382_v24 = vmul.f32 1.442695, %v1359_v0  ;;  %v2841_v58 = vsub.f32 %v2809_v27, %v2825_v30  ;;  %3716 = vpow2.f32 %v2864_v55  ;;  %v3715_v31 = vpop.eup %3714 }
 0x536   :  { %v1406_v36 = vmul.f32 %v3715_v31, %v2997_v49 }
 0x537   :  { %3718 = vpow2.f32 %v1382_v24 }
 0x538   :  { %v1216_v29 = vpop.f32.mrf.mxu0  ;;  %v1332_v40 = vpop.f32.mrf.mxu1  ;;  %v1422_v12 = vadd.f32 %v1406_v36, %v1212_v61 }
 0x539   :  { %v1217_v44 = vadd.f32 %v4671_v51, %v1216_v29  ;;  %v1333_v23 = vadd.f32 %v4676_v54, %v1332_v40 }
 0x53b   :  { %v3717_v47 = vpop.eup %3716  ;;  %3527 = vst [vmem:[%s5862_s3 + $0xc0] sm:$0xff] %v1217_v44  ;;  %v2826_v4 = vmul.f32 %v1217_v44, %v1217_v44  ;;  %v1360_v39 = vmul.f32 0.5, %v1333_v23  ;;  %v2810_v59 = vadd.f32 1.0, %v1333_v23  ;;  %v2866_v15 = vmul.f32 1.442695, %v1333_v23 }
 0x53c   :  { %v4788_v60 = vsub.f32 %v2841_v58, %v3717_v47  ;;  %3543 = vst [vmem:[%s5862_s3 + $0x140] sm:$0xff] %v1333_v23 }
 0x53d   :  { %v3719_v63 = vpop.eup %3718  ;;  %v2842_v1 = vsub.f32 %v2810_v59, %v2826_v4  ;;  %3720 = vpow2.f32 %v2866_v15  ;;  %v1384_v8 = vmul.f32 1.442695, %v1360_v39 }
 0x53e   :  { %v1407_v9 = vmul.f32 %v3719_v63, %v2998_v34 }
 0x53f   :  { %3722 = vpow2.f32 %v1384_v8 }
 0x540   :  { %v1218_v10 = vpop.f32.mrf.mxu0  ;;  %v1334_v11 = vpop.f32.mrf.mxu1  ;;  %v1423_v13 = vadd.f32 %v1407_v9, %v1214_v38  ;;  %v3000_v38 = vld [vmem:[%s5859_s0 + $0xc8] sm:$0xff] }
 0x541   :  { %v1219_v16 = vadd.f32 %v4671_v51, %v1218_v10  ;;  %v1335_v52 = vadd.f32 %v4676_v54, %v1334_v11  ;;  %v3001_v10 = vld [vmem:[%s5859_s0 + $0xd0] sm:$0xff] }
 0x542   :  { %v1435_v5 = vpack.c.bf16 %v1423_v13, %v1422_v12 }
 0x543   :  { %v3721_v33 = vpop.eup %3720  ;;  %3528 = vst [vmem:[%s5862_s3 + $0xc8] sm:$0xff] %v1219_v16  ;;  %v2827_v42 = vmul.f32 %v1219_v16, %v1219_v16  ;;  %v1361_v50 = vmul.f32 0.5, %v1335_v52  ;;  %v2811_v19 = vadd.f32 1.0, %v1335_v52  ;;  %v2868_v3 = vmul.f32 1.442695, %v1335_v52 }
 0x544   :  { %v4798_v20 = vsub.f32 %v2842_v1, %v3721_v33  ;;  %3544 = vst [vmem:[%s5862_s3 + $0x148] sm:$0xff] %v1335_v52  ;;  %1528 = vmatmul.bf16.gmra.mxu2 %v1435_v5  ;;  %v3002_v5 = vld [vmem:[%s5859_s0 + $0xd8] sm:$0xff] }
 0x545   :  { %v1386_v61 = vmul.f32 1.442695, %v1361_v50  ;;  %v2843_v17 = vsub.f32 %v2811_v19, %v2827_v42  ;;  %3724 = vpow2.f32 %v2868_v3  ;;  %v3723_v43 = vpop.eup %3722 }
 0x546   :  { %v1408_v28 = vmul.f32 %v3723_v43, %v2999_v18 }
 0x547   :  { %3726 = vpow2.f32 %v1386_v61 }
 0x548   :  { %v1221_v57 = vpop.f32.mrf.mxu0  ;;  %v1337_v25 = vpop.f32.mrf.mxu1  ;;  %v1424_v58 = vadd.f32 %v1408_v28, %v1217_v44 }
 0x549   :  { %v1222_v26 = vadd.f32 %v4671_v51, %v1221_v57  ;;  %v1338_v6 = vadd.f32 %v4676_v54, %v1337_v25 }
 0x54b   :  { %v3725_v32 = vpop.eup %3724  ;;  %3529 = vst [vmem:[%s5862_s3 + $0xd0] sm:$0xff] %v1222_v26  ;;  %v2828_v22 = vmul.f32 %v1222_v26, %v1222_v26  ;;  %v1362_v21 = vmul.f32 0.5, %v1338_v6  ;;  %v2812_v46 = vadd.f32 1.0, %v1338_v6  ;;  %v2870_v41 = vmul.f32 1.442695, %v1338_v6 }
 0x54c   :  { %v4814_v62 = vsub.f32 %v2843_v17, %v3725_v32  ;;  %3545 = vst [vmem:[%s5862_s3 + $0x150] sm:$0xff] %v1338_v6 }
 0x54d   :  { %v3727_v35 = vpop.eup %3726  ;;  %v2844_v30 = vsub.f32 %v2812_v46, %v2828_v22  ;;  %3728 = vpow2.f32 %v2870_v41  ;;  %v1388_v0 = vmul.f32 1.442695, %v1362_v21 }
 0x54e   :  { %v1409_v27 = vmul.f32 %v3727_v35, %v3000_v38 }
 0x54f   :  { %3730 = vpow2.f32 %v1388_v0 }
 0x550   :  { %v1223_v55 = vpop.f32.mrf.mxu0  ;;  %v1339_v24 = vpop.f32.mrf.mxu1  ;;  %v1425_v31 = vadd.f32 %v1409_v27, %v1219_v16 }
 0x551   :  { %v1224_v29 = vadd.f32 %v4671_v51, %v1223_v55  ;;  %v1340_v40 = vadd.f32 %v4676_v54, %v1339_v24 }
 0x552   :  { %v1436_v23 = vpack.c.bf16 %v1425_v31, %v1424_v58  ;;  %v3003_v58 = vld [vmem:[%s5859_s0 + $0xe0] sm:$0xff] }
 0x553   :  { %v3729_v49 = vpop.eup %3728  ;;  %3530 = vst [vmem:[%s5862_s3 + $0xd8] sm:$0xff] %v1224_v29  ;;  %v2829_v47 = vmul.f32 %v1224_v29, %v1224_v29  ;;  %v1363_v4 = vmul.f32 0.5, %v1340_v40  ;;  %v2813_v39 = vadd.f32 1.0, %v1340_v40  ;;  %v2872_v59 = vmul.f32 1.442695, %v1340_v40 }
 0x554   :  { %v4824_v15 = vsub.f32 %v2844_v30, %v3729_v49  ;;  %3546 = vst [vmem:[%s5862_s3 + $0x158] sm:$0xff] %v1340_v40  ;;  %1533 = vmatmul.bf16.gmra.mxu2 %v1436_v23 }
 0x555   :  { %v1390_v44 = vmul.f32 1.442695, %v1363_v4  ;;  %v2845_v34 = vsub.f32 %v2813_v39, %v2829_v47  ;;  %3732 = vpow2.f32 %v2872_v59  ;;  %v3731_v36 = vpop.eup %3730  ;;  %v3004_v47 = vld [vmem:[%s5859_s0 + $0xe8] sm:$0xff] }
 0x556   :  { %v1410_v33 = vmul.f32 %v3731_v36, %v3001_v10 }
 0x557   :  { %3734 = vpow2.f32 %v1390_v44 }
 0x558   :  { %v1226_v63 = vpop.f32.mrf.mxu0  ;;  %v1342_v1 = vpop.f32.mrf.mxu1  ;;  %v1426_v57 = vadd.f32 %v1410_v33, %v1222_v26 }
 0x559   :  { %v1227_v8 = vadd.f32 %v4671_v51, %v1226_v63  ;;  %v1343_v9 = vadd.f32 %v4676_v54, %v1342_v1 }
 0x55b   :  { %v3733_v11 = vpop.eup %3732  ;;  %3531 = vst [vmem:[%s5862_s3 + $0xe0] sm:$0xff] %v1227_v8  ;;  %v2830_v12 = vmul.f32 %v1227_v8, %v1227_v8  ;;  %v1364_v13 = vmul.f32 0.5, %v1343_v9  ;;  %v2814_v16 = vadd.f32 1.0, %v1343_v9  ;;  %v2874_v52 = vmul.f32 1.442695, %v1343_v9 }
 0x55c   :  { %3547 = vst [vmem:[%s5862_s3 + $0x160] sm:$0xff] %v1343_v9  ;;  %v4843_v42 = vsub.f32 %v2845_v34, %v3733_v11 }
 0x55d   :  { %v3735_v50 = vpop.eup %3734  ;;  %v2846_v19 = vsub.f32 %v2814_v16, %v2830_v12  ;;  %3736 = vpow2.f32 %v2874_v52  ;;  %v1392_v3 = vmul.f32 1.442695, %v1364_v13 }
 0x55e   :  { %v1411_v61 = vmul.f32 %v3735_v50, %v3002_v5 }
 0x55f   :  { %3738 = vpow2.f32 %v1392_v3  ;;  %v3005_v3 = vld [vmem:[%s5859_s0 + $0xf0] sm:$0xff] }
 0x560   :  { %v1228_v17 = vpop.f32.mrf.mxu0  ;;  %v1344_v43 = vpop.f32.mrf.mxu1  ;;  %v1427_v25 = vadd.f32 %v1411_v61, %v1224_v29 }
 0x561   :  { %v1229_v6 = vadd.f32 %v4671_v51, %v1228_v17  ;;  %v1345_v18 = vadd.f32 %v4676_v54, %v1344_v43  ;;  %v3006_v17 = vld [vmem:[%s5859_s0 + $0xf8] sm:$0xff] }
 0x562   :  { %v1437_v32 = vpack.c.bf16 %v1427_v25, %v1426_v57 }
 0x563   :  { %v3737_v22 = vpop.eup %3736  ;;  %3532 = vst [vmem:[%s5862_s3 + $0xe8] sm:$0xff] %v1229_v6  ;;  %v2831_v21 = vmul.f32 %v1229_v6, %v1229_v6  ;;  %v1365_v46 = vmul.f32 0.5, %v1345_v18  ;;  %v2815_v41 = vadd.f32 1.0, %v1345_v18  ;;  %v2876_v38 = vmul.f32 1.442695, %v1345_v18 }
 0x564   :  { %3548 = vst [vmem:[%s5862_s3 + $0x168] sm:$0xff] %v1345_v18  ;;  %1538 = vmatmul.bf16.gmra.mxu2 %v1437_v32  ;;  %v4853_v26 = vsub.f32 %v2846_v19, %v3737_v22 }
 0x565   :  { %v1394_v28 = vmul.f32 1.442695, %v1365_v46  ;;  %3740 = vpow2.f32 %v2876_v38  ;;  %v2847_v35 = vsub.f32 %v2815_v41, %v2831_v21  ;;  %v3739_v30 = vpop.eup %3738  ;;  %v3614_v41 = vld [vmem:[%s5860_s1 + $0x1f8] sm:$0xff] }
 0x566   :  { %v1412_v4 = vmul.f32 %v3739_v30, %v3003_v58  ;;  %1769 = vmatpush.bf16.msra.mxu3 %v3614_v41  ;;  %v3611_v58 = vld [vmem:[%s5860_s1 + $0x1e0] sm:$0xff] }
 0x567   :  { %3742 = vpow2.f32 %v1394_v28 }
 0x568   :  { %v1231_v0 = vpop.f32.mrf.mxu0  ;;  %v1347_v27 = vpop.f32.mrf.mxu1  ;;  %v1428_v9 = vadd.f32 %v1412_v4, %v1227_v8 }
 0x569   :  { %v1232_v55 = vadd.f32 %v4671_v51, %v1231_v0  ;;  %v1348_v24 = vadd.f32 %v4676_v54, %v1347_v27  ;;  %v3612_v27 = vld [vmem:[%s5860_s1 + $0x1e8] sm:$0xff] }
 0x56b   :  { %v3741_v31 = vpop.eup %3740  ;;  %3533 = vst [vmem:[%s5862_s3 + $0xf0] sm:$0xff] %v1232_v55  ;;  %v2832_v29 = vmul.f32 %v1232_v55, %v1232_v55  ;;  %v1366_v40 = vmul.f32 0.5, %v1348_v24  ;;  %v2816_v23 = vadd.f32 1.0, %v1348_v24  ;;  %v2878_v49 = vmul.f32 1.442695, %v1348_v24 }
 0x56c   :  { %3549 = vst [vmem:[%s5862_s3 + $0x170] sm:$0xff] %v1348_v24  ;;  %v4869_v39 = vsub.f32 %v2847_v35, %v3741_v31  ;;  %v3613_v35 = vld [vmem:[%s5860_s1 + $0x1f0] sm:$0xff] }
 0x56d   :  { %v3743_v59 = vpop.eup %3742  ;;  %3744 = vpow2.f32 %v2878_v49  ;;  %v2848_v44 = vsub.f32 %v2816_v23, %v2832_v29  ;;  %v1396_v34 = vmul.f32 1.442695, %v1366_v40  ;;  %1770 = vmatpush.bf16.msra.mxu3 %v3613_v35  ;;  %v3610_v40 = vld [vmem:[%s5860_s1 + $0x1d8] sm:$0xff] }
 0x56e   :  { %v1413_v36 = vmul.f32 %v3743_v59, %v3004_v47 }
 0x56f   :  { %3746 = vpow2.f32 %v1396_v34 }
 0x570   :  { %v1233_v63 = vpop.f32.mrf.mxu0  ;;  %v1349_v1 = vpop.f32.mrf.mxu1  ;;  %v1429_v10 = vadd.f32 %v1413_v36, %v1229_v6 }
 0x571   :  { %v1234_v11 = vadd.f32 %v4671_v51, %v1233_v63  ;;  %v1350_v12 = vadd.f32 %v4676_v54, %v1349_v1  ;;  %1771 = vmatpush.bf16.msra.mxu3 %v3612_v27 }
 0x572   :  { %v1438_v13 = vpack.c.bf16 %v1429_v10, %v1428_v9 }
 0x573   :  { %v3745_v16 = vpop.eup %3744  ;;  %3534 = vst [vmem:[%s5862_s3 + $0xf8] sm:$0xff] %v1234_v11  ;;  %v2833_v52 = vmul.f32 %v1234_v11, %v1234_v11  ;;  %v1367_v5 = vmul.f32 0.5, %v1350_v12  ;;  %v2880_v33 = vmul.f32 1.442695, %v1350_v12  ;;  %v2817_v50 = vadd.f32 1.0, %v1350_v12 }
 0x574   :  { %3550 = vst [vmem:[%s5862_s3 + $0x178] sm:$0xff] %v1350_v12  ;;  %1543 = vmatmul.bf16.gmra.mxu2 %v1438_v13  ;;  %v4879_v8 = vsub.f32 %v2848_v44, %v3745_v16 }
 0x575   :  { %v1398_v51 = vmul.f32 1.442695, %v1367_v5  ;;  %3748 = vpow2.f32 %v2880_v33  ;;  %v2849_v54 = vsub.f32 %v2817_v50, %v2833_v52  ;;  %v3747_v19 = vpop.eup %3746  ;;  %1772 = vmatpush.bf16.msra.mxu3 %v3611_v58 }
 0x576   :  { %v1414_v43 = vmul.f32 %v3747_v19, %v3005_v3 }
 0x577   :  { %3750 = vpow2.f32 %v1398_v51 }
 0x578   :  { %v1430_v18 = vadd.f32 %v1414_v43, %v1232_v55 }
 0x579   :  { %1773 = vmatpush.bf16.msra.mxu3 %v3610_v40 }
 0x57b   :  { %v3749_v61 = vpop.eup %3748 }
 0x57c   :  { %v4887_v57 = vsub.f32 %v2849_v54, %v3749_v61 }
 0x57d   :  { %v3751_v25 = vpop.eup %3750 }
 0x57e   :  { %v1415_v6 = vmul.f32 %v3751_v25, %v3006_v17 }
 0x580   :  { %v1431_v32 = vadd.f32 %v1415_v6, %v1234_v11 }
 0x582   :  { %v1439_v22 = vpack.c.bf16 %v1431_v32, %v1430_v18 }
 0x584   :  { %1548 = vmatmul.bf16.gmra.mxu2 %v1439_v22 }
 0x597   :  { %v4889_v21 = vpop.f32.mrf.mxu2 }
 0x598   :  { %v1578_v4 = vmul.f32 %v4889_v21, %v4889_v21 }
 0x59f   :  { %v4891_v46 = vpop.f32.mrf.mxu2 }
 0x5a0   :  { %v1579_v47 = vmul.f32 %v4891_v46, %v4891_v46  ;;  %v1556_v59 = vadd.f32 %v4891_v46, %v4889_v21 }
 0x5a2   :  { %v1594_v36 = vadd.f32 %v1579_v47, %v1578_v4 }
 0x5a7   :  { %v4896_v38 = vpop.f32.mrf.mxu2 }
 0x5a8   :  { %v1580_v44 = vmul.f32 %v4896_v38, %v4896_v38  ;;  %v1557_v34 = vadd.f32 %v1556_v59, %v4896_v38 }
 0x5aa   :  { %v1595_v9 = vadd.f32 %v1594_v36, %v1580_v44 }
 0x5af   :  { %v4898_v28 = vpop.f32.mrf.mxu2 }
 0x5b0   :  { %v1581_v63 = vmul.f32 %v4898_v28, %v4898_v28  ;;  %v1558_v10 = vadd.f32 %v1557_v34, %v4898_v28 }
 0x5b2   :  { %v1596_v13 = vadd.f32 %v1595_v9, %v1581_v63 }
 0x5b7   :  { %v4903_v30 = vpop.f32.mrf.mxu2 }
 0x5b8   :  { %v1582_v11 = vmul.f32 %v4903_v30, %v4903_v30  ;;  %v1559_v12 = vadd.f32 %v1558_v10, %v4903_v30 }
 0x5ba   :  { %v1597_v52 = vadd.f32 %v1596_v13, %v1582_v11 }
 0x5bf   :  { %v4905_v0 = vpop.f32.mrf.mxu2 }
 0x5c0   :  { %v1583_v16 = vmul.f32 %v4905_v0, %v4905_v0  ;;  %v1560_v5 = vadd.f32 %v1559_v12, %v4905_v0 }
 0x5c2   :  { %v1598_v51 = vadd.f32 %v1597_v52, %v1583_v16 }
 0x5c7   :  { %v4910_v55 = vpop.f32.mrf.mxu2 }
 0x5c8   :  { %v1584_v33 = vmul.f32 %v4910_v55, %v4910_v55  ;;  %v1561_v50 = vadd.f32 %v1560_v5, %v4910_v55 }
 0x5ca   :  { %v1599_v3 = vadd.f32 %v1598_v51, %v1584_v33 }
 0x5cf   :  { %v4912_v24 = vpop.f32.mrf.mxu2 }
 0x5d0   :  { %v1585_v54 = vmul.f32 %v4912_v24, %v4912_v24  ;;  %v1562_v61 = vadd.f32 %v1561_v50, %v4912_v24 }
 0x5d2   :  { %v1600_v25 = vadd.f32 %v1599_v3, %v1585_v54 }
 0x5d7   :  { %v4917_v31 = vpop.f32.mrf.mxu2 }
 0x5d8   :  { %v1586_v17 = vmul.f32 %v4917_v31, %v4917_v31  ;;  %v1563_v43 = vadd.f32 %v1562_v61, %v4917_v31 }
 0x5da   :  { %v1601_v18 = vadd.f32 %v1600_v25, %v1586_v17 }
 0x5df   :  { %v4919_v29 = vpop.f32.mrf.mxu2 }
 0x5e0   :  { %v1587_v6 = vmul.f32 %v4919_v29, %v4919_v29  ;;  %v1564_v32 = vadd.f32 %v1563_v43, %v4919_v29 }
 0x5e2   :  { %v1602_v41 = vadd.f32 %v1601_v18, %v1587_v6 }
 0x5e7   :  { %v4924_v23 = vpop.f32.mrf.mxu2 }
 0x5e8   :  { %v1588_v22 = vmul.f32 %v4924_v23, %v4924_v23  ;;  %v1565_v35 = vadd.f32 %v1564_v32, %v4924_v23  ;;  %v3609_v32 = vld [vmem:[%s5860_s1 + $0x1d0] sm:$0xff] }
 0x5e9   :  { %1774 = vmatpush.bf16.msra.mxu3 %v3609_v32 }
 0x5ea   :  { %v1603_v40 = vadd.f32 %v1602_v41, %v1588_v22 }
 0x5ef   :  { %v4926_v49 = vpop.f32.mrf.mxu2 }
 0x5f0   :  { %v1589_v27 = vmul.f32 %v4926_v49, %v4926_v49  ;;  %v1566_v47 = vadd.f32 %v1565_v35, %v4926_v49  ;;  %v3608_v35 = vld [vmem:[%s5860_s1 + $0x1c8] sm:$0xff] }
 0x5f1   :  { %1775 = vmatpush.bf16.msra.mxu3 %v3608_v35 }
 0x5f2   :  { %v1604_v59 = vadd.f32 %v1603_v40, %v1589_v27 }
 0x5f7   :  { %v4939_v1 = vpop.f32.mrf.mxu2 }
 0x5f8   :  { %v1590_v4 = vmul.f32 %v4939_v1, %v4939_v1  ;;  %v1567_v44 = vadd.f32 %v1566_v47, %v4939_v1 }
 0x5fa   :  { %v1605_v36 = vadd.f32 %v1604_v59, %v1590_v4  ;;  %v3607_v4 = vld [vmem:[%s5860_s1 + $0x1c0] sm:$0xff] }
 0x5fb   :  { %1776 = vmatpush.bf16.msra.mxu3 %v3607_v4 }
 0x5ff   :  { %v4953_v19 = vpop.f32.mrf.mxu2 }
 0x600   :  { %v1591_v34 = vmul.f32 %v4953_v19, %v4953_v19  ;;  %v1568_v63 = vadd.f32 %v1567_v44, %v4953_v19 }
 0x602   :  { %v1606_v10 = vadd.f32 %v1605_v36, %v1591_v34 }
 0x607   :  { %v4967_v58 = vpop.f32.mrf.mxu2 }
 0x608   :  { %v1592_v9 = vmul.f32 %v4967_v58, %v4967_v58  ;;  %v1569_v11 = vadd.f32 %v1568_v63, %v4967_v58 }
 0x60a   :  { %v1607_v13 = vadd.f32 %v1606_v10, %v1592_v9 }
 0x60f   :  { %v1551_v12 = vpop.f32.mrf.mxu2 }
 0x610   :  { %v1570_v16 = vadd.f32 %v1569_v11, %v1551_v12  ;;  %v1593_v52 = vmul.f32 %v1551_v12, %v1551_v12 }
 0x612   :  { %v1571_v5 = vrot.slane %v1570_v16, 4  ;;  %v1608_v33 = vadd.f32 %v1607_v13, %v1593_v52 }
 0x614   :  { %v1572_v50 = vadd.f32 %v1571_v5, %v1570_v16  ;;  %v1609_v51 = vrot.slane %v1608_v33, 4 }
 0x616   :  { %v1573_v54 = vrot.slane %v1572_v50, 2  ;;  %v1610_v3 = vadd.f32 %v1609_v51, %v1608_v33  ;;  %v5017_v51 = vld [vmem:[%s5861_s2 + $0xd] ss:$0 sm:$0xff] }
 0x618   :  { %v1574_v61 = vadd.f32 %v1573_v54, %v1572_v50  ;;  %v1611_v17 = vrot.slane %v1610_v3, 2 }
 0x61a   :  { %v1575_v43 = vrot.slane %v1574_v61, 1  ;;  %v1612_v25 = vadd.f32 %v1611_v17, %v1610_v3 }
 0x61c   :  { %v1576_v6 = vadd.f32 %v1575_v43, %v1574_v61  ;;  %v1613_v18 = vrot.slane %v1612_v25, 1 }
 0x61e   :  { %v4983_v22 = vmul.f32 %v1576_v6, %v3992_v2  ;;  %v1614_v41 = vadd.f32 %v1613_v18, %v1612_v25 }
 0x620   :  { %v1615_v27 = vmul.f32 %v1614_v41, %v3992_v2  ;;  %v1616_v40 = vmul.f32 %v4983_v22, %v4983_v22  ;;  %v1640_v59 = vsub.f32 %v4924_v23, %v4983_v22  ;;  %v1641_v44 = vsub.f32 %v4926_v49, %v4983_v22  ;;  %v1554_v49 = vld [vmem:[%s5861_s2 + $0x4] sm:$0x1] }
 0x621   :  { %v1642_v36 = vsub.f32 %v4939_v1, %v4983_v22  ;;  %v1643_v63 = vsub.f32 %v4953_v19, %v4983_v22  ;;  %v1644_v9 = vsub.f32 %v4967_v58, %v4983_v22  ;;  %v1645_v5 = vsub.f32 %v1551_v12, %v4983_v22 }
 0x622   :  { %v1617_v47 = vsub.f32 %v1615_v27, %v1616_v40  ;;  %v1630_v33 = vsub.f32 %v4889_v21, %v4983_v22  ;;  %v1631_v50 = vsub.f32 %v4891_v46, %v4983_v22  ;;  %v1638_v46 = vsub.f32 %v4917_v31, %v4983_v22 }
 0x623   :  { %v1639_v25 = vsub.f32 %v4919_v29, %v4983_v22  ;;  %v1632_v6 = vsub.f32 %v4896_v38, %v4983_v22  ;;  %v1633_v32 = vsub.f32 %v4898_v28, %v4983_v22 }
 0x624   :  { %v1618_v34 = vadd.f32 1e-05, %v1617_v47 }
 0x626   :  { %3752 = vrsqrt.f32 %v1618_v34  ;;  %vm1625_vm14 = vweird.f32 %v1618_v34 }
 0x62c   :  { %v3753_v10 = vpop.eup %3752 }
 0x62d   :  { %v1620_v11 = vmul.f32 %v3753_v10, %v1618_v34  ;;  %vm1626_vm13 = vweird.f32 %v3753_v10 }
 0x62e   :  { %vm1627_vm15 = vmor %vm1625_vm14, %vm1626_vm13 }
 0x62f   :  { %v1621_v13 = vmul.f32 %v3753_v10, %v1620_v11 }
 0x631   :  { %v1622_v16 = vmul.f32 0.5, %v1621_v13 }
 0x633   :  { %v1623_v23 = vsub.f32 1.5, %v1622_v16 }
 0x635   :  { %v1624_v52 = vmul.f32 %v3753_v10, %v1623_v23 }
 0x637   :  { %v1628_v1 = vsel %vm1627_vm15, %v3753_v10, %v1624_v52 }
 0x638   :  { %v1629_v19 = vmul.f32 %v1628_v1, %v1554_v49 }
 0x63a   :  { %v5008_v58 = vperm.slane %v1629_v19, 0 }
 0x63c   :  { %v1662_v54 = vmul.f32 %v5008_v58, %v1645_v5  ;;  %v1647_v3 = vmul.f32 %v5008_v58, %v1630_v33  ;;  %v1648_v61 = vmul.f32 %v5008_v58, %v1631_v50  ;;  %v1655_v41 = vmul.f32 %v5008_v58, %v1638_v46 }
 0x63d   :  { %v1656_v35 = vmul.f32 %v5008_v58, %v1639_v25  ;;  %v1649_v27 = vmul.f32 %v5008_v58, %v1632_v6  ;;  %v1657_v40 = vmul.f32 %v5008_v58, %v1640_v59  ;;  %v1658_v31 = vmul.f32 %v5008_v58, %v1641_v44 }
 0x63e   :  { %v1664_v12 = vadd.f32 %v5017_v51, %v1647_v3  ;;  %v1665_v17 = vadd.f32 %v5017_v51, %v1648_v61  ;;  %v1650_v29 = vmul.f32 %v5008_v58, %v1633_v32  ;;  %v1672_v47 = vadd.f32 %v5017_v51, %v1655_v41 }
 0x63f   :  { %v1673_v38 = vadd.f32 %v5017_v51, %v1656_v35  ;;  %v1659_v4 = vmul.f32 %v5008_v58, %v1642_v36  ;;  %v1674_v28 = vadd.f32 %v5017_v51, %v1657_v40  ;;  %v1675_v34 = vadd.f32 %v5017_v51, %v1658_v31 }
 0x640   :  { %v1680_v43 = vmax.f32 %v1664_v12, 0.0  ;;  %v1681_v21 = vmax.f32 %v1665_v17, 0.0  ;;  %v1660_v10 = vmul.f32 %v5008_v58, %v1643_v63  ;;  %v1661_v11 = vmul.f32 %v5008_v58, %v1644_v9 }
 0x641   :  { %v1688_v59 = vmax.f32 %v1672_v47, 0.0  ;;  %v1689_v13 = vmax.f32 %v1673_v38, 0.0  ;;  %v1676_v44 = vadd.f32 %v5017_v51, %v1659_v4  ;;  %v1679_v16 = vadd.f32 %v5017_v51, %v1662_v54 }
 0x642   :  { %v1696_v18 = vpack.c.bf16 %v1681_v21, %v1680_v43  ;;  %v1690_v23 = vmax.f32 %v1674_v28, 0.0  ;;  %v1691_v49 = vmax.f32 %v1675_v34, 0.0  ;;  %v1677_v52 = vadd.f32 %v5017_v51, %v1660_v10 }
 0x643   :  { %v1678_v36 = vadd.f32 %v5017_v51, %v1661_v11  ;;  %v1700_v1 = vpack.c.bf16 %v1689_v13, %v1688_v59  ;;  %v1692_v19 = vmax.f32 %v1676_v44, 0.0  ;;  %v1695_v5 = vmax.f32 %v1679_v16, 0.0  ;;  %v3620_v59 = vld [vmem:[%s5860_s1 + $0x228] sm:$0xff]  ;;  %v3619_v16 = vld [vmem:[%s5860_s1 + $0x220] sm:$0xff] }
 0x644   :  { %1777 = vmatmul.bf16.vlgmr.msra.gmra.mxu3 %v1696_v18  ;;  %v1701_v33 = vpack.c.bf16 %v1691_v49, %v1690_v23  ;;  %v1693_v50 = vmax.f32 %v1677_v52, 0.0  ;;  %v1666_v9 = vadd.f32 %v5017_v51, %v1649_v27  ;;  %v1667_v3 = vadd.f32 %v5017_v51, %v1650_v29  ;;  %v3618_v52 = vld [vmem:[%s5860_s1 + $0x218] sm:$0xff] }
 0x645   :  { %v1694_v63 = vmax.f32 %v1678_v36, 0.0  ;;  %v1634_v21 = vsub.f32 %v4903_v30, %v4983_v22  ;;  %v1635_v46 = vsub.f32 %v4905_v0, %v4983_v22  ;;  %v1636_v40 = vsub.f32 %v4910_v55, %v4983_v22 }
 0x646   :  { %v1702_v61 = vpack.c.bf16 %v1693_v50, %v1692_v19  ;;  %v1682_v17 = vmax.f32 %v1666_v9, 0.0  ;;  %v1683_v54 = vmax.f32 %v1667_v3, 0.0  ;;  %v1637_v30 = vsub.f32 %v4912_v24, %v4983_v22  ;;  %v3622_v24 = vld [vmem:[%s5860_s1 + $0x238] sm:$0xff] }
 0x647   :  { %v1703_v12 = vpack.c.bf16 %v1695_v5, %v1694_v63  ;;  %v1651_v25 = vmul.f32 %v5008_v58, %v1634_v21  ;;  %v1652_v6 = vmul.f32 %v5008_v58, %v1635_v46  ;;  %v1653_v0 = vmul.f32 %v5008_v58, %v1636_v40  ;;  %2033 = vmatpush.bf16.msra.mxu0 %v3622_v24 }
 0x648   :  { %v1697_v43 = vpack.c.bf16 %v1683_v54, %v1682_v17  ;;  %v1654_v31 = vmul.f32 %v5008_v58, %v1637_v30 }
 0x649   :  { %v1668_v18 = vadd.f32 %v5017_v51, %v1651_v25  ;;  %v1669_v32 = vadd.f32 %v5017_v51, %v1652_v6  ;;  %v1670_v29 = vadd.f32 %v5017_v51, %v1653_v0 }
 0x64a   :  { %v1671_v47 = vadd.f32 %v5017_v51, %v1654_v31  ;;  %v3621_v51 = vld [vmem:[%s5860_s1 + $0x230] sm:$0xff] }
 0x64b   :  { %v1684_v41 = vmax.f32 %v1668_v18, 0.0  ;;  %v1685_v35 = vmax.f32 %v1669_v32, 0.0  ;;  %v1686_v38 = vmax.f32 %v1670_v29, 0.0  ;;  %2034 = vmatpush.bf16.msra.mxu0 %v3621_v51 }
 0x64c   :  { %v1687_v4 = vmax.f32 %v1671_v47, 0.0 }
 0x64d   :  { %v1698_v27 = vpack.c.bf16 %v1685_v35, %v1684_v41 }
 0x64e   :  { %v1699_v28 = vpack.c.bf16 %v1687_v4, %v1686_v38 }
 0x64f   :  { %2035 = vmatpush.bf16.msra.mxu0 %v3620_v59 }
 0x653   :  { %2036 = vmatpush.bf16.msra.mxu0 %v3619_v16 }
 0x654   :  { %1782 = vmatmul.bf16.gmra.mxu3 %v1697_v43 }
 0x657   :  { %2037 = vmatpush.bf16.msra.mxu0 %v3618_v52 }
 0x664   :  { %1787 = vmatmul.bf16.gmra.mxu3 %v1698_v27 }
 0x674   :  { %1792 = vmatmul.bf16.gmra.mxu3 %v1699_v28 }
 0x684   :  { %1797 = vmatmul.bf16.gmra.mxu3 %v1700_v1 }
 0x694   :  { %1802 = vmatmul.bf16.gmra.mxu3 %v1701_v33 }
 0x6a4   :  { %1807 = vmatmul.bf16.gmra.mxu3 %v1702_v61 }
 0x6b4   :  { %1812 = vmatmul.bf16.gmra.mxu3 %v1703_v12 }
 0x6c7   :  { %v5067_v55 = vpop.f32.mrf.mxu3 }
 0x6c8   :  { %v1842_v5 = vmul.f32 %v5067_v55, %v5067_v55 }
 0x6cf   :  { %v5069_v34 = vpop.f32.mrf.mxu3 }
 0x6d0   :  { %v1843_v19 = vmul.f32 %v5069_v34, %v5069_v34  ;;  %v1820_v33 = vadd.f32 %v5069_v34, %v5067_v55 }
 0x6d2   :  { %v1858_v63 = vadd.f32 %v1843_v19, %v1842_v5 }
 0x6d7   :  { %v5074_v22 = vpop.f32.mrf.mxu3 }
 0x6d8   :  { %v1844_v50 = vmul.f32 %v5074_v22, %v5074_v22  ;;  %v1821_v9 = vadd.f32 %v1820_v33, %v5074_v22 }
 0x6da   :  { %v1859_v12 = vadd.f32 %v1858_v63, %v1844_v50 }
 0x6df   :  { %v5076_v58 = vpop.f32.mrf.mxu3 }
 0x6e0   :  { %v1845_v3 = vmul.f32 %v5076_v58, %v5076_v58  ;;  %v1822_v17 = vadd.f32 %v1821_v9, %v5076_v58 }
 0x6e2   :  { %v1860_v43 = vadd.f32 %v1859_v12, %v1845_v3 }
 0x6e7   :  { %v5081_v10 = vpop.f32.mrf.mxu3 }
 0x6e8   :  { %v1846_v54 = vmul.f32 %v5081_v10, %v5081_v10  ;;  %v1823_v21 = vadd.f32 %v1822_v17, %v5081_v10 }
 0x6ea   :  { %v1861_v25 = vadd.f32 %v1860_v43, %v1846_v54 }
 0x6ef   :  { %v5083_v11 = vpop.f32.mrf.mxu3 }
 0x6f0   :  { %v1847_v46 = vmul.f32 %v5083_v11, %v5083_v11  ;;  %v1824_v6 = vadd.f32 %v1823_v21, %v5083_v11 }
 0x6f2   :  { %v1862_v32 = vadd.f32 %v1861_v25, %v1847_v46 }
 0x6f7   :  { %v5088_v13 = vpop.f32.mrf.mxu3 }
 0x6f8   :  { %v1848_v18 = vmul.f32 %v5088_v13, %v5088_v13  ;;  %v1825_v41 = vadd.f32 %v1824_v6, %v5088_v13 }
 0x6fa   :  { %v1863_v40 = vadd.f32 %v1862_v32, %v1848_v18 }
 0x6ff   :  { %v5090_v44 = vpop.f32.mrf.mxu3 }
 0x700   :  { %v1849_v35 = vmul.f32 %v5090_v44, %v5090_v44  ;;  %v1826_v30 = vadd.f32 %v1825_v41, %v5090_v44 }
 0x702   :  { %v1864_v31 = vadd.f32 %v1863_v40, %v1849_v35 }
 0x707   :  { %v5095_v23 = vpop.f32.mrf.mxu3 }
 0x708   :  { %v1850_v0 = vmul.f32 %v5095_v23, %v5095_v23  ;;  %v1827_v29 = vadd.f32 %v1826_v30, %v5095_v23 }
 0x70a   :  { %v1865_v38 = vadd.f32 %v1864_v31, %v1850_v0 }
 0x70f   :  { %v5097_v49 = vpop.f32.mrf.mxu3 }
 0x710   :  { %v1851_v47 = vmul.f32 %v5097_v49, %v5097_v49  ;;  %v1828_v4 = vadd.f32 %v1827_v29, %v5097_v49 }
 0x712   :  { %v1866_v24 = vadd.f32 %v1865_v38, %v1851_v47 }
 0x717   :  { %v5102_v36 = vpop.f32.mrf.mxu3 }
 0x718   :  { %v1852_v28 = vmul.f32 %v5102_v36, %v5102_v36  ;;  %v1829_v51 = vadd.f32 %v1828_v4, %v5102_v36 }
 0x71a   :  { %v1867_v52 = vadd.f32 %v1866_v24, %v1852_v28  ;;  %v3617_v24 = vld [vmem:[%s5860_s1 + $0x210] sm:$0xff] }
 0x71b   :  { %2038 = vmatpush.bf16.msra.mxu0 %v3617_v24 }
 0x71f   :  { %v5104_v1 = vpop.f32.mrf.mxu3 }
 0x720   :  { %v1853_v59 = vmul.f32 %v5104_v1, %v5104_v1  ;;  %v1830_v19 = vadd.f32 %v1829_v51, %v5104_v1 }
 0x722   :  { %v1868_v33 = vadd.f32 %v1867_v52, %v1853_v59 }
 0x727   :  { %v5117_v61 = vpop.f32.mrf.mxu3 }
 0x728   :  { %v1854_v5 = vmul.f32 %v5117_v61, %v5117_v61  ;;  %v1831_v50 = vadd.f32 %v1830_v19, %v5117_v61  ;;  %v3616_v19 = vld [vmem:[%s5860_s1 + $0x208] sm:$0xff] }
 0x729   :  { %2039 = vmatpush.bf16.msra.mxu0 %v3616_v19 }
 0x72a   :  { %v1869_v9 = vadd.f32 %v1868_v33, %v1854_v5 }
 0x72f   :  { %v5131_v27 = vpop.f32.mrf.mxu3 }
 0x730   :  { %v1855_v63 = vmul.f32 %v5131_v27, %v5131_v27  ;;  %v1832_v3 = vadd.f32 %v1831_v50, %v5131_v27 }
 0x732   :  { %v1870_v17 = vadd.f32 %v1869_v9, %v1855_v63  ;;  %v3615_v9 = vld [vmem:[%s5860_s1 + $0x200] sm:$0xff] }
 0x733   :  { %2040 = vmatpush.bf16.msra.mxu0 %v3615_v9 }
 0x737   :  { %v5145_v16 = vpop.f32.mrf.mxu3 }
 0x738   :  { %v1856_v12 = vmul.f32 %v5145_v16, %v5145_v16  ;;  %v1833_v54 = vadd.f32 %v1832_v3, %v5145_v16 }
 0x73a   :  { %v1871_v21 = vadd.f32 %v1870_v17, %v1856_v12 }
 0x73f   :  { %v1815_v43 = vpop.f32.mrf.mxu3 }
 0x740   :  { %v1834_v46 = vadd.f32 %v1833_v54, %v1815_v43  ;;  %v1857_v25 = vmul.f32 %v1815_v43, %v1815_v43 }
 0x742   :  { %v1835_v6 = vrot.slane %v1834_v46, 4  ;;  %v1872_v18 = vadd.f32 %v1871_v21, %v1857_v25 }
 0x744   :  { %v1836_v32 = vadd.f32 %v1835_v6, %v1834_v46  ;;  %v1873_v41 = vrot.slane %v1872_v18, 4  ;;  %v1818_v46 = vld [vmem:[%s5861_s2 + $0x5] sm:$0x1] }
 0x746   :  { %v1837_v35 = vrot.slane %v1836_v32, 2  ;;  %v1874_v40 = vadd.f32 %v1873_v41, %v1872_v18 }
 0x748   :  { %v1838_v30 = vadd.f32 %v1837_v35, %v1836_v32  ;;  %v1875_v0 = vrot.slane %v1874_v40, 2 }
 0x74a   :  { %v1839_v31 = vrot.slane %v1838_v30, 1  ;;  %v1876_v29 = vadd.f32 %v1875_v0, %v1874_v40 }
 0x74c   :  { %v1840_v47 = vadd.f32 %v1839_v31, %v1838_v30  ;;  %v1877_v38 = vrot.slane %v1876_v29, 1 }
 0x74e   :  { %v5158_v4 = vmul.f32 %v1840_v47, %v3992_v2  ;;  %v1878_v28 = vadd.f32 %v1877_v38, %v1876_v29 }
 0x750   :  { %v1879_v51 = vmul.f32 %v1878_v28, %v3992_v2  ;;  %v1880_v59 = vmul.f32 %v5158_v4, %v5158_v4  ;;  %v1909_v52 = vsub.f32 %v1815_v43, %v5158_v4  ;;  %v1904_v33 = vsub.f32 %v5102_v36, %v5158_v4 }
 0x751   :  { %v1905_v50 = vsub.f32 %v5104_v1, %v5158_v4  ;;  %v1906_v3 = vsub.f32 %v5117_v61, %v5158_v4  ;;  %v1907_v12 = vsub.f32 %v5131_v27, %v5158_v4  ;;  %v1908_v17 = vsub.f32 %v5145_v16, %v5158_v4  ;;  %v5191_v16 = vld [vmem:[%s5861_s2 + $0xe] ss:$0 sm:$0xff] }
 0x752   :  { %v1881_v5 = vsub.f32 %v1879_v51, %v1880_v59  ;;  %v1894_v18 = vsub.f32 %v5067_v55, %v5158_v4  ;;  %v1895_v32 = vsub.f32 %v5069_v34, %v5158_v4  ;;  %v1902_v55 = vsub.f32 %v5095_v23, %v5158_v4 }
 0x753   :  { %v1903_v34 = vsub.f32 %v5097_v49, %v5158_v4  ;;  %v1896_v38 = vsub.f32 %v5074_v22, %v5158_v4  ;;  %v1897_v59 = vsub.f32 %v5076_v58, %v5158_v4 }
 0x754   :  { %v1882_v63 = vadd.f32 1e-05, %v1881_v5 }
 0x756   :  { %3754 = vrsqrt.f32 %v1882_v63  ;;  %vm1889_vm1 = vweird.f32 %v1882_v63 }
 0x75c   :  { %v3755_v36 = vpop.eup %3754 }
 0x75d   :  { %v1884_v54 = vmul.f32 %v3755_v36, %v1882_v63  ;;  %vm1890_vm0 = vweird.f32 %v3755_v36 }
 0x75e   :  { %vm1891_vm2 = vmor %vm1889_vm1, %vm1890_vm0 }
 0x75f   :  { %v1885_v1 = vmul.f32 %v3755_v36, %v1884_v54 }
 0x761   :  { %v1886_v43 = vmul.f32 0.5, %v1885_v1 }
 0x763   :  { %v1887_v21 = vsub.f32 1.5, %v1886_v43 }
 0x765   :  { %v1888_v25 = vmul.f32 %v3755_v36, %v1887_v21 }
 0x767   :  { %v1892_v61 = vsel %vm1891_vm2, %v3755_v36, %v1888_v25 }
 0x768   :  { %v1893_v27 = vmul.f32 %v1892_v61, %v1818_v46 }
 0x76a   :  { %v5186_v6 = vperm.slane %v1893_v27, 0 }
 0x76c   :  { %v1926_v41 = vmul.f32 %v5186_v6, %v1909_v52  ;;  %v1911_v35 = vmul.f32 %v5186_v6, %v1894_v18  ;;  %v1912_v40 = vmul.f32 %v5186_v6, %v1895_v32  ;;  %v1919_v24 = vmul.f32 %v5186_v6, %v1902_v55 }
 0x76d   :  { %v1920_v51 = vmul.f32 %v5186_v6, %v1903_v34  ;;  %v1913_v52 = vmul.f32 %v5186_v6, %v1896_v38  ;;  %v1921_v19 = vmul.f32 %v5186_v6, %v1904_v33  ;;  %v1922_v5 = vmul.f32 %v5186_v6, %v1905_v50 }
 0x76e   :  { %v1943_v30 = vadd.f32 %v5191_v16, %v1926_v41  ;;  %v1928_v0 = vadd.f32 %v5191_v16, %v1911_v35  ;;  %v1929_v31 = vadd.f32 %v5191_v16, %v1912_v40  ;;  %v1936_v23 = vadd.f32 %v5191_v16, %v1919_v24 }
 0x76f   :  { %v1937_v49 = vadd.f32 %v5191_v16, %v1920_v51  ;;  %v1923_v22 = vmul.f32 %v5186_v6, %v1906_v3  ;;  %v1914_v63 = vmul.f32 %v5186_v6, %v1897_v59  ;;  %v1938_v9 = vadd.f32 %v5191_v16, %v1921_v19 }
 0x770   :  { %v1944_v29 = vmax.f32 %v1928_v0, 0.0  ;;  %v1945_v47 = vmax.f32 %v1929_v31, 0.0  ;;  %v1924_v36 = vmul.f32 %v5186_v6, %v1907_v12  ;;  %v1925_v58 = vmul.f32 %v5186_v6, %v1908_v17 }
 0x771   :  { %v1952_v54 = vmax.f32 %v1936_v23, 0.0  ;;  %v1953_v1 = vmax.f32 %v1937_v49, 0.0  ;;  %v1939_v33 = vadd.f32 %v5191_v16, %v1922_v5  ;;  %v1940_v43 = vadd.f32 %v5191_v16, %v1923_v22 }
 0x772   :  { %v1960_v28 = vpack.c.bf16 %v1945_v47, %v1944_v29  ;;  %v1954_v21 = vmax.f32 %v1938_v9, 0.0  ;;  %v1941_v46 = vadd.f32 %v5191_v16, %v1924_v36  ;;  %v1942_v50 = vadd.f32 %v5191_v16, %v1925_v58 }
 0x773   :  { %v1959_v3 = vmax.f32 %v1943_v30, 0.0  ;;  %v1964_v25 = vpack.c.bf16 %v1953_v1, %v1952_v54  ;;  %v1955_v61 = vmax.f32 %v1939_v33, 0.0  ;;  %v1956_v27 = vmax.f32 %v1940_v43, 0.0  ;;  %v3628_v54 = vld [vmem:[%s5860_s1 + $0x268] sm:$0xff]  ;;  %v3627_v43 = vld [vmem:[%s5860_s1 + $0x260] sm:$0xff] }
 0x774   :  { %2041 = vmatmul.bf16.vlgmr.msra.gmra.mxu0 %v1960_v28  ;;  %v1957_v18 = vmax.f32 %v1941_v46, 0.0  ;;  %v1958_v32 = vmax.f32 %v1942_v50, 0.0  ;;  %v1930_v12 = vadd.f32 %v5191_v16, %v1913_v52  ;;  %v1931_v17 = vadd.f32 %v5191_v16, %v1914_v63  ;;  %v3626_v50 = vld [vmem:[%s5860_s1 + $0x258] sm:$0xff] }
 0x775   :  { %v1965_v41 = vpack.c.bf16 %v1955_v61, %v1954_v21  ;;  %v1898_v47 = vsub.f32 %v5081_v10, %v5158_v4  ;;  %v1899_v30 = vsub.f32 %v5083_v11, %v5158_v4  ;;  %v1900_v52 = vsub.f32 %v5088_v13, %v5158_v4 }
 0x776   :  { %v1966_v35 = vpack.c.bf16 %v1957_v18, %v1956_v27  ;;  %v1967_v40 = vpack.c.bf16 %v1959_v3, %v1958_v32  ;;  %v1946_v0 = vmax.f32 %v1930_v12, 0.0  ;;  %v1947_v31 = vmax.f32 %v1931_v17, 0.0 }
 0x777   :  { %v1915_v55 = vmul.f32 %v5186_v6, %v1898_v47  ;;  %v1916_v34 = vmul.f32 %v5186_v6, %v1899_v30  ;;  %v1901_v10 = vsub.f32 %v5090_v44, %v5158_v4  ;;  %v1917_v11 = vmul.f32 %v5186_v6, %v1900_v52  ;;  %v3630_v44 = vld [vmem:[%s5860_s1 + $0x278] sm:$0xff] }
 0x778   :  { %v1961_v29 = vpack.c.bf16 %v1947_v31, %v1946_v0  ;;  %2297 = vmatpush.bf16.msra.mxu1 %v3630_v44 }
 0x779   :  { %v1932_v38 = vadd.f32 %v5191_v16, %v1915_v55  ;;  %v1933_v28 = vadd.f32 %v5191_v16, %v1916_v34  ;;  %v1918_v19 = vmul.f32 %v5186_v6, %v1901_v10  ;;  %v1934_v23 = vadd.f32 %v5191_v16, %v1917_v11 }
 0x77b   :  { %v1948_v24 = vmax.f32 %v1932_v38, 0.0  ;;  %v1949_v51 = vmax.f32 %v1933_v28, 0.0  ;;  %v1935_v49 = vadd.f32 %v5191_v16, %v1918_v19  ;;  %v1950_v5 = vmax.f32 %v1934_v23, 0.0  ;;  %v3629_v16 = vld [vmem:[%s5860_s1 + $0x270] sm:$0xff] }
 0x77c   :  { %2298 = vmatpush.bf16.msra.mxu1 %v3629_v16 }
 0x77d   :  { %v1962_v59 = vpack.c.bf16 %v1949_v51, %v1948_v24  ;;  %v1951_v22 = vmax.f32 %v1935_v49, 0.0 }
 0x77f   :  { %v1963_v63 = vpack.c.bf16 %v1951_v22, %v1950_v5 }
 0x780   :  { %2299 = vmatpush.bf16.msra.mxu1 %v3628_v54 }
 0x784   :  { %2046 = vmatmul.bf16.gmra.mxu0 %v1961_v29  ;;  %2300 = vmatpush.bf16.msra.mxu1 %v3627_v43 }
 0x788   :  { %2301 = vmatpush.bf16.msra.mxu1 %v3626_v50 }
 0x794   :  { %2051 = vmatmul.bf16.gmra.mxu0 %v1962_v59 }
 0x7a4   :  { %2056 = vmatmul.bf16.gmra.mxu0 %v1963_v63 }
 0x7b4   :  { %2061 = vmatmul.bf16.gmra.mxu0 %v1964_v25 }
 0x7c4   :  { %2066 = vmatmul.bf16.gmra.mxu0 %v1965_v41 }
 0x7d4   :  { %2071 = vmatmul.bf16.gmra.mxu0 %v1966_v35 }
 0x7e4   :  { %2076 = vmatmul.bf16.gmra.mxu0 %v1967_v40 }
 0x7f1   :  { %v5245_v13 = vpop.f32.mrf.mxu0 }
 0x7f2   :  { %v2106_v27 = vmul.f32 %v5245_v13, %v5245_v13 }
 0x7f9   :  { %v5247_v9 = vpop.f32.mrf.mxu0 }
 0x7fa   :  { %v2107_v61 = vmul.f32 %v5247_v9, %v5247_v9  ;;  %v2084_v18 = vadd.f32 %v5247_v9, %v5245_v13 }
 0x7fc   :  { %v2122_v12 = vadd.f32 %v2107_v61, %v2106_v27 }
 0x801   :  { %v5252_v4 = vpop.f32.mrf.mxu0 }
 0x802   :  { %v2108_v32 = vmul.f32 %v5252_v4, %v5252_v4  ;;  %v2085_v17 = vadd.f32 %v2084_v18, %v5252_v4 }
 0x804   :  { %v2123_v40 = vadd.f32 %v2122_v12, %v2108_v32 }
 0x809   :  { %v5254_v6 = vpop.f32.mrf.mxu0 }
 0x80a   :  { %v2109_v41 = vmul.f32 %v5254_v6, %v5254_v6  ;;  %v2086_v0 = vadd.f32 %v2085_v17, %v5254_v6 }
 0x80c   :  { %v2124_v29 = vadd.f32 %v2123_v40, %v2109_v41 }
 0x811   :  { %v5259_v36 = vpop.f32.mrf.mxu0 }
 0x812   :  { %v2110_v31 = vmul.f32 %v5259_v36, %v5259_v36  ;;  %v2087_v47 = vadd.f32 %v2086_v0, %v5259_v36 }
 0x814   :  { %v2125_v55 = vadd.f32 %v2124_v29, %v2110_v31 }
 0x819   :  { %v5261_v58 = vpop.f32.mrf.mxu0 }
 0x81a   :  { %v2111_v30 = vmul.f32 %v5261_v58, %v5261_v58  ;;  %v2088_v34 = vadd.f32 %v2087_v47, %v5261_v58 }
 0x81c   :  { %v2126_v28 = vadd.f32 %v2125_v55, %v2111_v30 }
 0x821   :  { %v5266_v1 = vpop.f32.mrf.mxu0 }
 0x822   :  { %v2112_v38 = vmul.f32 %v5266_v1, %v5266_v1  ;;  %v2089_v24 = vadd.f32 %v2088_v34, %v5266_v1 }
 0x824   :  { %v2127_v52 = vadd.f32 %v2126_v28, %v2112_v38 }
 0x829   :  { %v5268_v33 = vpop.f32.mrf.mxu0 }
 0x82a   :  { %v2113_v51 = vmul.f32 %v5268_v33, %v5268_v33  ;;  %v2090_v10 = vadd.f32 %v2089_v24, %v5268_v33 }
 0x82c   :  { %v2128_v19 = vadd.f32 %v2127_v52, %v2113_v51 }
 0x831   :  { %v5273_v21 = vpop.f32.mrf.mxu0 }
 0x832   :  { %v2114_v11 = vmul.f32 %v5273_v21, %v5273_v21  ;;  %v2091_v23 = vadd.f32 %v2090_v10, %v5273_v21 }
 0x834   :  { %v2129_v5 = vadd.f32 %v2128_v19, %v2114_v11 }
 0x839   :  { %v5275_v46 = vpop.f32.mrf.mxu0 }
 0x83a   :  { %v2115_v49 = vmul.f32 %v5275_v46, %v5275_v46  ;;  %v2092_v22 = vadd.f32 %v2091_v23, %v5275_v46 }
 0x83c   :  { %v2130_v44 = vadd.f32 %v2129_v5, %v2115_v49 }
 0x841   :  { %v5280_v3 = vpop.f32.mrf.mxu0 }
 0x842   :  { %v2116_v63 = vmul.f32 %v5280_v3, %v5280_v3  ;;  %v2093_v16 = vadd.f32 %v2092_v22, %v5280_v3 }
 0x844   :  { %v2131_v50 = vadd.f32 %v2130_v44, %v2116_v63  ;;  %v3625_v44 = vld [vmem:[%s5860_s1 + $0x250] sm:$0xff] }
 0x845   :  { %2302 = vmatpush.bf16.msra.mxu1 %v3625_v44 }
 0x849   :  { %v5282_v25 = vpop.f32.mrf.mxu0 }
 0x84a   :  { %v2117_v54 = vmul.f32 %v5282_v25, %v5282_v25  ;;  %v2094_v61 = vadd.f32 %v2093_v16, %v5282_v25 }
 0x84c   :  { %v2132_v18 = vadd.f32 %v2131_v50, %v2117_v54 }
 0x851   :  { %v5295_v35 = vpop.f32.mrf.mxu0 }
 0x852   :  { %v2118_v27 = vmul.f32 %v5295_v35, %v5295_v35  ;;  %v2095_v32 = vadd.f32 %v2094_v61, %v5295_v35  ;;  %v3624_v61 = vld [vmem:[%s5860_s1 + $0x248] sm:$0xff] }
 0x853   :  { %2303 = vmatpush.bf16.msra.mxu1 %v3624_v61 }
 0x854   :  { %v2133_v17 = vadd.f32 %v2132_v18, %v2118_v27 }
 0x859   :  { %v5309_v59 = vpop.f32.mrf.mxu0 }
 0x85a   :  { %v2119_v12 = vmul.f32 %v5309_v59, %v5309_v59  ;;  %v2096_v41 = vadd.f32 %v2095_v32, %v5309_v59 }
 0x85c   :  { %v2134_v0 = vadd.f32 %v2133_v17, %v2119_v12  ;;  %v3623_v17 = vld [vmem:[%s5860_s1 + $0x240] sm:$0xff] }
 0x85d   :  { %2304 = vmatpush.bf16.msra.mxu1 %v3623_v17 }
 0x861   :  { %v5323_v43 = vpop.f32.mrf.mxu0 }
 0x862   :  { %v2120_v40 = vmul.f32 %v5323_v43, %v5323_v43  ;;  %v2097_v31 = vadd.f32 %v2096_v41, %v5323_v43 }
 0x864   :  { %v2135_v47 = vadd.f32 %v2134_v0, %v2120_v40 }
 0x869   :  { %v2079_v29 = vpop.f32.mrf.mxu0 }
 0x86a   :  { %v2098_v30 = vadd.f32 %v2097_v31, %v2079_v29  ;;  %v2121_v55 = vmul.f32 %v2079_v29, %v2079_v29 }
 0x86c   :  { %v2099_v34 = vrot.slane %v2098_v30, 4  ;;  %v2136_v38 = vadd.f32 %v2135_v47, %v2121_v55 }
 0x86e   :  { %v2100_v28 = vadd.f32 %v2099_v34, %v2098_v30  ;;  %v2137_v24 = vrot.slane %v2136_v38, 4  ;;  %v2082_v30 = vld [vmem:[%s5861_s2 + $0x6] sm:$0x1] }
 0x870   :  { %v2101_v51 = vrot.slane %v2100_v28, 2  ;;  %v2138_v52 = vadd.f32 %v2137_v24, %v2136_v38 }
 0x872   :  { %v2102_v10 = vadd.f32 %v2101_v51, %v2100_v28  ;;  %v2139_v11 = vrot.slane %v2138_v52, 2 }
 0x874   :  { %v2103_v19 = vrot.slane %v2102_v10, 1  ;;  %v2140_v23 = vadd.f32 %v2139_v11, %v2138_v52 }
 0x876   :  { %v2104_v49 = vadd.f32 %v2103_v19, %v2102_v10  ;;  %v2141_v5 = vrot.slane %v2140_v23, 1 }
 0x878   :  { %v5336_v22 = vmul.f32 %v2104_v49, %v3992_v2  ;;  %v2142_v63 = vadd.f32 %v2141_v5, %v2140_v23 }
 0x87a   :  { %v2143_v16 = vmul.f32 %v2142_v63, %v3992_v2  ;;  %v2144_v54 = vmul.f32 %v5336_v22, %v5336_v22  ;;  %v2173_v50 = vsub.f32 %v2079_v29, %v5336_v22  ;;  %v2168_v18 = vsub.f32 %v5280_v3, %v5336_v22 }
 0x87b   :  { %v2169_v32 = vsub.f32 %v5282_v25, %v5336_v22  ;;  %v2170_v41 = vsub.f32 %v5295_v35, %v5336_v22  ;;  %v2171_v40 = vsub.f32 %v5309_v59, %v5336_v22  ;;  %v2172_v0 = vsub.f32 %v5323_v43, %v5336_v22  ;;  %v5369_v43 = vld [vmem:[%s5861_s2 + $0xf] ss:$0 sm:$0xff] }
 0x87c   :  { %v2145_v27 = vsub.f32 %v2143_v16, %v2144_v54  ;;  %v2158_v38 = vsub.f32 %v5245_v13, %v5336_v22  ;;  %v2159_v28 = vsub.f32 %v5247_v9, %v5336_v22  ;;  %v2166_v13 = vsub.f32 %v5273_v21, %v5336_v22 }
 0x87d   :  { %v2167_v9 = vsub.f32 %v5275_v46, %v5336_v22  ;;  %v2160_v5 = vsub.f32 %v5252_v4, %v5336_v22  ;;  %v2161_v54 = vsub.f32 %v5254_v6, %v5336_v22 }
 0x87e   :  { %v2146_v12 = vadd.f32 1e-05, %v2145_v27 }
 0x880   :  { %3756 = vrsqrt.f32 %v2146_v12  ;;  %vm2153_vm4 = vweird.f32 %v2146_v12 }
 0x886   :  { %v3757_v3 = vpop.eup %3756 }
 0x887   :  { %v2148_v31 = vmul.f32 %v3757_v3, %v2146_v12  ;;  %vm2154_vm3 = vweird.f32 %v3757_v3 }
 0x888   :  { %vm2155_vm5 = vmor %vm2153_vm4, %vm2154_vm3 }
 0x889   :  { %v2149_v25 = vmul.f32 %v3757_v3, %v2148_v31 }
 0x88b   :  { %v2150_v29 = vmul.f32 0.5, %v2149_v25 }
 0x88d   :  { %v2151_v47 = vsub.f32 1.5, %v2150_v29 }
 0x88f   :  { %v2152_v55 = vmul.f32 %v3757_v3, %v2151_v47 }
 0x891   :  { %v2156_v35 = vsel %vm2155_vm5, %v3757_v3, %v2152_v55 }
 0x892   :  { %v2157_v59 = vmul.f32 %v2156_v35, %v2082_v30 }
 0x894   :  { %v5364_v34 = vperm.slane %v2157_v59, 0 }
 0x896   :  { %v2190_v24 = vmul.f32 %v5364_v34, %v2173_v50  ;;  %v2175_v51 = vmul.f32 %v5364_v34, %v2158_v38  ;;  %v2176_v52 = vmul.f32 %v5364_v34, %v2159_v28  ;;  %v2183_v44 = vmul.f32 %v5364_v34, %v2166_v13 }
 0x897   :  { %v2184_v16 = vmul.f32 %v5364_v34, %v2167_v9  ;;  %v2177_v50 = vmul.f32 %v5364_v34, %v2160_v5  ;;  %v2185_v61 = vmul.f32 %v5364_v34, %v2168_v18  ;;  %v2186_v27 = vmul.f32 %v5364_v34, %v2169_v32 }
 0x898   :  { %v2207_v10 = vadd.f32 %v5369_v43, %v2190_v24  ;;  %v2192_v11 = vadd.f32 %v5369_v43, %v2175_v51  ;;  %v2193_v19 = vadd.f32 %v5369_v43, %v2176_v52  ;;  %v2200_v21 = vadd.f32 %v5369_v43, %v2183_v44 }
 0x899   :  { %v2201_v46 = vadd.f32 %v5369_v43, %v2184_v16  ;;  %v2187_v4 = vmul.f32 %v5364_v34, %v2170_v41  ;;  %v2178_v12 = vmul.f32 %v5364_v34, %v2161_v54  ;;  %v2202_v17 = vadd.f32 %v5369_v43, %v2185_v61 }
 0x89a   :  { %v2208_v23 = vmax.f32 %v2192_v11, 0.0  ;;  %v2209_v49 = vmax.f32 %v2193_v19, 0.0  ;;  %v2188_v3 = vmul.f32 %v5364_v34, %v2171_v40  ;;  %v2189_v6 = vmul.f32 %v5364_v34, %v2172_v0 }
 0x89b   :  { %v2216_v31 = vmax.f32 %v2200_v21, 0.0  ;;  %v2217_v25 = vmax.f32 %v2201_v46, 0.0  ;;  %v2203_v18 = vadd.f32 %v5369_v43, %v2186_v27  ;;  %v2204_v29 = vadd.f32 %v5369_v43, %v2187_v4 }
 0x89c   :  { %v2224_v63 = vpack.c.bf16 %v2209_v49, %v2208_v23  ;;  %v2218_v47 = vmax.f32 %v2202_v17, 0.0  ;;  %v2205_v30 = vadd.f32 %v5369_v43, %v2188_v3  ;;  %v2206_v32 = vadd.f32 %v5369_v43, %v2189_v6 }
 0x89d   :  { %v2223_v41 = vmax.f32 %v2207_v10, 0.0  ;;  %v2228_v55 = vpack.c.bf16 %v2217_v25, %v2216_v31  ;;  %v2219_v35 = vmax.f32 %v2203_v18, 0.0  ;;  %v2220_v59 = vmax.f32 %v2204_v29, 0.0  ;;  %v3636_v31 = vld [vmem:[%s5860_s1 + $0x2a8] sm:$0xff]  ;;  %v3635_v29 = vld [vmem:[%s5860_s1 + $0x2a0] sm:$0xff] }
 0x89e   :  { %2305 = vmatmul.bf16.vlgmr.msra.gmra.mxu1 %v2224_v63  ;;  %v2221_v38 = vmax.f32 %v2205_v30, 0.0  ;;  %v2222_v28 = vmax.f32 %v2206_v32, 0.0  ;;  %v2194_v40 = vadd.f32 %v5369_v43, %v2177_v50  ;;  %v2195_v0 = vadd.f32 %v5369_v43, %v2178_v12  ;;  %v3634_v32 = vld [vmem:[%s5860_s1 + $0x298] sm:$0xff] }
 0x89f   :  { %v2229_v24 = vpack.c.bf16 %v2219_v35, %v2218_v47  ;;  %v2162_v49 = vsub.f32 %v5259_v36, %v5336_v22  ;;  %v2163_v10 = vsub.f32 %v5261_v58, %v5336_v22  ;;  %v2164_v50 = vsub.f32 %v5266_v1, %v5336_v22 }
 0x8a0   :  { %v2230_v51 = vpack.c.bf16 %v2221_v38, %v2220_v59  ;;  %v2231_v52 = vpack.c.bf16 %v2223_v41, %v2222_v28  ;;  %v2210_v11 = vmax.f32 %v2194_v40, 0.0  ;;  %v2211_v19 = vmax.f32 %v2195_v0, 0.0 }
 0x8a1   :  { %v2179_v13 = vmul.f32 %v5364_v34, %v2162_v49  ;;  %v2180_v9 = vmul.f32 %v5364_v34, %v2163_v10  ;;  %v2165_v36 = vsub.f32 %v5268_v33, %v5336_v22  ;;  %v2181_v58 = vmul.f32 %v5364_v34, %v2164_v50  ;;  %v3638_v33 = vld [vmem:[%s5860_s1 + $0x2b8] sm:$0xff] }
 0x8a2   :  { %v2225_v23 = vpack.c.bf16 %v2211_v19, %v2210_v11  ;;  %2561 = vmatpush.bf16.msra.mxu2 %v3638_v33 }
 0x8a3   :  { %v2196_v5 = vadd.f32 %v5369_v43, %v2179_v13  ;;  %v2197_v63 = vadd.f32 %v5369_v43, %v2180_v9  ;;  %v2182_v61 = vmul.f32 %v5364_v34, %v2165_v36  ;;  %v2198_v21 = vadd.f32 %v5369_v43, %v2181_v58 }
 0x8a5   :  { %v2212_v44 = vmax.f32 %v2196_v5, 0.0  ;;  %v2213_v16 = vmax.f32 %v2197_v63, 0.0  ;;  %v2199_v46 = vadd.f32 %v5369_v43, %v2182_v61  ;;  %v2214_v27 = vmax.f32 %v2198_v21, 0.0  ;;  %v3637_v43 = vld [vmem:[%s5860_s1 + $0x2b0] sm:$0xff] }
 0x8a6   :  { %2562 = vmatpush.bf16.msra.mxu2 %v3637_v43 }
 0x8a7   :  { %v2226_v54 = vpack.c.bf16 %v2213_v16, %v2212_v44  ;;  %v2215_v4 = vmax.f32 %v2199_v46, 0.0 }
 0x8a9   :  { %v2227_v12 = vpack.c.bf16 %v2215_v4, %v2214_v27 }
 0x8aa   :  { %2563 = vmatpush.bf16.msra.mxu2 %v3636_v31 }
 0x8ae   :  { %2310 = vmatmul.bf16.gmra.mxu1 %v2225_v23  ;;  %2564 = vmatpush.bf16.msra.mxu2 %v3635_v29 }
 0x8b2   :  { %2565 = vmatpush.bf16.msra.mxu2 %v3634_v32 }
 0x8be   :  { %2315 = vmatmul.bf16.gmra.mxu1 %v2226_v54 }
 0x8ce   :  { %2320 = vmatmul.bf16.gmra.mxu1 %v2227_v12 }
 0x8de   :  { %2325 = vmatmul.bf16.gmra.mxu1 %v2228_v55 }
 0x8ee   :  { %2330 = vmatmul.bf16.gmra.mxu1 %v2229_v24 }
 0x8fe   :  { %2335 = vmatmul.bf16.gmra.mxu1 %v2230_v51 }
 0x90e   :  { %2340 = vmatmul.bf16.gmra.mxu1 %v2231_v52 }
 0x91b   :  { %v5423_v1 = vpop.f32.mrf.mxu1 }
 0x91c   :  { %v2370_v59 = vmul.f32 %v5423_v1, %v5423_v1 }
 0x923   :  { %v5425_v17 = vpop.f32.mrf.mxu1 }
 0x924   :  { %v2371_v35 = vmul.f32 %v5425_v17, %v5425_v17  ;;  %v2348_v38 = vadd.f32 %v5425_v17, %v5423_v1 }
 0x926   :  { %v2386_v40 = vadd.f32 %v2371_v35, %v2370_v59 }
 0x92b   :  { %v5430_v22 = vpop.f32.mrf.mxu1 }
 0x92c   :  { %v2372_v28 = vmul.f32 %v5430_v22, %v5430_v22  ;;  %v2349_v0 = vadd.f32 %v2348_v38, %v5430_v22 }
 0x92e   :  { %v2387_v52 = vadd.f32 %v2386_v40, %v2372_v28 }
 0x933   :  { %v5432_v34 = vpop.f32.mrf.mxu1 }
 0x934   :  { %v2373_v24 = vmul.f32 %v5432_v34, %v5432_v34  ;;  %v2350_v11 = vadd.f32 %v2349_v0, %v5432_v34 }
 0x936   :  { %v2388_v23 = vadd.f32 %v2387_v52, %v2373_v24 }
 0x93b   :  { %v5437_v3 = vpop.f32.mrf.mxu1 }
 0x93c   :  { %v2374_v19 = vmul.f32 %v5437_v3, %v5437_v3  ;;  %v2351_v49 = vadd.f32 %v2350_v11, %v5437_v3 }
 0x93e   :  { %v2389_v13 = vadd.f32 %v2388_v23, %v2374_v19 }
 0x943   :  { %v5439_v6 = vpop.f32.mrf.mxu1 }
 0x944   :  { %v2375_v10 = vmul.f32 %v5439_v6, %v5439_v6  ;;  %v2352_v9 = vadd.f32 %v2351_v49, %v5439_v6 }
 0x946   :  { %v2390_v63 = vadd.f32 %v2389_v13, %v2375_v10 }
 0x94b   :  { %v5444_v25 = vpop.f32.mrf.mxu1 }
 0x94c   :  { %v2376_v5 = vmul.f32 %v5444_v25, %v5444_v25  ;;  %v2353_v44 = vadd.f32 %v2352_v9, %v5444_v25 }
 0x94e   :  { %v2391_v50 = vadd.f32 %v2390_v63, %v2376_v5 }
 0x953   :  { %v5446_v18 = vpop.f32.mrf.mxu1 }
 0x954   :  { %v2377_v16 = vmul.f32 %v5446_v18, %v5446_v18  ;;  %v2354_v36 = vadd.f32 %v2353_v44, %v5446_v18 }
 0x956   :  { %v2392_v61 = vadd.f32 %v2391_v50, %v2377_v16 }
 0x95b   :  { %v5451_v47 = vpop.f32.mrf.mxu1 }
 0x95c   :  { %v2378_v58 = vmul.f32 %v5451_v47, %v5451_v47  ;;  %v2355_v21 = vadd.f32 %v2354_v36, %v5451_v47 }
 0x95e   :  { %v2393_v27 = vadd.f32 %v2392_v61, %v2378_v58 }
 0x963   :  { %v5453_v30 = vpop.f32.mrf.mxu1 }
 0x964   :  { %v2379_v46 = vmul.f32 %v5453_v30, %v5453_v30  ;;  %v2356_v4 = vadd.f32 %v2355_v21, %v5453_v30 }
 0x966   :  { %v2394_v33 = vadd.f32 %v2393_v27, %v2379_v46 }
 0x96b   :  { %v5458_v41 = vpop.f32.mrf.mxu1 }
 0x96c   :  { %v2380_v12 = vmul.f32 %v5458_v41, %v5458_v41  ;;  %v2357_v43 = vadd.f32 %v2356_v4, %v5458_v41 }
 0x96e   :  { %v2395_v32 = vadd.f32 %v2394_v33, %v2380_v12  ;;  %v3633_v33 = vld [vmem:[%s5860_s1 + $0x290] sm:$0xff] }
 0x96f   :  { %2566 = vmatpush.bf16.msra.mxu2 %v3633_v33 }
 0x973   :  { %v5460_v55 = vpop.f32.mrf.mxu1 }
 0x974   :  { %v2381_v31 = vmul.f32 %v5460_v55, %v5460_v55  ;;  %v2358_v35 = vadd.f32 %v2357_v43, %v5460_v55 }
 0x976   :  { %v2396_v38 = vadd.f32 %v2395_v32, %v2381_v31 }
 0x97b   :  { %v5473_v51 = vpop.f32.mrf.mxu1 }
 0x97c   :  { %v2382_v59 = vmul.f32 %v5473_v51, %v5473_v51  ;;  %v2359_v28 = vadd.f32 %v2358_v35, %v5473_v51  ;;  %v3632_v35 = vld [vmem:[%s5860_s1 + $0x288] sm:$0xff] }
 0x97d   :  { %2567 = vmatpush.bf16.msra.mxu2 %v3632_v35 }
 0x97e   :  { %v2397_v0 = vadd.f32 %v2396_v38, %v2382_v59 }
 0x983   :  { %v5487_v54 = vpop.f32.mrf.mxu1 }
 0x984   :  { %v2383_v40 = vmul.f32 %v5487_v54, %v5487_v54  ;;  %v2360_v24 = vadd.f32 %v2359_v28, %v5487_v54 }
 0x986   :  { %v2398_v11 = vadd.f32 %v2397_v0, %v2383_v40  ;;  %v3631_v0 = vld [vmem:[%s5860_s1 + $0x280] sm:$0xff] }
 0x987   :  { %2568 = vmatpush.bf16.msra.mxu2 %v3631_v0 }
 0x98b   :  { %v5501_v29 = vpop.f32.mrf.mxu1 }
 0x98c   :  { %v2384_v52 = vmul.f32 %v5501_v29, %v5501_v29  ;;  %v2361_v19 = vadd.f32 %v2360_v24, %v5501_v29 }
 0x98e   :  { %v2399_v49 = vadd.f32 %v2398_v11, %v2384_v52 }
 0x993   :  { %v2343_v23 = vpop.f32.mrf.mxu1 }
 0x994   :  { %v2362_v10 = vadd.f32 %v2361_v19, %v2343_v23  ;;  %v2385_v13 = vmul.f32 %v2343_v23, %v2343_v23 }
 0x996   :  { %v2363_v9 = vrot.slane %v2362_v10, 4  ;;  %v2400_v5 = vadd.f32 %v2399_v49, %v2385_v13 }
 0x998   :  { %v2364_v63 = vadd.f32 %v2363_v9, %v2362_v10  ;;  %v2401_v44 = vrot.slane %v2400_v5, 4  ;;  %v2346_v10 = vld [vmem:[%s5861_s2 + $0x7] sm:$0x1] }
 0x99a   :  { %v2365_v16 = vrot.slane %v2364_v63, 2  ;;  %v2402_v50 = vadd.f32 %v2401_v44, %v2400_v5 }
 0x99c   :  { %v2366_v36 = vadd.f32 %v2365_v16, %v2364_v63  ;;  %v2403_v58 = vrot.slane %v2402_v50, 2 }
 0x99e   :  { %v2367_v61 = vrot.slane %v2366_v36, 1  ;;  %v2404_v21 = vadd.f32 %v2403_v58, %v2402_v50 }
 0x9a0   :  { %v2368_v46 = vadd.f32 %v2367_v61, %v2366_v36  ;;  %v2405_v27 = vrot.slane %v2404_v21, 1 }
 0x9a2   :  { %v5514_v4 = vmul.f32 %v2368_v46, %v3992_v2  ;;  %v2406_v12 = vadd.f32 %v2405_v27, %v2404_v21 }
 0x9a4   :  { %v2407_v43 = vmul.f32 %v2406_v12, %v3992_v2  ;;  %v2408_v31 = vmul.f32 %v5514_v4, %v5514_v4  ;;  %v2437_v32 = vsub.f32 %v2343_v23, %v5514_v4  ;;  %v2432_v38 = vsub.f32 %v5458_v41, %v5514_v4 }
 0x9a5   :  { %v2433_v28 = vsub.f32 %v5460_v55, %v5514_v4  ;;  %v2434_v24 = vsub.f32 %v5473_v51, %v5514_v4  ;;  %v2435_v52 = vsub.f32 %v5487_v54, %v5514_v4  ;;  %v2436_v11 = vsub.f32 %v5501_v29, %v5514_v4  ;;  %v5547_v29 = vld [vmem:[%s5861_s2 + $0x10] ss:$0 sm:$0xff] }
 0x9a6   :  { %v2409_v59 = vsub.f32 %v2407_v43, %v2408_v31  ;;  %v2422_v5 = vsub.f32 %v5423_v1, %v5514_v4  ;;  %v2423_v63 = vsub.f32 %v5425_v17, %v5514_v4  ;;  %v2430_v1 = vsub.f32 %v5451_v47, %v5514_v4 }
 0x9a7   :  { %v2431_v17 = vsub.f32 %v5453_v30, %v5514_v4  ;;  %v2424_v27 = vsub.f32 %v5430_v22, %v5514_v4  ;;  %v2425_v31 = vsub.f32 %v5432_v34, %v5514_v4 }
 0x9a8   :  { %v2410_v40 = vadd.f32 1e-05, %v2409_v59 }
 0x9aa   :  { %3758 = vrsqrt.f32 %v2410_v40  ;;  %vm2417_vm7 = vweird.f32 %v2410_v40 }
 0x9b0   :  { %v3759_v41 = vpop.eup %3758 }
 0x9b1   :  { %v2412_v19 = vmul.f32 %v3759_v41, %v2410_v40  ;;  %vm2418_vm6 = vweird.f32 %v3759_v41 }
 0x9b2   :  { %vm2419_vm8 = vmor %vm2417_vm7, %vm2418_vm6 }
 0x9b3   :  { %v2413_v55 = vmul.f32 %v3759_v41, %v2412_v19 }
 0x9b5   :  { %v2414_v23 = vmul.f32 0.5, %v2413_v55 }
 0x9b7   :  { %v2415_v49 = vsub.f32 1.5, %v2414_v23 }
 0x9b9   :  { %v2416_v13 = vmul.f32 %v3759_v41, %v2415_v49 }
 0x9bb   :  { %v2420_v51 = vsel %vm2419_vm8, %v3759_v41, %v2416_v13 }
 0x9bc   :  { %v2421_v54 = vmul.f32 %v2420_v51, %v2346_v10 }
 0x9be   :  { %v5542_v9 = vperm.slane %v2421_v54, 0 }
 0x9c0   :  { %v2454_v44 = vmul.f32 %v5542_v9, %v2437_v32  ;;  %v2439_v16 = vmul.f32 %v5542_v9, %v2422_v5  ;;  %v2440_v50 = vmul.f32 %v5542_v9, %v2423_v63  ;;  %v2447_v33 = vmul.f32 %v5542_v9, %v2430_v1 }
 0x9c1   :  { %v2448_v43 = vmul.f32 %v5542_v9, %v2431_v17  ;;  %v2441_v32 = vmul.f32 %v5542_v9, %v2424_v27  ;;  %v2449_v35 = vmul.f32 %v5542_v9, %v2432_v38  ;;  %v2450_v59 = vmul.f32 %v5542_v9, %v2433_v28 }
 0x9c2   :  { %v2471_v36 = vadd.f32 %v5547_v29, %v2454_v44  ;;  %v2456_v58 = vadd.f32 %v5547_v29, %v2439_v16  ;;  %v2457_v61 = vadd.f32 %v5547_v29, %v2440_v50  ;;  %v2464_v47 = vadd.f32 %v5547_v29, %v2447_v33 }
 0x9c3   :  { %v2465_v30 = vadd.f32 %v5547_v29, %v2448_v43  ;;  %v2451_v22 = vmul.f32 %v5542_v9, %v2434_v24  ;;  %v2442_v40 = vmul.f32 %v5542_v9, %v2425_v31  ;;  %v2466_v0 = vadd.f32 %v5547_v29, %v2449_v35 }
 0x9c4   :  { %v2472_v21 = vmax.f32 %v2456_v58, 0.0  ;;  %v2473_v46 = vmax.f32 %v2457_v61, 0.0  ;;  %v2452_v41 = vmul.f32 %v5542_v9, %v2435_v52  ;;  %v2453_v34 = vmul.f32 %v5542_v9, %v2436_v11 }
 0x9c5   :  { %v2480_v19 = vmax.f32 %v2464_v47, 0.0  ;;  %v2481_v55 = vmax.f32 %v2465_v30, 0.0  ;;  %v2467_v38 = vadd.f32 %v5547_v29, %v2450_v59  ;;  %v2468_v23 = vadd.f32 %v5547_v29, %v2451_v22 }
 0x9c6   :  { %v2488_v12 = vpack.c.bf16 %v2473_v46, %v2472_v21  ;;  %v2482_v49 = vmax.f32 %v2466_v0, 0.0  ;;  %v2469_v10 = vadd.f32 %v5547_v29, %v2452_v41  ;;  %v2470_v28 = vadd.f32 %v5547_v29, %v2453_v34 }
 0x9c7   :  { %v2487_v24 = vmax.f32 %v2471_v36, 0.0  ;;  %v2492_v13 = vpack.c.bf16 %v2481_v55, %v2480_v19  ;;  %v2483_v51 = vmax.f32 %v2467_v38, 0.0  ;;  %v2484_v54 = vmax.f32 %v2468_v23, 0.0 }
 0x9c8   :  { %2569 = vmatmul.bf16.vlgmr.msra.gmra.mxu2 %v2488_v12  ;;  %v2485_v5 = vmax.f32 %v2469_v10, 0.0  ;;  %v2486_v63 = vmax.f32 %v2470_v28, 0.0  ;;  %v2458_v52 = vadd.f32 %v5547_v29, %v2441_v32  ;;  %v2459_v11 = vadd.f32 %v5547_v29, %v2442_v40 }
 0x9c9   :  { %v2493_v44 = vpack.c.bf16 %v2483_v51, %v2482_v49  ;;  %v2426_v46 = vsub.f32 %v5437_v3, %v5514_v4  ;;  %v2427_v36 = vsub.f32 %v5439_v6, %v5514_v4  ;;  %v2428_v32 = vsub.f32 %v5444_v25, %v5514_v4 }
 0x9ca   :  { %v2494_v16 = vpack.c.bf16 %v2485_v5, %v2484_v54  ;;  %v2495_v50 = vpack.c.bf16 %v2487_v24, %v2486_v63  ;;  %v2474_v58 = vmax.f32 %v2458_v52, 0.0  ;;  %v2475_v61 = vmax.f32 %v2459_v11, 0.0 }
 0x9cb   :  { %v2443_v1 = vmul.f32 %v5542_v9, %v2426_v46  ;;  %v2444_v17 = vmul.f32 %v5542_v9, %v2427_v36  ;;  %v2429_v3 = vsub.f32 %v5446_v18, %v5514_v4  ;;  %v2445_v6 = vmul.f32 %v5542_v9, %v2428_v32 }
 0x9cc   :  { %v2489_v21 = vpack.c.bf16 %v2475_v61, %v2474_v58 }
 0x9cd   :  { %v2460_v27 = vadd.f32 %v5547_v29, %v2443_v1  ;;  %v2461_v12 = vadd.f32 %v5547_v29, %v2444_v17  ;;  %v2446_v35 = vmul.f32 %v5542_v9, %v2429_v3  ;;  %v2462_v47 = vadd.f32 %v5547_v29, %v2445_v6 }
 0x9cf   :  { %v2476_v33 = vmax.f32 %v2460_v27, 0.0  ;;  %v2477_v43 = vmax.f32 %v2461_v12, 0.0  ;;  %v2463_v30 = vadd.f32 %v5547_v29, %v2446_v35  ;;  %v2478_v59 = vmax.f32 %v2462_v47, 0.0 }
 0x9d1   :  { %v2490_v31 = vpack.c.bf16 %v2477_v43, %v2476_v33  ;;  %v2479_v22 = vmax.f32 %v2463_v30, 0.0 }
 0x9d3   :  { %v2491_v40 = vpack.c.bf16 %v2479_v22, %v2478_v59 }
 0x9d8   :  { %2574 = vmatmul.bf16.gmra.mxu2 %v2489_v21 }
 0x9e8   :  { %2579 = vmatmul.bf16.gmra.mxu2 %v2490_v31 }
 0x9f8   :  { %2584 = vmatmul.bf16.gmra.mxu2 %v2491_v40 }
 0xa08   :  { %2589 = vmatmul.bf16.gmra.mxu2 %v2492_v13 }
 0xa18   :  { %2594 = vmatmul.bf16.gmra.mxu2 %v2493_v44 }
 0xa28   :  { %2599 = vmatmul.bf16.gmra.mxu2 %v2494_v16 }
 0xa38   :  { %2604 = vmatmul.bf16.gmra.mxu2 %v2495_v50 }
 0xa4b   :  { %v5601_v25 = vpop.f32.mrf.mxu2 }
 0xa4c   :  { %v2634_v10 = vmul.f32 %v5601_v25, %v5601_v25 }
 0xa53   :  { %v5603_v0 = vpop.f32.mrf.mxu2 }
 0xa54   :  { %v2635_v49 = vmul.f32 %v5603_v0, %v5603_v0  ;;  %v2612_v28 = vadd.f32 %v5603_v0, %v5601_v25 }
 0xa56   :  { %v2650_v13 = vadd.f32 %v2635_v49, %v2634_v10 }
 0xa5b   :  { %v5605_v18 = vpop.f32.mrf.mxu2 }
 0xa5c   :  { %v2636_v24 = vmul.f32 %v5605_v18, %v5605_v18  ;;  %v2613_v51 = vadd.f32 %v2612_v28, %v5605_v18 }
 0xa5e   :  { %v2651_v63 = vadd.f32 %v2650_v13, %v2636_v24 }
 0xa63   :  { %v5607_v4 = vpop.f32.mrf.mxu2 }
 0xa64   :  { %v2637_v54 = vmul.f32 %v5607_v4, %v5607_v4  ;;  %v2614_v52 = vadd.f32 %v2613_v51, %v5607_v4 }
 0xa66   :  { %v2652_v44 = vadd.f32 %v2651_v63, %v2637_v54 }
 0xa6b   :  { %v5609_v9 = vpop.f32.mrf.mxu2 }
 0xa6c   :  { %v2638_v11 = vmul.f32 %v5609_v9, %v5609_v9  ;;  %v2615_v16 = vadd.f32 %v2614_v52, %v5609_v9 }
 0xa6e   :  { %v2653_v58 = vadd.f32 %v2652_v44, %v2638_v11 }
 0xa73   :  { %v5611_v41 = vpop.f32.mrf.mxu2 }
 0xa74   :  { %v2639_v50 = vmul.f32 %v5611_v41, %v5611_v41  ;;  %v2616_v61 = vadd.f32 %v2615_v16, %v5611_v41 }
 0xa76   :  { %v2654_v46 = vadd.f32 %v2653_v58, %v2639_v50 }
 0xa7b   :  { %v5613_v29 = vpop.f32.mrf.mxu2 }
 0xa7c   :  { %v2640_v21 = vmul.f32 %v5613_v29, %v5613_v29  ;;  %v2617_v36 = vadd.f32 %v2616_v61, %v5613_v29 }
 0xa7e   :  { %v2655_v27 = vadd.f32 %v2654_v46, %v2640_v21 }
 0xa83   :  { %v5615_v34 = vpop.f32.mrf.mxu2 }
 0xa84   :  { %v2641_v1 = vmul.f32 %v5615_v34, %v5615_v34  ;;  %v2618_v12 = vadd.f32 %v2617_v36, %v5615_v34 }
 0xa86   :  { %v2656_v43 = vadd.f32 %v2655_v27, %v2641_v1 }
 0xa8b   :  { %v5617_v19 = vpop.f32.mrf.mxu2 }
 0xa8c   :  { %v2642_v33 = vmul.f32 %v5617_v19, %v5617_v19  ;;  %v2619_v31 = vadd.f32 %v2618_v12, %v5617_v19 }
 0xa8e   :  { %v2657_v3 = vadd.f32 %v2656_v43, %v2642_v33 }
 0xa93   :  { %v5619_v55 = vpop.f32.mrf.mxu2 }
 0xa94   :  { %v2643_v32 = vmul.f32 %v5619_v55, %v5619_v55  ;;  %v2620_v6 = vadd.f32 %v2619_v31, %v5619_v55 }
 0xa96   :  { %v2658_v47 = vadd.f32 %v2657_v3, %v2643_v32 }
 0xa9b   :  { %v5621_v38 = vpop.f32.mrf.mxu2 }
 0xa9c   :  { %v2644_v35 = vmul.f32 %v5621_v38, %v5621_v38  ;;  %v2621_v30 = vadd.f32 %v2620_v6, %v5621_v38 }
 0xa9e   :  { %v2659_v40 = vadd.f32 %v2658_v47, %v2644_v35 }
 0xaa3   :  { %v5623_v23 = vpop.f32.mrf.mxu2 }
 0xaa4   :  { %v2645_v59 = vmul.f32 %v5623_v23, %v5623_v23  ;;  %v2622_v49 = vadd.f32 %v2621_v30, %v5623_v23 }
 0xaa6   :  { %v2660_v28 = vadd.f32 %v2659_v40, %v2645_v59 }
 0xaab   :  { %v5636_v5 = vpop.f32.mrf.mxu2 }
 0xaac   :  { %v2646_v10 = vmul.f32 %v5636_v5, %v5636_v5  ;;  %v2623_v24 = vadd.f32 %v2622_v49, %v5636_v5 }
 0xaae   :  { %v2661_v51 = vadd.f32 %v2660_v28, %v2646_v10 }
 0xab3   :  { %v5650_v17 = vpop.f32.mrf.mxu2 }
 0xab4   :  { %v2647_v13 = vmul.f32 %v5650_v17, %v5650_v17  ;;  %v2624_v54 = vadd.f32 %v2623_v24, %v5650_v17 }
 0xab6   :  { %v2662_v52 = vadd.f32 %v2661_v51, %v2647_v13  ;;  %v2610_v51 = vld [vmem:[%s5861_s2 + $0x8] sm:$0x1] }
 0xabb   :  { %v5664_v22 = vpop.f32.mrf.mxu2 }
 0xabc   :  { %v2648_v63 = vmul.f32 %v5664_v22, %v5664_v22  ;;  %v2625_v11 = vadd.f32 %v2624_v54, %v5664_v22 }
 0xabe   :  { %v2663_v16 = vadd.f32 %v2662_v52, %v2648_v63 }
 0xac3   :  { %v2607_v44 = vpop.f32.mrf.mxu2 }
 0xac4   :  { %v2626_v50 = vadd.f32 %v2625_v11, %v2607_v44  ;;  %v2649_v58 = vmul.f32 %v2607_v44, %v2607_v44 }
 0xac6   :  { %v2627_v61 = vrot.slane %v2626_v50, 4  ;;  %v2664_v21 = vadd.f32 %v2663_v16, %v2649_v58 }
 0xac8   :  { %v2628_v46 = vadd.f32 %v2627_v61, %v2626_v50  ;;  %v2665_v36 = vrot.slane %v2664_v21, 4 }
 0xaca   :  { %v2629_v1 = vrot.slane %v2628_v46, 2  ;;  %v2666_v27 = vadd.f32 %v2665_v36, %v2664_v21 }
 0xacc   :  { %v2630_v12 = vadd.f32 %v2629_v1, %v2628_v46  ;;  %v2667_v33 = vrot.slane %v2666_v27, 2  ;;  %v3677_v46 = vld [vmem:[%s5861_s2 + $0x11] ss:$0 sm:$0xff] }
 0xace   :  { %v2631_v43 = vrot.slane %v2630_v12, 1  ;;  %v2668_v31 = vadd.f32 %v2667_v33, %v2666_v27 }
 0xad0   :  { %v2632_v32 = vadd.f32 %v2631_v43, %v2630_v12  ;;  %v2669_v3 = vrot.slane %v2668_v31, 1 }
 0xad2   :  { %v2633_v6 = vmul.f32 %v2632_v32, %v3992_v2  ;;  %v2670_v35 = vadd.f32 %v2669_v3, %v2668_v31 }
 0xad4   :  { %v2671_v47 = vmul.f32 %v2670_v35, %v3992_v2  ;;  %v2672_v30 = vmul.f32 %v2633_v6, %v2633_v6  ;;  %v2701_v2 = vsub.f32 %v2607_v44, %v2633_v6  ;;  %v2686_v11 = vsub.f32 %v5601_v25, %v2633_v6 }
 0xad5   :  { %v2687_v16 = vsub.f32 %v5603_v0, %v2633_v6  ;;  %v2688_v50 = vsub.f32 %v5605_v18, %v2633_v6  ;;  %v2689_v58 = vsub.f32 %v5607_v4, %v2633_v6  ;;  %v2690_v61 = vsub.f32 %v5609_v9, %v2633_v6 }
 0xad6   :  { %v2673_v59 = vsub.f32 %v2671_v47, %v2672_v30  ;;  %v2691_v36 = vsub.f32 %v5611_v41, %v2633_v6  ;;  %v2692_v1 = vsub.f32 %v5613_v29, %v2633_v6  ;;  %v2693_v44 = vsub.f32 %v5615_v34, %v2633_v6 }
 0xad7   :  { %v2694_v25 = vsub.f32 %v5617_v19, %v2633_v6  ;;  %v2695_v0 = vsub.f32 %v5619_v55, %v2633_v6  ;;  %v2696_v18 = vsub.f32 %v5621_v38, %v2633_v6  ;;  %v2697_v4 = vsub.f32 %v5623_v23, %v2633_v6 }
 0xad8   :  { %v2674_v40 = vadd.f32 1e-05, %v2673_v59  ;;  %v2698_v43 = vsub.f32 %v5636_v5, %v2633_v6  ;;  %v2699_v41 = vsub.f32 %v5650_v17, %v2633_v6  ;;  %v2700_v29 = vsub.f32 %v5664_v22, %v2633_v6 }
 0xada   :  { %3760 = vrsqrt.f32 %v2674_v40  ;;  %vm2681_vm10 = vweird.f32 %v2674_v40 }
 0xae0   :  { %v3761_v49 = vpop.eup %3760 }
 0xae1   :  { %v2676_v10 = vmul.f32 %v3761_v49, %v2674_v40  ;;  %vm2682_vm9 = vweird.f32 %v3761_v49 }
 0xae2   :  { %vm2683_vm11 = vmor %vm2681_vm10, %vm2682_vm9 }
 0xae3   :  { %v2677_v28 = vmul.f32 %v3761_v49, %v2676_v10 }
 0xae5   :  { %v2678_v24 = vmul.f32 0.5, %v2677_v28 }
 0xae7   :  { %v2679_v13 = vsub.f32 1.5, %v2678_v24 }
 0xae9   :  { %v2680_v54 = vmul.f32 %v3761_v49, %v2679_v13 }
 0xaeb   :  { %v2684_v63 = vsel %vm2683_vm11, %v3761_v49, %v2680_v54 }
 0xaec   :  { %v2685_v52 = vmul.f32 %v2684_v63, %v2610_v51 }
 0xaee   :  { %v2702_v21 = vperm.slane %v2685_v52, 0  ;;  %v3762_v52 = vld [vmem:[%s5859_s0] sm:$0xff] }
 0xaf0   :  { %v2718_v9 = vmul.f32 %v2702_v21, %v2701_v2  ;;  %v2703_v27 = vmul.f32 %v2702_v21, %v2686_v11  ;;  %v2704_v12 = vmul.f32 %v2702_v21, %v2687_v16  ;;  %v2705_v33 = vmul.f32 %v2702_v21, %v2688_v50  ;;  %v3763_v11 = vld [vmem:[%s5859_s0 + $0x8] sm:$0xff] }
 0xaf1   :  { %v2706_v31 = vmul.f32 %v2702_v21, %v2689_v58  ;;  %v2707_v19 = vmul.f32 %v2702_v21, %v2690_v61  ;;  %v2708_v32 = vmul.f32 %v2702_v21, %v2691_v36  ;;  %v2709_v55 = vmul.f32 %v2702_v21, %v2692_v1  ;;  %v3764_v61 = vld [vmem:[%s5859_s0 + $0x50] sm:$0xff]  ;;  %v3765_v36 = vld [vmem:[%s5859_s0 + $0x58] sm:$0xff] }
 0xaf2   :  { %v5699_v34 = vadd.f32 %v3677_v46, %v2718_v9  ;;  %v2713_v3 = vmul.f32 %v2702_v21, %v2696_v18  ;;  %v2714_v38 = vmul.f32 %v2702_v21, %v2697_v4  ;;  %v2715_v35 = vmul.f32 %v2702_v21, %v2698_v43  ;;  %v3767_v18 = vld [vmem:[%s5859_s0 + $0x68] sm:$0xff]  ;;  %v3768_v9 = vld [vmem:[%s5859_s0 + $0x70] sm:$0xff] }
 0xaf3   :  { %v2716_v23 = vmul.f32 %v2702_v21, %v2699_v41  ;;  %v2717_v5 = vmul.f32 %v2702_v21, %v2700_v29  ;;  %v2720_v47 = vadd.f32 %v3677_v46, %v2703_v27  ;;  %v2721_v17 = vadd.f32 %v3677_v46, %v2704_v12  ;;  %v3769_v27 = vld [vmem:[%s5859_s0 + $0x10] sm:$0xff] }
 0xaf4   :  { %2751 = vst [vmem:[%s5862_s3 + $0x78] sm:$0xff] %v5699_v34  ;;  %v2722_v30 = vadd.f32 %v3677_v46, %v2705_v33  ;;  %v2710_v22 = vmul.f32 %v2702_v21, %v2693_v44  ;;  %v2711_v6 = vmul.f32 %v2702_v21, %v2694_v25  ;;  %v2723_v59 = vadd.f32 %v3677_v46, %v2706_v31  ;;  %v3766_v25 = vld [vmem:[%s5859_s0 + $0x60] sm:$0xff] }
 0xaf5   :  { %v2712_v40 = vmul.f32 %v2702_v21, %v2695_v0  ;;  %v2724_v49 = vadd.f32 %v3677_v46, %v2707_v19  ;;  %v2725_v10 = vadd.f32 %v3677_v46, %v2708_v32  ;;  %v2730_v28 = vadd.f32 %v3677_v46, %v2713_v3  ;;  %2736 = vst [vmem:[%s5862_s3] sm:$0xff] %v2720_v47  ;;  %v3770_v19 = vld [vmem:[%s5859_s0 + $0x18] sm:$0xff] }
 0xaf6   :  { %v2731_v24 = vadd.f32 %v3677_v46, %v2714_v38  ;;  %v2732_v13 = vadd.f32 %v3677_v46, %v2715_v35  ;;  %v2733_v51 = vadd.f32 %v3677_v46, %v2716_v23  ;;  %v5708_v54 = vadd.f32 %v3677_v46, %v2717_v5  ;;  %2737 = vst [vmem:[%s5862_s3 + $0x8] sm:$0xff] %v2721_v17  ;;  %v3771_v35 = vld [vmem:[%s5859_s0 + $0x20] sm:$0xff] }
 0xaf7   :  { %v5713_v63 = vadd.f32 %v3677_v46, %v2709_v55  ;;  %2738 = vst [vmem:[%s5862_s3 + $0x10] sm:$0xff] %v2722_v30  ;;  %v2786_v2 = vsub.f32 %v2720_v47, %v3762_v52  ;;  %v2787_v16 = vsub.f32 %v2721_v17, %v3763_v11  ;;  %v5724_v50 = vadd.f32 %v3677_v46, %v2710_v22  ;;  %v3774_v11 = vld [vmem:[%s5859_s0 + $0x38] sm:$0xff] }
 0xaf8   :  { %2739 = vst [vmem:[%s5862_s3 + $0x18] sm:$0xff] %v2723_v59  ;;  %v5729_v58 = vadd.f32 %v3677_v46, %v2711_v6  ;;  %v2796_v21 = vsub.f32 %v2730_v28, %v3764_v61  ;;  %v2797_v1 = vsub.f32 %v2731_v24, %v3765_v36  ;;  %v5740_v44 = vadd.f32 %v3677_v46, %v2712_v40 }
 0xaf9   :  { %2740 = vst [vmem:[%s5862_s3 + $0x20] sm:$0xff] %v2724_v49  ;;  %v2798_v0 = vsub.f32 %v2732_v13, %v3766_v25  ;;  %v2799_v4 = vsub.f32 %v2733_v51, %v3767_v18  ;;  %v2800_v46 = vsub.f32 %v5708_v54, %v3768_v9  ;;  %v2788_v12 = vsub.f32 %v2722_v30, %v3769_v27 }
 0xafa   :  { %2741 = vst [vmem:[%s5862_s3 + $0x28] sm:$0xff] %v2725_v10  ;;  %v2898_v33 = vmul.f32 %v2786_v2, %v2786_v2  ;;  %v2899_v43 = vmul.f32 %v2787_v16, %v2787_v16  ;;  %v2914_v41 = vmul.f32 0.5, %v4694_v7  ;;  %v2915_v29 = vmul.f32 0.5, %v4710_v45 }
 0xafb   :  { %2742 = vst [vmem:[%s5862_s3 + $0x30] sm:$0xff] %v5713_v63  ;;  %v5769_v31 = vmul.f32 0.5, %v4824_v15  ;;  %v2789_v7 = vsub.f32 %v2723_v59, %v3770_v19  ;;  %v5778_v32 = vmul.f32 %v2796_v21, %v2796_v21  ;;  %v5780_v45 = vmul.f32 %v2797_v1, %v2797_v1  ;;  %v3772_v59 = vld [vmem:[%s5859_s0 + $0x28] sm:$0xff] }
 0xafc   :  { %2743 = vst [vmem:[%s5862_s3 + $0x38] sm:$0xff] %v5724_v50  ;;  %v5786_v15 = vmul.f32 %v2798_v0, %v2798_v0  ;;  %v5788_v55 = vmul.f32 %v2799_v4, %v2799_v4  ;;  %v5790_v3 = vmul.f32 %v2800_v46, %v2800_v46  ;;  %v5793_v38 = vmul.f32 0.5, %v4843_v42 }
 0xafd   :  { %2744 = vst [vmem:[%s5862_s3 + $0x40] sm:$0xff] %v5729_v58  ;;  %v2790_v23 = vsub.f32 %v2724_v49, %v3771_v35  ;;  %v2900_v5 = vmul.f32 %v2788_v12, %v2788_v12  ;;  %v2930_v47 = vsub.f32 %v2898_v33, %v2914_v41  ;;  %v2931_v17 = vsub.f32 %v2899_v43, %v2915_v29 }
 0xafe   :  { %2745 = vst [vmem:[%s5862_s3 + $0x48] sm:$0xff] %v5740_v44  ;;  %v2916_v30 = vmul.f32 0.5, %v4720_v48  ;;  %v2926_v42 = vmul.f32 0.5, %v4853_v26  ;;  %v2927_v22 = vmul.f32 0.5, %v4869_v39  ;;  %v2928_v6 = vmul.f32 0.5, %v4879_v8 }
 0xaff   :  { %2746 = vst [vmem:[%s5862_s3 + $0x50] sm:$0xff] %v2730_v28  ;;  %v2791_v40 = vsub.f32 %v2725_v10, %v3772_v59  ;;  %v2901_v48 = vmul.f32 %v2789_v7, %v2789_v7  ;;  %v2940_v49 = vsub.f32 %v5778_v32, %v5769_v31  ;;  %v2941_v26 = vsub.f32 %v5780_v45, %v5793_v38  ;;  %v3773_v10 = vld [vmem:[%s5859_s0 + $0x30] sm:$0xff] }
 0xb00   :  { %2747 = vst [vmem:[%s5862_s3 + $0x58] sm:$0xff] %v2731_v24  ;;  %v2917_v39 = vmul.f32 0.5, %v4736_v53  ;;  %v2942_v8 = vsub.f32 %v5786_v15, %v2926_v42  ;;  %v2943_v28 = vsub.f32 %v5788_v55, %v2927_v22  ;;  %v2944_v24 = vsub.f32 %v5790_v3, %v2928_v6  ;;  %v3777_v15 = vld [vmem:[%s5859_s0 + $0x78] sm:$0xff] }
 0xb01   :  { %2748 = vst [vmem:[%s5862_s3 + $0x60] sm:$0xff] %v2732_v13  ;;  %v2792_v53 = vsub.f32 %v5713_v63, %v3773_v10  ;;  %v2902_v13 = vmul.f32 %v2790_v23, %v2790_v23  ;;  %v2932_v52 = vsub.f32 %v2900_v5, %v2916_v30  ;;  %v2918_v2 = vmul.f32 0.5, %v4746_v14  ;;  %v3775_v63 = vld [vmem:[%s5859_s0 + $0x40] sm:$0xff] }
 0xb02   :  { %2749 = vst [vmem:[%s5862_s3 + $0x68] sm:$0xff] %v2733_v51  ;;  %v2946_v51 = vadd.f32 %v2931_v17, %v2930_v47  ;;  %v2793_v16 = vsub.f32 %v5724_v50, %v3774_v11  ;;  %v2903_v61 = vmul.f32 %v2791_v40, %v2791_v40  ;;  %v2933_v21 = vsub.f32 %v2901_v48, %v2917_v39  ;;  %v3776_v50 = vld [vmem:[%s5859_s0 + $0x48] sm:$0xff] }
 0xb03   :  { %2750 = vst [vmem:[%s5862_s3 + $0x70] sm:$0xff] %v5708_v54  ;;  %v2919_v36 = vmul.f32 0.5, %v4762_v37  ;;  %v2794_v1 = vsub.f32 %v5729_v58, %v3775_v63  ;;  %v2904_v25 = vmul.f32 %v2792_v53, %v2792_v53  ;;  %v2934_v0 = vsub.f32 %v2902_v13, %v2918_v2 }
 0xb04   :  { %v2947_v54 = vadd.f32 %v2946_v51, %v2932_v52  ;;  %v2920_v18 = vmul.f32 0.5, %v4772_v56  ;;  %v2795_v4 = vsub.f32 %v5740_v44, %v3776_v50  ;;  %v2905_v9 = vmul.f32 %v2793_v16, %v2793_v16 }
 0xb05   :  { %v2935_v46 = vsub.f32 %v2903_v61, %v2919_v36  ;;  %v2921_v27 = vmul.f32 0.5, %v4788_v60  ;;  %v2906_v12 = vmul.f32 %v2794_v1, %v2794_v1  ;;  %v2922_v58 = vmul.f32 0.5, %v4798_v20 }
 0xb06   :  { %v2948_v14 = vadd.f32 %v2947_v54, %v2933_v21  ;;  %v2936_v33 = vsub.f32 %v2904_v25, %v2920_v18  ;;  %v2907_v41 = vmul.f32 %v2795_v4, %v2795_v4  ;;  %v2923_v56 = vmul.f32 0.5, %v4814_v62 }
 0xb07   :  { %v2937_v29 = vsub.f32 %v2905_v9, %v2921_v27  ;;  %v2938_v19 = vsub.f32 %v2906_v12, %v2922_v58  ;;  %v2801_v60 = vsub.f32 %v5699_v34, %v3777_v15  ;;  %v2929_v35 = vmul.f32 0.5, %v4887_v57 }
 0xb08   :  { %v2949_v37 = vadd.f32 %v2948_v14, %v2934_v0  ;;  %v2939_v32 = vsub.f32 %v2907_v41, %v2923_v56 }
 0xb09   :  { %v2913_v38 = vmul.f32 %v2801_v60, %v2801_v60 }
 0xb0a   :  { %v2950_v43 = vadd.f32 %v2949_v37, %v2935_v46 }
 0xb0b   :  { %v2945_v5 = vsub.f32 %v2913_v38, %v2929_v35 }
 0xb0c   :  { %v2951_v31 = vadd.f32 %v2950_v43, %v2936_v33 }
 0xb0e   :  { %v2952_v7 = vadd.f32 %v2951_v31, %v2937_v29 }
 0xb10   :  { %v2953_v45 = vadd.f32 %v2952_v7, %v2938_v19 }
 0xb12   :  { %v2954_v44 = vadd.f32 %v2953_v45, %v2939_v32 }
 0xb14   :  { %v2955_v55 = vadd.f32 %v2954_v44, %v2940_v49 }
 0xb16   :  { %v2956_v3 = vadd.f32 %v2955_v55, %v2941_v26 }
 0xb18   :  { %v2957_v20 = vadd.f32 %v2956_v3, %v2942_v8 }
 0xb1a   :  { %v2958_v23 = vadd.f32 %v2957_v20, %v2943_v28 }
 0xb1c   :  { %v2959_v62 = vadd.f32 %v2958_v23, %v2944_v24 }
 0xb1e   :  { %v2960_v47 = vadd.f32 %v2959_v62, %v2945_v5 }
 0xb20   :  { %2961 = vadd.xlane.f32.xlu0 %v2960_v47 }
 0xb93   :  { %v2962_v17 = vpop.xlane.xlu0 %2961 }
 0xb94   :  { %v2963_v30 = vrot.slane %v2962_v17, 4 }
 0xb96   :  { %v2964_v42 = vadd.f32 %v2963_v30, %v2962_v17 }
 0xb98   :  { %v2965_v22 = vrot.slane %v2964_v42, 2 }
 0xb9a   :  { %v2966_v6 = vadd.f32 %v2965_v22, %v2964_v42 }
 0xb9c   :  { %v2967_v59 = vrot.slane %v2966_v6, 1 }
 0xb9e   :  { %v2968_v40 = vadd.f32 %v2967_v59, %v2966_v6 }
 0xba0   :  { %3663 = vpush %v2968_v40 }
 0xbd1   :  { %s3664_s28 = spop %3663 }
 0xbd2   :  { %2971 = sst [smem:[#allocation2]] %s3664_s28 }
 0xbd3   :  { %2982 = dma.smem_to_hbm %s3793_s29, 16, %s2980_s27, [#allocation3]  }
 0xbd4   :  { %3790 = dma.done.wait [#allocation3], 16  }
 0xbd5   :  { %3791 = vsyncadd [#allocation3], 4294967280 }
 0xbd6   :  { %2989 = sfence }
 0xbd7   :  { %2990 = vsyncpa [#allocation3], 1 }

</bundles_post_ra>
